<compile_context>
chip_gen: v6e
topology: v6e:2x2x1
jax: 0.10.0
libtpu: 0.0.40
codegen_flags: <defaults>
</compile_context>

<pallas_src>
import functools
import math

import jax
import jax.numpy as jnp
from jax.experimental import pallas as pl
from jax.experimental.pallas import tpu as pltpu

BN_EPS = 1e-5


# ----------------------------------------------------------------------------
# small helpers
# ----------------------------------------------------------------------------
def _round_up(x, m):
    return ((x + m - 1) // m) * m


def _pick_tile(dim, unit, cap):
    """Largest multiple of `unit` that divides `dim` and is <= cap (dim is a multiple of unit)."""
    best = unit
    t = unit
    top = min(dim, cap)
    while t <= top:
        if dim % t == 0:
            best = t
        t += unit
    return best


# ----------------------------------------------------------------------------
# Pallas kernels
# ----------------------------------------------------------------------------
def _matmul_kernel(a_ref, b_ref, bias_ref, o_ref):
    # K is the last grid axis; output block is resident across it -> accumulate in o_ref.
    @pl.when(pl.program_id(2) == 0)
    def _():
        o_ref[...] = jnp.broadcast_to(bias_ref[...], o_ref.shape)

    o_ref[...] += jnp.dot(a_ref[...], b_ref[...],
                          preferred_element_type=jnp.float32)


def _bn_stats_kernel(x_ref, sum_ref, ssq_ref):
    @pl.when(pl.program_id(0) == 0)
    def _():
        sum_ref[...] = jnp.zeros_like(sum_ref)
        ssq_ref[...] = jnp.zeros_like(ssq_ref)

    x = x_ref[...]
    sum_ref[...] += jnp.sum(x, axis=0, keepdims=True)
    ssq_ref[...] += jnp.sum(x * x, axis=0, keepdims=True)


def _bn_apply_kernel(x_ref, scale_ref, shift_ref, o_ref, *, relu):
    y = x_ref[...] * scale_ref[...] + shift_ref[...]
    if relu:
        y = jnp.maximum(y, 0.0)
    o_ref[...] = y.astype(o_ref.dtype)


def _gap_kernel(x_ref, o_ref):
    @pl.when(pl.program_id(1) == 0)
    def _():
        o_ref[...] = jnp.zeros_like(o_ref)

    o_ref[...] += jnp.sum(x_ref[...], axis=1, keepdims=True)


# ----------------------------------------------------------------------------
# Wrappers
# ----------------------------------------------------------------------------
def _pack_gemm(w_hwio, bias):
    """HWIO conv weight + bias -> bf16 [Kp, Np] GEMM weight (pad once at init)."""
    KH, KW, Cin, Cout = w_hwio.shape
    K = KH * KW * Cin
    Kp = _round_up(K, 128)
    Np = _round_up(Cout, 128)
    w2d = jnp.pad(w_hwio.reshape(K, Cout).astype(jnp.bfloat16),
                  ((0, Kp - K), (0, Np - Cout)))
    b2d = jnp.pad(bias.astype(jnp.float32).reshape(1, Cout),
                  ((0, 0), (0, Np - Cout)))
    return {"w": w2d, "bias": b2d, "k": K, "n": Cout}


def pallas_conv_gemm(a, wp):
    """a: [M, K] (any float) x packed weight wp -> [M, n_out] f32 (bias fused)."""
    M, K = a.shape
    assert K == wp["k"], (K, wp["k"])
    w2d, b2d = wp["w"], wp["bias"]
    Kp, Np = w2d.shape

    a = a.astype(jnp.bfloat16)
    Mp = _round_up(M, 16)
    if Mp != M or Kp != K:
        a = jnp.pad(a, ((0, Mp - M), (0, Kp - K)))

    TM = _pick_tile(Mp, 16, 256)
    TN = _pick_tile(Np, 128, 512)
    TK = _pick_tile(Kp, 128, 512)
    grid = (Mp // TM, Np // TN, Kp // TK)

    out = pl.pallas_call(
        _matmul_kernel,
        out_shape=jax.ShapeDtypeStruct((Mp, Np), jnp.float32),
        grid_spec=pltpu.PrefetchScalarGridSpec(
            num_scalar_prefetch=0,
            grid=grid,
            in_specs=[
                pl.BlockSpec((TM, TK), lambda i, j, k: (i, k)),
                pl.BlockSpec((TK, TN), lambda i, j, k: (k, j)),
                pl.BlockSpec((1, TN), lambda i, j, k: (0, j)),
            ],
            out_specs=pl.BlockSpec((TM, TN), lambda i, j, k: (i, j)),
        ),
        compiler_params=pltpu.CompilerParams(
            dimension_semantics=("parallel", "parallel", "arbitrary"),
            vmem_limit_bytes=64 * 1024 * 1024,
        ),
    )(a, w2d, b2d)
    return out[:M, :wp["n"]]


def pallas_batchnorm_relu(x2d, gamma, beta, out_dtype=jnp.bfloat16, relu=True):
    """Training-mode batch norm (batch stats, biased var) + optional fused ReLU."""
    M, C = x2d.shape
    Mp = _round_up(M, 16)
    xpad = jnp.pad(x2d, ((0, Mp - M), (0, 0))) if Mp != M else x2d
    TM = _pick_tile(Mp, 16, 1024)

    s, ss = pl.pallas_call(
        _bn_stats_kernel,
        out_shape=(jax.ShapeDtypeStruct((1, C), jnp.float32),
                   jax.ShapeDtypeStruct((1, C), jnp.float32)),
        grid_spec=pltpu.PrefetchScalarGridSpec(
            num_scalar_prefetch=0,
            grid=(Mp // TM,),
            in_specs=[pl.BlockSpec((TM, C), lambda i: (i, 0))],
            out_specs=[pl.BlockSpec((1, C), lambda i: (0, 0)),
                       pl.BlockSpec((1, C), lambda i: (0, 0))],
        ),
        compiler_params=pltpu.CompilerParams(dimension_semantics=("arbitrary",)),
    )(xpad)

    # per-channel math on tiny [1, C] vectors (glue)
    mean = s / float(M)
    var = jnp.maximum(ss / float(M) - mean * mean, 0.0)      # biased variance
    inv = jax.lax.rsqrt(var + BN_EPS)
    scale = gamma.reshape(1, C).astype(jnp.float32) * inv
    shift = beta.reshape(1, C).astype(jnp.float32) - mean * scale

    y = pl.pallas_call(
        functools.partial(_bn_apply_kernel, relu=relu),
        out_shape=jax.ShapeDtypeStruct((Mp, C), out_dtype),
        grid_spec=pltpu.PrefetchScalarGridSpec(
            num_scalar_prefetch=0,
            grid=(Mp // TM,),
            in_specs=[pl.BlockSpec((TM, C), lambda i: (i, 0)),
                      pl.BlockSpec((1, C), lambda i: (0, 0)),
                      pl.BlockSpec((1, C), lambda i: (0, 0))],
            out_specs=pl.BlockSpec((TM, C), lambda i: (i, 0)),
        ),
        compiler_params=pltpu.CompilerParams(dimension_semantics=("parallel",)),
    )(xpad, scale, shift)
    return y[:M]


def pallas_global_avg_pool(x_nhwc):
    """[N, H, W, C] -> [N, C] spatial mean (tiled channel-sum reduction)."""
    N, H, W, C = x_nhwc.shape
    M = H * W
    x3 = x_nhwc.reshape(N, M, C)
    Mp = _round_up(M, 8)
    if Mp != M:
        x3 = jnp.pad(x3, ((0, 0), (0, Mp - M), (0, 0)))
    TM = _pick_tile(Mp, 8, 1024)

    s = pl.pallas_call(
        _gap_kernel,
        out_shape=jax.ShapeDtypeStruct((N, 1, C), jnp.float32),
        grid_spec=pltpu.PrefetchScalarGridSpec(
            num_scalar_prefetch=0,
            grid=(N, Mp // TM),
            in_specs=[pl.BlockSpec((1, TM, C), lambda b, m: (b, m, 0))],
            out_specs=pl.BlockSpec((1, 1, C), lambda b, m: (b, 0, 0)),
        ),
        compiler_params=pltpu.CompilerParams(
            dimension_semantics=("parallel", "arbitrary")),
    )(x3)
    return s.reshape(N, C) / float(M)


def _im2col_3x3(x_bf, dilation):
    """stride-1, pad=dilation 3x3 dilated conv patches: [N*H*W, 9*C] bf16."""
    N, H, W, C = x_bf.shape
    d = dilation
    xp = jnp.pad(x_bf, ((0, 0), (d, d), (d, d), (0, 0)))
    cols = [xp[:, i * d:i * d + H, j * d:j * d + W, :]
            for i in range(3) for j in range(3)]
    return jnp.concatenate(cols, axis=-1).reshape(N * H * W, 9 * C)


# ----------------------------------------------------------------------------
# ASPP module (params + forward)
# ----------------------------------------------------------------------------
def init_aspp_params(key, dim_in, dim_out):
    keys = iter(jax.random.split(key, 6))

    def conv_params(kh, kw, cin, cout):
        wk, bk = jax.random.split(next(keys))
        fan_in = kh * kw * cin
        bound = 1.0 / math.sqrt(fan_in)       # PyTorch default conv init bounds
        w = jax.random.uniform(wk, (kh, kw, cin, cout), jnp.float32, -bound, bound)
        b = jax.random.uniform(bk, (cout,), jnp.float32, -bound, bound)
        p = _pack_gemm(w, b)
        p["gamma"] = jnp.ones((cout,), jnp.float32)
        p["beta"] = jnp.zeros((cout,), jnp.float32)
        return p

    return {
        "b1": conv_params(1, 1, dim_in, dim_out),
        "b2": conv_params(3, 3, dim_in, dim_out),
        "b3": conv_params(3, 3, dim_in, dim_out),
        "b4": conv_params(3, 3, dim_in, dim_out),
        "b5": conv_params(1, 1, dim_in, dim_out),
        "cat": conv_params(1, 1, dim_out * 5, dim_out),
    }


def aspp_forward(params, x_nchw, rate=1):
    x = jnp.transpose(x_nchw, (0, 2, 3, 1)).astype(jnp.float32)   # NCHW -> NHWC
    N, H, W, Cin = x.shape
    M = N * H * W
    dim_out = params["b1"]["n"]
    x_bf = x.astype(jnp.bfloat16)

    def conv_bn_relu(a2d, p, out_dtype=jnp.bfloat16):
        y = pallas_conv_gemm(a2d, p)
        return pallas_batchnorm_relu(y, p["gamma"], p["beta"],
                                     out_dtype=out_dtype, relu=True)

    # branch1: 1x1 conv (dilation irrelevant) + BN + ReLU
    branch_outs = [conv_bn_relu(x_bf.reshape(M, Cin), params["b1"])]

    # branches 2-4: 3x3 dilated convs + BN + ReLU
    for name, mult in (("b2", 6), ("b3", 12), ("b4", 18)):
        patches = _im2col_3x3(x_bf, mult * rate)
        branch_outs.append(conv_bn_relu(patches, params[name]))

    # branch5: global average pool -> 1x1 conv -> BN -> ReLU -> bilinear upsample.
    # Bilinear interpolation of a 1x1 map (align_corners=True) is a pure broadcast.
    g = pallas_global_avg_pool(x)                                  # [N, Cin]
    g = conv_bn_relu(g.astype(jnp.bfloat16), params["b5"])         # [N, dim_out]
    g_full = jnp.broadcast_to(g[:, None, :], (N, H * W, dim_out)).reshape(M, dim_out)
    branch_outs.append(g_full)

    # concat (bf16) -> 1x1 conv_cat -> BN -> ReLU
    cat = jnp.concatenate(branch_outs, axis=-1)                    # [M, 5*dim_out]
    y = pallas_conv_gemm(cat, params["cat"])
    y = pallas_batchnorm_relu(y, params["cat"]["gamma"], params["cat"]["beta"],
                              out_dtype=jnp.float32, relu=True)
    y = y.reshape(N, H, W, dim_out)
    return jnp.transpose(y, (0, 3, 1, 2))                          # NHWC -> NCHW


# ----------------------------------------------------------------------------
if __name__ == "__main__":
    key = jax.random.PRNGKey(0)
    dim_in, dim_out, rate = 128, 128, 1
    params = init_aspp_params(key, dim_in, dim_out)

    # small NCHW input (batch=2 so training-mode BN on the pooled branch is well defined)
    x = jax.random.normal(jax.random.fold_in(key, 12345),
                          (2, dim_in, 16, 16), jnp.float32)

    fwd = jax.jit(lambda inp: aspp_forward(params, inp, rate=rate))
    out = jax.block_until_ready(fwd(x))

    assert out.shape == (2, dim_out, 16, 16), out.shape
    assert bool(jnp.all(jnp.isfinite(out)))
    print("KERNEL_OK")
</pallas_src>

<mosaic_0001>
module attributes {stable_mosaic.version = 11 : i64} {
  func.func @_matmul_kernel(%arg0: i32, %arg1: i32, %arg2: i32, %arg3: memref<256x384xbf16, #tpu.memory_space<vmem>>, %arg4: memref<384x128xbf16, #tpu.memory_space<vmem>>, %arg5: memref<1x128xf32, #tpu.memory_space<vmem>>, %arg6: memref<256x128xf32, #tpu.memory_space<vmem>>) attributes {dimension_semantics = [#tpu.dimension_semantics<parallel>, #tpu.dimension_semantics<parallel>, #tpu.dimension_semantics<arbitrary>], iteration_bounds = array<i64: 2, 1, 3>, scalar_prefetch = 0 : i64, scratch_operands = 0 : i64, tpu.core_type = #tpu.core_type<tc>, window_params = [{transform_indices = @transform_0, window_bounds = array<i64: 256, 384>}, {transform_indices = @transform_1, window_bounds = array<i64: 384, 128>}, {transform_indices = @transform_2, window_bounds = array<i64: 1, 128>}, {transform_indices = @transform_3, window_bounds = array<i64: 256, 128>}]} {
    %c0_i32 = arith.constant 0 : i32
    %0 = arith.cmpi eq, %arg2, %c0_i32 : i32
    %1 = arith.extui %0 : i1 to i32
    %c0_i32_0 = arith.constant 0 : i32
    %2 = arith.cmpi ne, %1, %c0_i32_0 : i32
    scf.if %2 {
      %c0_8 = arith.constant 0 : index
      %c0_9 = arith.constant 0 : index
      %9 = vector.load %arg5[%c0_8, %c0_9] : memref<1x128xf32, #tpu.memory_space<vmem>>, vector<1x128xf32>
      %10 = vector.shape_cast %9 : vector<1x128xf32> to vector<1x128xf32>
      %11 = vector.broadcast %10 : vector<1x128xf32> to vector<256x128xf32>
      %c0_10 = arith.constant 0 : index
      %c0_11 = arith.constant 0 : index
      %12 = vector.load %arg6[%c0_10, %c0_11] : memref<256x128xf32, #tpu.memory_space<vmem>>, vector<256x128xf32>
      tpu.vector_store %arg6[%c0_10, %c0_11], %11 {strides = array<i32>} : memref<256x128xf32, #tpu.memory_space<vmem>>, vector<256x128xf32>,
    } else {
    }
    %c0 = arith.constant 0 : index
    %c0_1 = arith.constant 0 : index
    %3 = vector.load %arg6[%c0, %c0_1] : memref<256x128xf32, #tpu.memory_space<vmem>>, vector<256x128xf32>
    %c0_2 = arith.constant 0 : index
    %c0_3 = arith.constant 0 : index
    %4 = vector.load %arg3[%c0_2, %c0_3] : memref<256x384xbf16, #tpu.memory_space<vmem>>, vector<256x384xbf16>
    %c0_4 = arith.constant 0 : index
    %c0_5 = arith.constant 0 : index
    %5 = vector.load %arg4[%c0_4, %c0_5] : memref<384x128xbf16, #tpu.memory_space<vmem>>, vector<384x128xbf16>
    %cst = arith.constant dense<0.000000e+00> : vector<256x128xf32>
    %6 = tpu.matmul %4, %5, %cst {dimension_numbers = #tpu.dot_dimension_numbers<[1], [0], [0], [1], [0, 0, 1, 1], [], []>} : vector<256x384xbf16>, vector<384x128xbf16>, vector<256x128xf32> -> vector<256x128xf32>
    %7 = arith.addf %3, %6 : vector<256x128xf32>
    %c0_6 = arith.constant 0 : index
    %c0_7 = arith.constant 0 : index
    %8 = vector.load %arg6[%c0_6, %c0_7] : memref<256x128xf32, #tpu.memory_space<vmem>>, vector<256x128xf32>
    tpu.vector_store %arg6[%c0_6, %c0_7], %7 {strides = array<i32>} : memref<256x128xf32, #tpu.memory_space<vmem>>, vector<256x128xf32>,
    return
  }
  func.func @transform_0(%arg0: i32, %arg1: i32, %arg2: i32) -> (i32, i32) {
    %c0_i32 = arith.constant 0 : i32
    return %arg0, %arg2 : i32, i32
  }
  func.func @transform_1(%arg0: i32, %arg1: i32, %arg2: i32) -> (i32, i32) {
    %c0_i32 = arith.constant 0 : i32
    return %arg2, %arg1 : i32, i32
  }
  func.func @transform_2(%arg0: i32, %arg1: i32, %arg2: i32) -> (i32, i32) {
    %c0_i32 = arith.constant 0 : i32
    %c0_i32_0 = arith.constant 0 : i32
    return %c0_i32, %arg1 : i32, i32
  }
  func.func @transform_3(%arg0: i32, %arg1: i32, %arg2: i32) -> (i32, i32) {
    %c0_i32 = arith.constant 0 : i32
    return %arg0, %arg1 : i32, i32
  }
}

module attributes {stable_mosaic.version = 11 : i64} {
  func.func @_bn_stats_kernel(%arg0: i32, %arg1: memref<512x128xf32, #tpu.memory_space<vmem>>, %arg2: memref<1x128xf32, #tpu.memory_space<vmem>>, %arg3: memref<1x128xf32, #tpu.memory_space<vmem>>) attributes {dimension_semantics = [#tpu.dimension_semantics<arbitrary>], iteration_bounds = array<i64: 1>, scalar_prefetch = 0 : i64, scratch_operands = 0 : i64, tpu.core_type = #tpu.core_type<tc>, window_params = [{transform_indices = @transform_0, window_bounds = array<i64: 512, 128>}, {pipeline_mode = #tpu.pipeline_mode<synchronous>, transform_indices = @transform_1, window_bounds = array<i64: 1, 128>}, {pipeline_mode = #tpu.pipeline_mode<synchronous>, transform_indices = @transform_2, window_bounds = array<i64: 1, 128>}]} {
    %c0_i32 = arith.constant 0 : i32
    %0 = arith.cmpi eq, %arg0, %c0_i32 : i32
    %1 = arith.extui %0 : i1 to i32
    %c0_i32_0 = arith.constant 0 : i32
    %2 = arith.cmpi ne, %1, %c0_i32_0 : i32
    scf.if %2 {
      %cst_11 = arith.constant 0.000000e+00 : f32
      %15 = vector.broadcast %cst_11 : f32 to vector<1x128xf32>
      %c0_12 = arith.constant 0 : index
      %c0_13 = arith.constant 0 : index
      %16 = vector.load %arg2[%c0_12, %c0_13] : memref<1x128xf32, #tpu.memory_space<vmem>>, vector<1x128xf32>
      tpu.vector_store %arg2[%c0_12, %c0_13], %15 {strides = array<i32>} : memref<1x128xf32, #tpu.memory_space<vmem>>, vector<1x128xf32>,
      %cst_14 = arith.constant 0.000000e+00 : f32
      %17 = vector.broadcast %cst_14 : f32 to vector<1x128xf32>
      %c0_15 = arith.constant 0 : index
      %c0_16 = arith.constant 0 : index
      %18 = vector.load %arg3[%c0_15, %c0_16] : memref<1x128xf32, #tpu.memory_space<vmem>>, vector<1x128xf32>
      tpu.vector_store %arg3[%c0_15, %c0_16], %17 {strides = array<i32>} : memref<1x128xf32, #tpu.memory_space<vmem>>, vector<1x128xf32>,
    } else {
    }
    %c0 = arith.constant 0 : index
    %c0_1 = arith.constant 0 : index
    %3 = vector.load %arg1[%c0, %c0_1] : memref<512x128xf32, #tpu.memory_space<vmem>>, vector<512x128xf32>
    %c0_2 = arith.constant 0 : index
    %c0_3 = arith.constant 0 : index
    %4 = vector.load %arg2[%c0_2, %c0_3] : memref<1x128xf32, #tpu.memory_space<vmem>>, vector<1x128xf32>
    %cst = arith.constant dense<0.000000e+00> : vector<128xf32>
    %5 = vector.multi_reduction <add>, %3, %cst [0] : vector<512x128xf32> to vector<128xf32>
    %6 = vector.shape_cast %5 : vector<128xf32> to vector<1x128xf32>
    %7 = arith.addf %4, %6 : vector<1x128xf32>
    %c0_4 = arith.constant 0 : index
    %c0_5 = arith.constant 0 : index
    %8 = vector.load %arg2[%c0_4, %c0_5] : memref<1x128xf32, #tpu.memory_space<vmem>>, vector<1x128xf32>
    tpu.vector_store %arg2[%c0_4, %c0_5], %7 {strides = array<i32>} : memref<1x128xf32, #tpu.memory_space<vmem>>, vector<1x128xf32>,
    %c0_6 = arith.constant 0 : index
    %c0_7 = arith.constant 0 : index
    %9 = vector.load %arg3[%c0_6, %c0_7] : memref<1x128xf32, #tpu.memory_space<vmem>>, vector<1x128xf32>
    %10 = arith.mulf %3, %3 : vector<512x128xf32>
    %cst_8 = arith.constant dense<0.000000e+00> : vector<128xf32>
    %11 = vector.multi_reduction <add>, %10, %cst_8 [0] : vector<512x128xf32> to vector<128xf32>
    %12 = vector.shape_cast %11 : vector<128xf32> to vector<1x128xf32>
    %13 = arith.addf %9, %12 : vector<1x128xf32>
    %c0_9 = arith.constant 0 : index
    %c0_10 = arith.constant 0 : index
    %14 = vector.load %arg3[%c0_9, %c0_10] : memref<1x128xf32, #tpu.memory_space<vmem>>, vector<1x128xf32>
    tpu.vector_store %arg3[%c0_9, %c0_10], %13 {strides = array<i32>} : memref<1x128xf32, #tpu.memory_space<vmem>>, vector<1x128xf32>,
    return
  }
  func.func @transform_0(%arg0: i32) -> (i32, i32) {
    %c0_i32 = arith.constant 0 : i32
    %c0_i32_0 = arith.constant 0 : i32
    return %arg0, %c0_i32 : i32, i32
  }
  func.func @transform_1(%arg0: i32) -> (i32, i32) {
    %c0_i32 = arith.constant 0 : i32
    %c0_i32_0 = arith.constant 0 : i32
    %c0_i32_1 = arith.constant 0 : i32
    return %c0_i32, %c0_i32_0 : i32, i32
  }
  func.func @transform_2(%arg0: i32) -> (i32, i32) {
    %c0_i32 = arith.constant 0 : i32
    %c0_i32_0 = arith.constant 0 : i32
    %c0_i32_1 = arith.constant 0 : i32
    return %c0_i32, %c0_i32_0 : i32, i32
  }
}

module attributes {stable_mosaic.version = 11 : i64} {
  func.func @_bn_apply_kernel(%arg0: i32, %arg1: memref<512x128xf32, #tpu.memory_space<vmem>>, %arg2: memref<1x128xf32, #tpu.memory_space<vmem>>, %arg3: memref<1x128xf32, #tpu.memory_space<vmem>>, %arg4: memref<512x128xbf16, #tpu.memory_space<vmem>>) attributes {dimension_semantics = [#tpu.dimension_semantics<parallel>], iteration_bounds = array<i64: 1>, scalar_prefetch = 0 : i64, scratch_operands = 0 : i64, tpu.core_type = #tpu.core_type<tc>, window_params = [{transform_indices = @transform_0, window_bounds = array<i64: 512, 128>}, {pipeline_mode = #tpu.pipeline_mode<synchronous>, transform_indices = @transform_1, window_bounds = array<i64: 1, 128>}, {pipeline_mode = #tpu.pipeline_mode<synchronous>, transform_indices = @transform_2, window_bounds = array<i64: 1, 128>}, {transform_indices = @transform_3, window_bounds = array<i64: 512, 128>}]} {
    %c0 = arith.constant 0 : index
    %c0_0 = arith.constant 0 : index
    %0 = vector.load %arg1[%c0, %c0_0] : memref<512x128xf32, #tpu.memory_space<vmem>>, vector<512x128xf32>
    %c0_1 = arith.constant 0 : index
    %c0_2 = arith.constant 0 : index
    %1 = vector.load %arg2[%c0_1, %c0_2] : memref<1x128xf32, #tpu.memory_space<vmem>>, vector<1x128xf32>
    %2 = vector.broadcast %1 : vector<1x128xf32> to vector<512x128xf32>
    %3 = arith.mulf %0, %2 : vector<512x128xf32>
    %c0_3 = arith.constant 0 : index
    %c0_4 = arith.constant 0 : index
    %4 = vector.load %arg3[%c0_3, %c0_4] : memref<1x128xf32, #tpu.memory_space<vmem>>, vector<1x128xf32>
    %5 = vector.broadcast %4 : vector<1x128xf32> to vector<512x128xf32>
    %6 = arith.addf %3, %5 : vector<512x128xf32>
    %cst = arith.constant 0.000000e+00 : f32
    %7 = vector.broadcast %cst : f32 to vector<512x128xf32>
    %8 = arith.maximumf %6, %7 : vector<512x128xf32>
    %9 = arith.truncf %8 : vector<512x128xf32> to vector<512x128xbf16>
    %c0_5 = arith.constant 0 : index
    %c0_6 = arith.constant 0 : index
    %10 = vector.load %arg4[%c0_5, %c0_6] : memref<512x128xbf16, #tpu.memory_space<vmem>>, vector<512x128xbf16>
    tpu.vector_store %arg4[%c0_5, %c0_6], %9 {strides = array<i32>} : memref<512x128xbf16, #tpu.memory_space<vmem>>, vector<512x128xbf16>,
    return
  }
  func.func @transform_0(%arg0: i32) -> (i32, i32) {
    %c0_i32 = arith.constant 0 : i32
    %c0_i32_0 = arith.constant 0 : i32
    return %arg0, %c0_i32 : i32, i32
  }
  func.func @transform_1(%arg0: i32) -> (i32, i32) {
    %c0_i32 = arith.constant 0 : i32
    %c0_i32_0 = arith.constant 0 : i32
    %c0_i32_1 = arith.constant 0 : i32
    return %c0_i32, %c0_i32_0 : i32, i32
  }
  func.func @transform_2(%arg0: i32) -> (i32, i32) {
    %c0_i32 = arith.constant 0 : i32
    %c0_i32_0 = arith.constant 0 : i32
    %c0_i32_1 = arith.constant 0 : i32
    return %c0_i32, %c0_i32_0 : i32, i32
  }
  func.func @transform_3(%arg0: i32) -> (i32, i32) {
    %c0_i32 = arith.constant 0 : i32
    %c0_i32_0 = arith.constant 0 : i32
    return %arg0, %c0_i32 : i32, i32
  }
}

module attributes {stable_mosaic.version = 11 : i64} {
  func.func @_matmul_kernel(%arg0: i32, %arg1: i32, %arg2: i32, %arg3: memref<256x128xbf16, #tpu.memory_space<vmem>>, %arg4: memref<128x128xbf16, #tpu.memory_space<vmem>>, %arg5: memref<1x128xf32, #tpu.memory_space<vmem>>, %arg6: memref<256x128xf32, #tpu.memory_space<vmem>>) attributes {dimension_semantics = [#tpu.dimension_semantics<parallel>, #tpu.dimension_semantics<parallel>, #tpu.dimension_semantics<arbitrary>], iteration_bounds = array<i64: 2, 1, 1>, scalar_prefetch = 0 : i64, scratch_operands = 0 : i64, tpu.core_type = #tpu.core_type<tc>, window_params = [{transform_indices = @transform_0, window_bounds = array<i64: 256, 128>}, {transform_indices = @transform_1, window_bounds = array<i64: 128, 128>}, {transform_indices = @transform_2, window_bounds = array<i64: 1, 128>}, {transform_indices = @transform_3, window_bounds = array<i64: 256, 128>}]} {
    %c0_i32 = arith.constant 0 : i32
    %0 = arith.cmpi eq, %arg2, %c0_i32 : i32
    %1 = arith.extui %0 : i1 to i32
    %c0_i32_0 = arith.constant 0 : i32
    %2 = arith.cmpi ne, %1, %c0_i32_0 : i32
    scf.if %2 {
      %c0_8 = arith.constant 0 : index
      %c0_9 = arith.constant 0 : index
      %9 = vector.load %arg5[%c0_8, %c0_9] : memref<1x128xf32, #tpu.memory_space<vmem>>, vector<1x128xf32>
      %10 = vector.shape_cast %9 : vector<1x128xf32> to vector<1x128xf32>
      %11 = vector.broadcast %10 : vector<1x128xf32> to vector<256x128xf32>
      %c0_10 = arith.constant 0 : index
      %c0_11 = arith.constant 0 : index
      %12 = vector.load %arg6[%c0_10, %c0_11] : memref<256x128xf32, #tpu.memory_space<vmem>>, vector<256x128xf32>
      tpu.vector_store %arg6[%c0_10, %c0_11], %11 {strides = array<i32>} : memref<256x128xf32, #tpu.memory_space<vmem>>, vector<256x128xf32>,
    } else {
    }
    %c0 = arith.constant 0 : index
    %c0_1 = arith.constant 0 : index
    %3 = vector.load %arg6[%c0, %c0_1] : memref<256x128xf32, #tpu.memory_space<vmem>>, vector<256x128xf32>
    %c0_2 = arith.constant 0 : index
    %c0_3 = arith.constant 0 : index
    %4 = vector.load %arg3[%c0_2, %c0_3] : memref<256x128xbf16, #tpu.memory_space<vmem>>, vector<256x128xbf16>
    %c0_4 = arith.constant 0 : index
    %c0_5 = arith.constant 0 : index
    %5 = vector.load %arg4[%c0_4, %c0_5] : memref<128x128xbf16, #tpu.memory_space<vmem>>, vector<128x128xbf16>
    %cst = arith.constant dense<0.000000e+00> : vector<256x128xf32>
    %6 = tpu.matmul %4, %5, %cst {dimension_numbers = #tpu.dot_dimension_numbers<[1], [0], [0], [1], [0, 0, 1, 1], [], []>} : vector<256x128xbf16>, vector<128x128xbf16>, vector<256x128xf32> -> vector<256x128xf32>
    %7 = arith.addf %3, %6 : vector<256x128xf32>
    %c0_6 = arith.constant 0 : index
    %c0_7 = arith.constant 0 : index
    %8 = vector.load %arg6[%c0_6, %c0_7] : memref<256x128xf32, #tpu.memory_space<vmem>>, vector<256x128xf32>
    tpu.vector_store %arg6[%c0_6, %c0_7], %7 {strides = array<i32>} : memref<256x128xf32, #tpu.memory_space<vmem>>, vector<256x128xf32>,
    return
  }
  func.func @transform_0(%arg0: i32, %arg1: i32, %arg2: i32) -> (i32, i32) {
    %c0_i32 = arith.constant 0 : i32
    return %arg0, %arg2 : i32, i32
  }
  func.func @transform_1(%arg0: i32, %arg1: i32, %arg2: i32) -> (i32, i32) {
    %c0_i32 = arith.constant 0 : i32
    return %arg2, %arg1 : i32, i32
  }
  func.func @transform_2(%arg0: i32, %arg1: i32, %arg2: i32) -> (i32, i32) {
    %c0_i32 = arith.constant 0 : i32
    %c0_i32_0 = arith.constant 0 : i32
    return %c0_i32, %arg1 : i32, i32
  }
  func.func @transform_3(%arg0: i32, %arg1: i32, %arg2: i32) -> (i32, i32) {
    %c0_i32 = arith.constant 0 : i32
    return %arg0, %arg1 : i32, i32
  }
}

module attributes {stable_mosaic.version = 11 : i64} {
  func.func @_matmul_kernel(%arg0: i32, %arg1: i32, %arg2: i32, %arg3: memref<16x128xbf16, #tpu.memory_space<vmem>>, %arg4: memref<128x128xbf16, #tpu.memory_space<vmem>>, %arg5: memref<1x128xf32, #tpu.memory_space<vmem>>, %arg6: memref<16x128xf32, #tpu.memory_space<vmem>>) attributes {dimension_semantics = [#tpu.dimension_semantics<parallel>, #tpu.dimension_semantics<parallel>, #tpu.dimension_semantics<arbitrary>], iteration_bounds = array<i64: 1, 1, 1>, scalar_prefetch = 0 : i64, scratch_operands = 0 : i64, tpu.core_type = #tpu.core_type<tc>, window_params = [{transform_indices = @transform_0, window_bounds = array<i64: 16, 128>}, {transform_indices = @transform_1, window_bounds = array<i64: 128, 128>}, {transform_indices = @transform_2, window_bounds = array<i64: 1, 128>}, {transform_indices = @transform_3, window_bounds = array<i64: 16, 128>}]} {
    %c0_i32 = arith.constant 0 : i32
    %0 = arith.cmpi eq, %arg2, %c0_i32 : i32
    %1 = arith.extui %0 : i1 to i32
    %c0_i32_0 = arith.constant 0 : i32
    %2 = arith.cmpi ne, %1, %c0_i32_0 : i32
    scf.if %2 {
      %c0_8 = arith.constant 0 : index
      %c0_9 = arith.constant 0 : index
      %9 = vector.load %arg5[%c0_8, %c0_9] : memref<1x128xf32, #tpu.memory_space<vmem>>, vector<1x128xf32>
      %10 = vector.shape_cast %9 : vector<1x128xf32> to vector<1x128xf32>
      %11 = vector.broadcast %10 : vector<1x128xf32> to vector<16x128xf32>
      %c0_10 = arith.constant 0 : index
      %c0_11 = arith.constant 0 : index
      %12 = vector.load %arg6[%c0_10, %c0_11] : memref<16x128xf32, #tpu.memory_space<vmem>>, vector<16x128xf32>
      tpu.vector_store %arg6[%c0_10, %c0_11], %11 {strides = array<i32>} : memref<16x128xf32, #tpu.memory_space<vmem>>, vector<16x128xf32>,
    } else {
    }
    %c0 = arith.constant 0 : index
    %c0_1 = arith.constant 0 : index
    %3 = vector.load %arg6[%c0, %c0_1] : memref<16x128xf32, #tpu.memory_space<vmem>>, vector<16x128xf32>
    %c0_2 = arith.constant 0 : index
    %c0_3 = arith.constant 0 : index
    %4 = vector.load %arg3[%c0_2, %c0_3] : memref<16x128xbf16, #tpu.memory_space<vmem>>, vector<16x128xbf16>
    %c0_4 = arith.constant 0 : index
    %c0_5 = arith.constant 0 : index
    %5 = vector.load %arg4[%c0_4, %c0_5] : memref<128x128xbf16, #tpu.memory_space<vmem>>, vector<128x128xbf16>
    %cst = arith.constant dense<0.000000e+00> : vector<16x128xf32>
    %6 = tpu.matmul %4, %5, %cst {dimension_numbers = #tpu.dot_dimension_numbers<[1], [0], [0], [1], [0, 0, 1, 1], [], []>} : vector<16x128xbf16>, vector<128x128xbf16>, vector<16x128xf32> -> vector<16x128xf32>
    %7 = arith.addf %3, %6 : vector<16x128xf32>
    %c0_6 = arith.constant 0 : index
    %c0_7 = arith.constant 0 : index
    %8 = vector.load %arg6[%c0_6, %c0_7] : memref<16x128xf32, #tpu.memory_space<vmem>>, vector<16x128xf32>
    tpu.vector_store %arg6[%c0_6, %c0_7], %7 {strides = array<i32>} : memref<16x128xf32, #tpu.memory_space<vmem>>, vector<16x128xf32>,
    return
  }
  func.func @transform_0(%arg0: i32, %arg1: i32, %arg2: i32) -> (i32, i32) {
    %c0_i32 = arith.constant 0 : i32
    return %arg0, %arg2 : i32, i32
  }
  func.func @transform_1(%arg0: i32, %arg1: i32, %arg2: i32) -> (i32, i32) {
    %c0_i32 = arith.constant 0 : i32
    return %arg2, %arg1 : i32, i32
  }
  func.func @transform_2(%arg0: i32, %arg1: i32, %arg2: i32) -> (i32, i32) {
    %c0_i32 = arith.constant 0 : i32
    %c0_i32_0 = arith.constant 0 : i32
    return %c0_i32, %arg1 : i32, i32
  }
  func.func @transform_3(%arg0: i32, %arg1: i32, %arg2: i32) -> (i32, i32) {
    %c0_i32 = arith.constant 0 : i32
    return %arg0, %arg1 : i32, i32
  }
}

module attributes {stable_mosaic.version = 11 : i64} {
  func.func @_gap_kernel(%arg0: i32, %arg1: i32, %arg2: memref<1x256x128xf32, #tpu.memory_space<vmem>>, %arg3: memref<1x1x128xf32, #tpu.memory_space<vmem>>) attributes {dimension_semantics = [#tpu.dimension_semantics<parallel>, #tpu.dimension_semantics<arbitrary>], iteration_bounds = array<i64: 2, 1>, scalar_prefetch = 0 : i64, scratch_operands = 0 : i64, tpu.core_type = #tpu.core_type<tc>, window_params = [{transform_indices = @transform_0, window_bounds = array<i64: 1, 256, 128>}, {transform_indices = @transform_1, window_bounds = array<i64: 1, 1, 128>}]} {
    %c0_i32 = arith.constant 0 : i32
    %0 = arith.cmpi eq, %arg1, %c0_i32 : i32
    %1 = arith.extui %0 : i1 to i32
    %c0_i32_0 = arith.constant 0 : i32
    %2 = arith.cmpi ne, %1, %c0_i32_0 : i32
    scf.if %2 {
      %cst_9 = arith.constant 0.000000e+00 : f32
      %9 = vector.broadcast %cst_9 : f32 to vector<1x1x128xf32>
      %c0_10 = arith.constant 0 : index
      %c0_11 = arith.constant 0 : index
      %c0_12 = arith.constant 0 : index
      %10 = vector.load %arg3[%c0_10, %c0_11, %c0_12] : memref<1x1x128xf32, #tpu.memory_space<vmem>>, vector<1x1x128xf32>
      tpu.vector_store %arg3[%c0_10, %c0_11, %c0_12], %9 {strides = array<i32>} : memref<1x1x128xf32, #tpu.memory_space<vmem>>, vector<1x1x128xf32>,
    } else {
    }
    %c0 = arith.constant 0 : index
    %c0_1 = arith.constant 0 : index
    %c0_2 = arith.constant 0 : index
    %3 = vector.load %arg3[%c0, %c0_1, %c0_2] : memref<1x1x128xf32, #tpu.memory_space<vmem>>, vector<1x1x128xf32>
    %c0_3 = arith.constant 0 : index
    %c0_4 = arith.constant 0 : index
    %c0_5 = arith.constant 0 : index
    %4 = vector.load %arg2[%c0_3, %c0_4, %c0_5] : memref<1x256x128xf32, #tpu.memory_space<vmem>>, vector<1x256x128xf32>
    %cst = arith.constant dense<0.000000e+00> : vector<1x128xf32>
    %5 = vector.multi_reduction <add>, %4, %cst [1] : vector<1x256x128xf32> to vector<1x128xf32>
    %6 = vector.shape_cast %5 : vector<1x128xf32> to vector<1x1x128xf32>
    %7 = arith.addf %3, %6 : vector<1x1x128xf32>
    %c0_6 = arith.constant 0 : index
    %c0_7 = arith.constant 0 : index
    %c0_8 = arith.constant 0 : index
    %8 = vector.load %arg3[%c0_6, %c0_7, %c0_8] : memref<1x1x128xf32, #tpu.memory_space<vmem>>, vector<1x1x128xf32>
    tpu.vector_store %arg3[%c0_6, %c0_7, %c0_8], %7 {strides = array<i32>} : memref<1x1x128xf32, #tpu.memory_space<vmem>>, vector<1x1x128xf32>,
    return
  }
  func.func @transform_0(%arg0: i32, %arg1: i32) -> (i32, i32, i32) {
    %c0_i32 = arith.constant 0 : i32
    %c0_i32_0 = arith.constant 0 : i32
    return %arg0, %arg1, %c0_i32 : i32, i32, i32
  }
  func.func @transform_1(%arg0: i32, %arg1: i32) -> (i32, i32, i32) {
    %c0_i32 = arith.constant 0 : i32
    %c0_i32_0 = arith.constant 0 : i32
    %c0_i32_1 = arith.constant 0 : i32
    return %arg0, %c0_i32, %c0_i32_0 : i32, i32, i32
  }
}

module attributes {stable_mosaic.version = 11 : i64} {
  func.func @_bn_stats_kernel(%arg0: i32, %arg1: memref<16x128xf32, #tpu.memory_space<vmem>>, %arg2: memref<1x128xf32, #tpu.memory_space<vmem>>, %arg3: memref<1x128xf32, #tpu.memory_space<vmem>>) attributes {dimension_semantics = [#tpu.dimension_semantics<arbitrary>], iteration_bounds = array<i64: 1>, scalar_prefetch = 0 : i64, scratch_operands = 0 : i64, tpu.core_type = #tpu.core_type<tc>, window_params = [{transform_indices = @transform_0, window_bounds = array<i64: 16, 128>}, {pipeline_mode = #tpu.pipeline_mode<synchronous>, transform_indices = @transform_1, window_bounds = array<i64: 1, 128>}, {pipeline_mode = #tpu.pipeline_mode<synchronous>, transform_indices = @transform_2, window_bounds = array<i64: 1, 128>}]} {
    %c0_i32 = arith.constant 0 : i32
    %0 = arith.cmpi eq, %arg0, %c0_i32 : i32
    %1 = arith.extui %0 : i1 to i32
    %c0_i32_0 = arith.constant 0 : i32
    %2 = arith.cmpi ne, %1, %c0_i32_0 : i32
    scf.if %2 {
      %cst_11 = arith.constant 0.000000e+00 : f32
      %15 = vector.broadcast %cst_11 : f32 to vector<1x128xf32>
      %c0_12 = arith.constant 0 : index
      %c0_13 = arith.constant 0 : index
      %16 = vector.load %arg2[%c0_12, %c0_13] : memref<1x128xf32, #tpu.memory_space<vmem>>, vector<1x128xf32>
      tpu.vector_store %arg2[%c0_12, %c0_13], %15 {strides = array<i32>} : memref<1x128xf32, #tpu.memory_space<vmem>>, vector<1x128xf32>,
      %cst_14 = arith.constant 0.000000e+00 : f32
      %17 = vector.broadcast %cst_14 : f32 to vector<1x128xf32>
      %c0_15 = arith.constant 0 : index
      %c0_16 = arith.constant 0 : index
      %18 = vector.load %arg3[%c0_15, %c0_16] : memref<1x128xf32, #tpu.memory_space<vmem>>, vector<1x128xf32>
      tpu.vector_store %arg3[%c0_15, %c0_16], %17 {strides = array<i32>} : memref<1x128xf32, #tpu.memory_space<vmem>>, vector<1x128xf32>,
    } else {
    }
    %c0 = arith.constant 0 : index
    %c0_1 = arith.constant 0 : index
    %3 = vector.load %arg1[%c0, %c0_1] : memref<16x128xf32, #tpu.memory_space<vmem>>, vector<16x128xf32>
    %c0_2 = arith.constant 0 : index
    %c0_3 = arith.constant 0 : index
    %4 = vector.load %arg2[%c0_2, %c0_3] : memref<1x128xf32, #tpu.memory_space<vmem>>, vector<1x128xf32>
    %cst = arith.constant dense<0.000000e+00> : vector<128xf32>
    %5 = vector.multi_reduction <add>, %3, %cst [0] : vector<16x128xf32> to vector<128xf32>
    %6 = vector.shape_cast %5 : vector<128xf32> to vector<1x128xf32>
    %7 = arith.addf %4, %6 : vector<1x128xf32>
    %c0_4 = arith.constant 0 : index
    %c0_5 = arith.constant 0 : index
    %8 = vector.load %arg2[%c0_4, %c0_5] : memref<1x128xf32, #tpu.memory_space<vmem>>, vector<1x128xf32>
    tpu.vector_store %arg2[%c0_4, %c0_5], %7 {strides = array<i32>} : memref<1x128xf32, #tpu.memory_space<vmem>>, vector<1x128xf32>,
    %c0_6 = arith.constant 0 : index
    %c0_7 = arith.constant 0 : index
    %9 = vector.load %arg3[%c0_6, %c0_7] : memref<1x128xf32, #tpu.memory_space<vmem>>, vector<1x128xf32>
    %10 = arith.mulf %3, %3 : vector<16x128xf32>
    %cst_8 = arith.constant dense<0.000000e+00> : vector<128xf32>
    %11 = vector.multi_reduction <add>, %10, %cst_8 [0] : vector<16x128xf32> to vector<128xf32>
    %12 = vector.shape_cast %11 : vector<128xf32> to vector<1x128xf32>
    %13 = arith.addf %9, %12 : vector<1x128xf32>
    %c0_9 = arith.constant 0 : index
    %c0_10 = arith.constant 0 : index
    %14 = vector.load %arg3[%c0_9, %c0_10] : memref<1x128xf32, #tpu.memory_space<vmem>>, vector<1x128xf32>
    tpu.vector_store %arg3[%c0_9, %c0_10], %13 {strides = array<i32>} : memref<1x128xf32, #tpu.memory_space<vmem>>, vector<1x128xf32>,
    return
  }
  func.func @transform_0(%arg0: i32) -> (i32, i32) {
    %c0_i32 = arith.constant 0 : i32
    %c0_i32_0 = arith.constant 0 : i32
    return %arg0, %c0_i32 : i32, i32
  }
  func.func @transform_1(%arg0: i32) -> (i32, i32) {
    %c0_i32 = arith.constant 0 : i32
    %c0_i32_0 = arith.constant 0 : i32
    %c0_i32_1 = arith.constant 0 : i32
    return %c0_i32, %c0_i32_0 : i32, i32
  }
  func.func @transform_2(%arg0: i32) -> (i32, i32) {
    %c0_i32 = arith.constant 0 : i32
    %c0_i32_0 = arith.constant 0 : i32
    %c0_i32_1 = arith.constant 0 : i32
    return %c0_i32, %c0_i32_0 : i32, i32
  }
}

module attributes {stable_mosaic.version = 11 : i64} {
  func.func @_bn_apply_kernel(%arg0: i32, %arg1: memref<16x128xf32, #tpu.memory_space<vmem>>, %arg2: memref<1x128xf32, #tpu.memory_space<vmem>>, %arg3: memref<1x128xf32, #tpu.memory_space<vmem>>, %arg4: memref<16x128xbf16, #tpu.memory_space<vmem>>) attributes {dimension_semantics = [#tpu.dimension_semantics<parallel>], iteration_bounds = array<i64: 1>, scalar_prefetch = 0 : i64, scratch_operands = 0 : i64, tpu.core_type = #tpu.core_type<tc>, window_params = [{transform_indices = @transform_0, window_bounds = array<i64: 16, 128>}, {pipeline_mode = #tpu.pipeline_mode<synchronous>, transform_indices = @transform_1, window_bounds = array<i64: 1, 128>}, {pipeline_mode = #tpu.pipeline_mode<synchronous>, transform_indices = @transform_2, window_bounds = array<i64: 1, 128>}, {transform_indices = @transform_3, window_bounds = array<i64: 16, 128>}]} {
    %c0 = arith.constant 0 : index
    %c0_0 = arith.constant 0 : index
    %0 = vector.load %arg1[%c0, %c0_0] : memref<16x128xf32, #tpu.memory_space<vmem>>, vector<16x128xf32>
    %c0_1 = arith.constant 0 : index
    %c0_2 = arith.constant 0 : index
    %1 = vector.load %arg2[%c0_1, %c0_2] : memref<1x128xf32, #tpu.memory_space<vmem>>, vector<1x128xf32>
    %2 = vector.broadcast %1 : vector<1x128xf32> to vector<16x128xf32>
    %3 = arith.mulf %0, %2 : vector<16x128xf32>
    %c0_3 = arith.constant 0 : index
    %c0_4 = arith.constant 0 : index
    %4 = vector.load %arg3[%c0_3, %c0_4] : memref<1x128xf32, #tpu.memory_space<vmem>>, vector<1x128xf32>
    %5 = vector.broadcast %4 : vector<1x128xf32> to vector<16x128xf32>
    %6 = arith.addf %3, %5 : vector<16x128xf32>
    %cst = arith.constant 0.000000e+00 : f32
    %7 = vector.broadcast %cst : f32 to vector<16x128xf32>
    %8 = arith.maximumf %6, %7 : vector<16x128xf32>
    %9 = arith.truncf %8 : vector<16x128xf32> to vector<16x128xbf16>
    %c0_5 = arith.constant 0 : index
    %c0_6 = arith.constant 0 : index
    %10 = vector.load %arg4[%c0_5, %c0_6] : memref<16x128xbf16, #tpu.memory_space<vmem>>, vector<16x128xbf16>
    tpu.vector_store %arg4[%c0_5, %c0_6], %9 {strides = array<i32>} : memref<16x128xbf16, #tpu.memory_space<vmem>>, vector<16x128xbf16>,
    return
  }
  func.func @transform_0(%arg0: i32) -> (i32, i32) {
    %c0_i32 = arith.constant 0 : i32
    %c0_i32_0 = arith.constant 0 : i32
    return %arg0, %c0_i32 : i32, i32
  }
  func.func @transform_1(%arg0: i32) -> (i32, i32) {
    %c0_i32 = arith.constant 0 : i32
    %c0_i32_0 = arith.constant 0 : i32
    %c0_i32_1 = arith.constant 0 : i32
    return %c0_i32, %c0_i32_0 : i32, i32
  }
  func.func @transform_2(%arg0: i32) -> (i32, i32) {
    %c0_i32 = arith.constant 0 : i32
    %c0_i32_0 = arith.constant 0 : i32
    %c0_i32_1 = arith.constant 0 : i32
    return %c0_i32, %c0_i32_0 : i32, i32
  }
  func.func @transform_3(%arg0: i32) -> (i32, i32) {
    %c0_i32 = arith.constant 0 : i32
    %c0_i32_0 = arith.constant 0 : i32
    return %arg0, %c0_i32 : i32, i32
  }
}

module attributes {stable_mosaic.version = 11 : i64} {
  func.func @_matmul_kernel(%arg0: i32, %arg1: i32, %arg2: i32, %arg3: memref<256x128xbf16, #tpu.memory_space<vmem>>, %arg4: memref<128x128xbf16, #tpu.memory_space<vmem>>, %arg5: memref<1x128xf32, #tpu.memory_space<vmem>>, %arg6: memref<256x128xf32, #tpu.memory_space<vmem>>) attributes {dimension_semantics = [#tpu.dimension_semantics<parallel>, #tpu.dimension_semantics<parallel>, #tpu.dimension_semantics<arbitrary>], iteration_bounds = array<i64: 2, 1, 5>, scalar_prefetch = 0 : i64, scratch_operands = 0 : i64, tpu.core_type = #tpu.core_type<tc>, window_params = [{transform_indices = @transform_0, window_bounds = array<i64: 256, 128>}, {transform_indices = @transform_1, window_bounds = array<i64: 128, 128>}, {transform_indices = @transform_2, window_bounds = array<i64: 1, 128>}, {transform_indices = @transform_3, window_bounds = array<i64: 256, 128>}]} {
    %c0_i32 = arith.constant 0 : i32
    %0 = arith.cmpi eq, %arg2, %c0_i32 : i32
    %1 = arith.extui %0 : i1 to i32
    %c0_i32_0 = arith.constant 0 : i32
    %2 = arith.cmpi ne, %1, %c0_i32_0 : i32
    scf.if %2 {
      %c0_8 = arith.constant 0 : index
      %c0_9 = arith.constant 0 : index
      %9 = vector.load %arg5[%c0_8, %c0_9] : memref<1x128xf32, #tpu.memory_space<vmem>>, vector<1x128xf32>
      %10 = vector.shape_cast %9 : vector<1x128xf32> to vector<1x128xf32>
      %11 = vector.broadcast %10 : vector<1x128xf32> to vector<256x128xf32>
      %c0_10 = arith.constant 0 : index
      %c0_11 = arith.constant 0 : index
      %12 = vector.load %arg6[%c0_10, %c0_11] : memref<256x128xf32, #tpu.memory_space<vmem>>, vector<256x128xf32>
      tpu.vector_store %arg6[%c0_10, %c0_11], %11 {strides = array<i32>} : memref<256x128xf32, #tpu.memory_space<vmem>>, vector<256x128xf32>,
    } else {
    }
    %c0 = arith.constant 0 : index
    %c0_1 = arith.constant 0 : index
    %3 = vector.load %arg6[%c0, %c0_1] : memref<256x128xf32, #tpu.memory_space<vmem>>, vector<256x128xf32>
    %c0_2 = arith.constant 0 : index
    %c0_3 = arith.constant 0 : index
    %4 = vector.load %arg3[%c0_2, %c0_3] : memref<256x128xbf16, #tpu.memory_space<vmem>>, vector<256x128xbf16>
    %c0_4 = arith.constant 0 : index
    %c0_5 = arith.constant 0 : index
    %5 = vector.load %arg4[%c0_4, %c0_5] : memref<128x128xbf16, #tpu.memory_space<vmem>>, vector<128x128xbf16>
    %cst = arith.constant dense<0.000000e+00> : vector<256x128xf32>
    %6 = tpu.matmul %4, %5, %cst {dimension_numbers = #tpu.dot_dimension_numbers<[1], [0], [0], [1], [0, 0, 1, 1], [], []>} : vector<256x128xbf16>, vector<128x128xbf16>, vector<256x128xf32> -> vector<256x128xf32>
    %7 = arith.addf %3, %6 : vector<256x128xf32>
    %c0_6 = arith.constant 0 : index
    %c0_7 = arith.constant 0 : index
    %8 = vector.load %arg6[%c0_6, %c0_7] : memref<256x128xf32, #tpu.memory_space<vmem>>, vector<256x128xf32>
    tpu.vector_store %arg6[%c0_6, %c0_7], %7 {strides = array<i32>} : memref<256x128xf32, #tpu.memory_space<vmem>>, vector<256x128xf32>,
    return
  }
  func.func @transform_0(%arg0: i32, %arg1: i32, %arg2: i32) -> (i32, i32) {
    %c0_i32 = arith.constant 0 : i32
    return %arg0, %arg2 : i32, i32
  }
  func.func @transform_1(%arg0: i32, %arg1: i32, %arg2: i32) -> (i32, i32) {
    %c0_i32 = arith.constant 0 : i32
    return %arg2, %arg1 : i32, i32
  }
  func.func @transform_2(%arg0: i32, %arg1: i32, %arg2: i32) -> (i32, i32) {
    %c0_i32 = arith.constant 0 : i32
    %c0_i32_0 = arith.constant 0 : i32
    return %c0_i32, %arg1 : i32, i32
  }
  func.func @transform_3(%arg0: i32, %arg1: i32, %arg2: i32) -> (i32, i32) {
    %c0_i32 = arith.constant 0 : i32
    return %arg0, %arg1 : i32, i32
  }
}

module attributes {stable_mosaic.version = 11 : i64} {
  func.func @_bn_apply_kernel(%arg0: i32, %arg1: memref<512x128xf32, #tpu.memory_space<vmem>>, %arg2: memref<1x128xf32, #tpu.memory_space<vmem>>, %arg3: memref<1x128xf32, #tpu.memory_space<vmem>>, %arg4: memref<512x128xf32, #tpu.memory_space<vmem>>) attributes {dimension_semantics = [#tpu.dimension_semantics<parallel>], iteration_bounds = array<i64: 1>, scalar_prefetch = 0 : i64, scratch_operands = 0 : i64, tpu.core_type = #tpu.core_type<tc>, window_params = [{transform_indices = @transform_0, window_bounds = array<i64: 512, 128>}, {pipeline_mode = #tpu.pipeline_mode<synchronous>, transform_indices = @transform_1, window_bounds = array<i64: 1, 128>}, {pipeline_mode = #tpu.pipeline_mode<synchronous>, transform_indices = @transform_2, window_bounds = array<i64: 1, 128>}, {transform_indices = @transform_3, window_bounds = array<i64: 512, 128>}]} {
    %c0 = arith.constant 0 : index
    %c0_0 = arith.constant 0 : index
    %0 = vector.load %arg1[%c0, %c0_0] : memref<512x128xf32, #tpu.memory_space<vmem>>, vector<512x128xf32>
    %c0_1 = arith.constant 0 : index
    %c0_2 = arith.constant 0 : index
    %1 = vector.load %arg2[%c0_1, %c0_2] : memref<1x128xf32, #tpu.memory_space<vmem>>, vector<1x128xf32>
    %2 = vector.broadcast %1 : vector<1x128xf32> to vector<512x128xf32>
    %3 = arith.mulf %0, %2 : vector<512x128xf32>
    %c0_3 = arith.constant 0 : index
    %c0_4 = arith.constant 0 : index
    %4 = vector.load %arg3[%c0_3, %c0_4] : memref<1x128xf32, #tpu.memory_space<vmem>>, vector<1x128xf32>
    %5 = vector.broadcast %4 : vector<1x128xf32> to vector<512x128xf32>
    %6 = arith.addf %3, %5 : vector<512x128xf32>
    %cst = arith.constant 0.000000e+00 : f32
    %7 = vector.broadcast %cst : f32 to vector<512x128xf32>
    %8 = arith.maximumf %6, %7 : vector<512x128xf32>
    %c0_5 = arith.constant 0 : index
    %c0_6 = arith.constant 0 : index
    %9 = vector.load %arg4[%c0_5, %c0_6] : memref<512x128xf32, #tpu.memory_space<vmem>>, vector<512x128xf32>
    tpu.vector_store %arg4[%c0_5, %c0_6], %8 {strides = array<i32>} : memref<512x128xf32, #tpu.memory_space<vmem>>, vector<512x128xf32>,
    return
  }
  func.func @transform_0(%arg0: i32) -> (i32, i32) {
    %c0_i32 = arith.constant 0 : i32
    %c0_i32_0 = arith.constant 0 : i32
    return %arg0, %c0_i32 : i32, i32
  }
  func.func @transform_1(%arg0: i32) -> (i32, i32) {
    %c0_i32 = arith.constant 0 : i32
    %c0_i32_0 = arith.constant 0 : i32
    %c0_i32_1 = arith.constant 0 : i32
    return %c0_i32, %c0_i32_0 : i32, i32
  }
  func.func @transform_2(%arg0: i32) -> (i32, i32) {
    %c0_i32 = arith.constant 0 : i32
    %c0_i32_0 = arith.constant 0 : i32
    %c0_i32_1 = arith.constant 0 : i32
    return %c0_i32, %c0_i32_0 : i32, i32
  }
  func.func @transform_3(%arg0: i32) -> (i32, i32) {
    %c0_i32 = arith.constant 0 : i32
    %c0_i32_0 = arith.constant 0 : i32
    return %arg0, %c0_i32 : i32, i32
  }
}

</mosaic_0001>

<bundles_post_ra>
// kernel: _lambda_.29
= control target key start
LH: loop header
LB: loop body
LE: loop exit
PB: predicated region body
PF: predicated region fallthrough
CT: control target
= control target key end

     0   :  { %v297_v0 = vmov 0.0   ;;  %s523_s0 = inlined_call_operand.vmem [shape: f32[512,128], index: 0, kind: input, shape index: {}]   ;;  %s524_s1 = inlined_call_operand.vmem [shape: f32[1,128], index: 1, kind: output, shape index: {0}]   ;;  %s525_s2 = inlined_call_operand.vmem [shape: f32[1,128], index: 2, kind: output, shape index: {1}]  }
   0x1   :  { %14 = vst [vmem:[%s524_s1] sm:$0x1] %v297_v0  ;;  %15 = vst [vmem:[%s525_s2] sm:$0x1] %v297_v0  ;;  %v16_v1 = vld [vmem:[%s523_s0] sm:$0xff]  ;;  %v17_v2 = vld [vmem:[%s523_s0 + $0x8] sm:$0xff] }
   0x2   :  { %v18_v3 = vld [vmem:[%s523_s0 + $0x10] sm:$0xff]  ;;  %v19_v4 = vld [vmem:[%s523_s0 + $0x18] sm:$0xff]  ;;  %v81_v5 = vadd.f32 %v17_v2, %v16_v1  ;;  %v153_v6 = vmul.f32 %v16_v1, %v16_v1  ;;  %v154_v7 = vmul.f32 %v17_v2, %v17_v2  ;;  %v20_v9 = vld [vmem:[%s523_s0 + $0x20] sm:$0xff] }
   0x3   :  { %v155_v8 = vmul.f32 %v18_v3, %v18_v3  ;;  %v156_v11 = vmul.f32 %v19_v4, %v19_v4  ;;  %v21_v13 = vld [vmem:[%s523_s0 + $0x28] sm:$0xff]  ;;  %v157_v15 = vmul.f32 %v20_v9, %v20_v9  ;;  %v22_v17 = vld [vmem:[%s523_s0 + $0x30] sm:$0xff]  ;;  %v23_v21 = vld [vmem:[%s523_s0 + $0x38] sm:$0xff] }
   0x4   :  { %v82_v10 = vadd.f32 %v81_v5, %v18_v3  ;;  %v217_v12 = vadd.f32 %v154_v7, %v153_v6  ;;  %v158_v19 = vmul.f32 %v21_v13, %v21_v13  ;;  %v159_v23 = vmul.f32 %v22_v17, %v22_v17  ;;  %v24_v25 = vld [vmem:[%s523_s0 + $0x40] sm:$0xff]  ;;  %v25_v29 = vld [vmem:[%s523_s0 + $0x48] sm:$0xff]  ;;  %v26_v33 = vld [vmem:[%s523_s0 + $0x50] sm:$0xff] }
   0x5   :  { %v160_v27 = vmul.f32 %v23_v21, %v23_v21  ;;  %v161_v31 = vmul.f32 %v24_v25, %v24_v25  ;;  %v162_v35 = vmul.f32 %v25_v29, %v25_v29  ;;  %v27_v37 = vld [vmem:[%s523_s0 + $0x58] sm:$0xff]  ;;  %v163_v39 = vmul.f32 %v26_v33, %v26_v33  ;;  %v28_v41 = vld [vmem:[%s523_s0 + $0x60] sm:$0xff]  ;;  %v29_v45 = vld [vmem:[%s523_s0 + $0x68] sm:$0xff] }
   0x6   :  { %v83_v14 = vadd.f32 %v82_v10, %v19_v4  ;;  %v218_v16 = vadd.f32 %v217_v12, %v155_v8  ;;  %v164_v43 = vmul.f32 %v27_v37, %v27_v37  ;;  %v165_v47 = vmul.f32 %v28_v41, %v28_v41  ;;  %v30_v49 = vld [vmem:[%s523_s0 + $0x70] sm:$0xff]  ;;  %v31_v53 = vld [vmem:[%s523_s0 + $0x78] sm:$0xff]  ;;  %v32_v57 = vld [vmem:[%s523_s0 + $0x80] sm:$0xff] }
   0x7   :  { %v166_v51 = vmul.f32 %v29_v45, %v29_v45  ;;  %v167_v55 = vmul.f32 %v30_v49, %v30_v49  ;;  %v168_v59 = vmul.f32 %v31_v53, %v31_v53  ;;  %v33_v61 = vld [vmem:[%s523_s0 + $0x88] sm:$0xff]  ;;  %v169_v63 = vmul.f32 %v32_v57, %v32_v57  ;;  %v34_v1 = vld [vmem:[%s523_s0 + $0x90] sm:$0xff]  ;;  %v35_v5 = vld [vmem:[%s523_s0 + $0x98] sm:$0xff] }
   0x8   :  { %v84_v18 = vadd.f32 %v83_v14, %v20_v9  ;;  %v219_v20 = vadd.f32 %v218_v16, %v156_v11  ;;  %v170_v3 = vmul.f32 %v33_v61, %v33_v61  ;;  %v171_v7 = vmul.f32 %v34_v1, %v34_v1  ;;  %v36_v9 = vld [vmem:[%s523_s0 + $0xa0] sm:$0xff] }
   0x9   :  { %v172_v11 = vmul.f32 %v35_v5, %v35_v5 }
   0xa   :  { %v85_v22 = vadd.f32 %v84_v18, %v21_v13  ;;  %v220_v24 = vadd.f32 %v219_v20, %v157_v15  ;;  %v37_v13 = vld [vmem:[%s523_s0 + $0xa8] sm:$0xff]  ;;  %v173_v15 = vmul.f32 %v36_v9, %v36_v9 }
   0xc   :  { %v86_v26 = vadd.f32 %v85_v22, %v22_v17  ;;  %v221_v28 = vadd.f32 %v220_v24, %v158_v19  ;;  %v38_v17 = vld [vmem:[%s523_s0 + $0xb0] sm:$0xff]  ;;  %v174_v19 = vmul.f32 %v37_v13, %v37_v13 }
   0xe   :  { %v87_v30 = vadd.f32 %v86_v26, %v23_v21  ;;  %v222_v32 = vadd.f32 %v221_v28, %v159_v23  ;;  %v39_v21 = vld [vmem:[%s523_s0 + $0xb8] sm:$0xff]  ;;  %v175_v23 = vmul.f32 %v38_v17, %v38_v17 }
  0x10   :  { %v88_v34 = vadd.f32 %v87_v30, %v24_v25  ;;  %v223_v36 = vadd.f32 %v222_v32, %v160_v27  ;;  %v40_v25 = vld [vmem:[%s523_s0 + $0xc0] sm:$0xff]  ;;  %v176_v27 = vmul.f32 %v39_v21, %v39_v21 }
  0x12   :  { %v89_v38 = vadd.f32 %v88_v34, %v25_v29  ;;  %v224_v40 = vadd.f32 %v223_v36, %v161_v31  ;;  %v41_v29 = vld [vmem:[%s523_s0 + $0xc8] sm:$0xff]  ;;  %v177_v31 = vmul.f32 %v40_v25, %v40_v25 }
  0x14   :  { %v90_v42 = vadd.f32 %v89_v38, %v26_v33  ;;  %v225_v44 = vadd.f32 %v224_v40, %v162_v35  ;;  %v42_v33 = vld [vmem:[%s523_s0 + $0xd0] sm:$0xff]  ;;  %v178_v35 = vmul.f32 %v41_v29, %v41_v29 }
  0x16   :  { %v91_v46 = vadd.f32 %v90_v42, %v27_v37  ;;  %v226_v48 = vadd.f32 %v225_v44, %v163_v39  ;;  %v43_v37 = vld [vmem:[%s523_s0 + $0xd8] sm:$0xff]  ;;  %v179_v39 = vmul.f32 %v42_v33, %v42_v33 }
  0x18   :  { %v92_v50 = vadd.f32 %v91_v46, %v28_v41  ;;  %v227_v52 = vadd.f32 %v226_v48, %v164_v43  ;;  %v44_v41 = vld [vmem:[%s523_s0 + $0xe0] sm:$0xff]  ;;  %v180_v43 = vmul.f32 %v43_v37, %v43_v37 }
  0x1a   :  { %v93_v54 = vadd.f32 %v92_v50, %v29_v45  ;;  %v228_v56 = vadd.f32 %v227_v52, %v165_v47  ;;  %v45_v45 = vld [vmem:[%s523_s0 + $0xe8] sm:$0xff]  ;;  %v181_v47 = vmul.f32 %v44_v41, %v44_v41 }
  0x1c   :  { %v94_v58 = vadd.f32 %v93_v54, %v30_v49  ;;  %v229_v60 = vadd.f32 %v228_v56, %v166_v51  ;;  %v46_v49 = vld [vmem:[%s523_s0 + $0xf0] sm:$0xff]  ;;  %v182_v51 = vmul.f32 %v45_v45, %v45_v45 }
  0x1e   :  { %v95_v62 = vadd.f32 %v94_v58, %v31_v53  ;;  %v230_v0 = vadd.f32 %v229_v60, %v167_v55  ;;  %v47_v53 = vld [vmem:[%s523_s0 + $0xf8] sm:$0xff]  ;;  %v183_v55 = vmul.f32 %v46_v49, %v46_v49 }
  0x20   :  { %v96_v2 = vadd.f32 %v95_v62, %v32_v57  ;;  %v231_v4 = vadd.f32 %v230_v0, %v168_v59  ;;  %v48_v57 = vld [vmem:[%s523_s0 + $0x100] sm:$0xff]  ;;  %v184_v59 = vmul.f32 %v47_v53, %v47_v53 }
  0x22   :  { %v97_v6 = vadd.f32 %v96_v2, %v33_v61  ;;  %v232_v8 = vadd.f32 %v231_v4, %v169_v63  ;;  %v49_v61 = vld [vmem:[%s523_s0 + $0x108] sm:$0xff]  ;;  %v185_v63 = vmul.f32 %v48_v57, %v48_v57 }
  0x24   :  { %v98_v10 = vadd.f32 %v97_v6, %v34_v1  ;;  %v233_v12 = vadd.f32 %v232_v8, %v170_v3  ;;  %v50_v1 = vld [vmem:[%s523_s0 + $0x110] sm:$0xff]  ;;  %v186_v3 = vmul.f32 %v49_v61, %v49_v61 }
  0x26   :  { %v99_v14 = vadd.f32 %v98_v10, %v35_v5  ;;  %v234_v16 = vadd.f32 %v233_v12, %v171_v7  ;;  %v51_v5 = vld [vmem:[%s523_s0 + $0x118] sm:$0xff]  ;;  %v187_v7 = vmul.f32 %v50_v1, %v50_v1 }
  0x28   :  { %v100_v18 = vadd.f32 %v99_v14, %v36_v9  ;;  %v235_v20 = vadd.f32 %v234_v16, %v172_v11  ;;  %v52_v9 = vld [vmem:[%s523_s0 + $0x120] sm:$0xff]  ;;  %v188_v11 = vmul.f32 %v51_v5, %v51_v5 }
  0x2a   :  { %v101_v22 = vadd.f32 %v100_v18, %v37_v13  ;;  %v236_v24 = vadd.f32 %v235_v20, %v173_v15  ;;  %v53_v13 = vld [vmem:[%s523_s0 + $0x128] sm:$0xff]  ;;  %v189_v15 = vmul.f32 %v52_v9, %v52_v9 }
  0x2c   :  { %v102_v26 = vadd.f32 %v101_v22, %v38_v17  ;;  %v237_v28 = vadd.f32 %v236_v24, %v174_v19  ;;  %v54_v17 = vld [vmem:[%s523_s0 + $0x130] sm:$0xff]  ;;  %v190_v19 = vmul.f32 %v53_v13, %v53_v13 }
  0x2e   :  { %v103_v30 = vadd.f32 %v102_v26, %v39_v21  ;;  %v238_v32 = vadd.f32 %v237_v28, %v175_v23  ;;  %v55_v21 = vld [vmem:[%s523_s0 + $0x138] sm:$0xff]  ;;  %v191_v23 = vmul.f32 %v54_v17, %v54_v17 }
  0x30   :  { %v104_v34 = vadd.f32 %v103_v30, %v40_v25  ;;  %v239_v36 = vadd.f32 %v238_v32, %v176_v27  ;;  %v56_v25 = vld [vmem:[%s523_s0 + $0x140] sm:$0xff]  ;;  %v192_v27 = vmul.f32 %v55_v21, %v55_v21 }
  0x32   :  { %v105_v38 = vadd.f32 %v104_v34, %v41_v29  ;;  %v240_v40 = vadd.f32 %v239_v36, %v177_v31  ;;  %v57_v29 = vld [vmem:[%s523_s0 + $0x148] sm:$0xff]  ;;  %v193_v31 = vmul.f32 %v56_v25, %v56_v25 }
  0x34   :  { %v106_v42 = vadd.f32 %v105_v38, %v42_v33  ;;  %v241_v44 = vadd.f32 %v240_v40, %v178_v35  ;;  %v58_v33 = vld [vmem:[%s523_s0 + $0x150] sm:$0xff]  ;;  %v194_v35 = vmul.f32 %v57_v29, %v57_v29 }
  0x36   :  { %v107_v46 = vadd.f32 %v106_v42, %v43_v37  ;;  %v242_v48 = vadd.f32 %v241_v44, %v179_v39  ;;  %v59_v37 = vld [vmem:[%s523_s0 + $0x158] sm:$0xff]  ;;  %v195_v39 = vmul.f32 %v58_v33, %v58_v33 }
  0x38   :  { %v108_v50 = vadd.f32 %v107_v46, %v44_v41  ;;  %v243_v52 = vadd.f32 %v242_v48, %v180_v43  ;;  %v60_v41 = vld [vmem:[%s523_s0 + $0x160] sm:$0xff]  ;;  %v196_v43 = vmul.f32 %v59_v37, %v59_v37 }
  0x3a   :  { %v109_v54 = vadd.f32 %v108_v50, %v45_v45  ;;  %v244_v56 = vadd.f32 %v243_v52, %v181_v47  ;;  %v61_v45 = vld [vmem:[%s523_s0 + $0x168] sm:$0xff]  ;;  %v197_v47 = vmul.f32 %v60_v41, %v60_v41 }
  0x3c   :  { %v110_v58 = vadd.f32 %v109_v54, %v46_v49  ;;  %v245_v60 = vadd.f32 %v244_v56, %v182_v51  ;;  %v62_v49 = vld [vmem:[%s523_s0 + $0x170] sm:$0xff]  ;;  %v198_v51 = vmul.f32 %v61_v45, %v61_v45 }
  0x3e   :  { %v111_v62 = vadd.f32 %v110_v58, %v47_v53  ;;  %v246_v0 = vadd.f32 %v245_v60, %v183_v55  ;;  %v63_v53 = vld [vmem:[%s523_s0 + $0x178] sm:$0xff]  ;;  %v199_v55 = vmul.f32 %v62_v49, %v62_v49 }
  0x40   :  { %v112_v2 = vadd.f32 %v111_v62, %v48_v57  ;;  %v247_v4 = vadd.f32 %v246_v0, %v184_v59  ;;  %v64_v57 = vld [vmem:[%s523_s0 + $0x180] sm:$0xff]  ;;  %v200_v59 = vmul.f32 %v63_v53, %v63_v53 }
  0x42   :  { %v113_v6 = vadd.f32 %v112_v2, %v49_v61  ;;  %v248_v8 = vadd.f32 %v247_v4, %v185_v63  ;;  %v65_v61 = vld [vmem:[%s523_s0 + $0x188] sm:$0xff]  ;;  %v201_v63 = vmul.f32 %v64_v57, %v64_v57 }
  0x44   :  { %v114_v10 = vadd.f32 %v113_v6, %v50_v1  ;;  %v249_v12 = vadd.f32 %v248_v8, %v186_v3  ;;  %v66_v1 = vld [vmem:[%s523_s0 + $0x190] sm:$0xff]  ;;  %v202_v3 = vmul.f32 %v65_v61, %v65_v61 }
  0x46   :  { %v115_v14 = vadd.f32 %v114_v10, %v51_v5  ;;  %v250_v16 = vadd.f32 %v249_v12, %v187_v7  ;;  %v67_v5 = vld [vmem:[%s523_s0 + $0x198] sm:$0xff]  ;;  %v203_v7 = vmul.f32 %v66_v1, %v66_v1 }
  0x48   :  { %v116_v18 = vadd.f32 %v115_v14, %v52_v9  ;;  %v251_v20 = vadd.f32 %v250_v16, %v188_v11  ;;  %v68_v9 = vld [vmem:[%s523_s0 + $0x1a0] sm:$0xff]  ;;  %v204_v11 = vmul.f32 %v67_v5, %v67_v5 }
  0x4a   :  { %v117_v22 = vadd.f32 %v116_v18, %v53_v13  ;;  %v252_v24 = vadd.f32 %v251_v20, %v189_v15  ;;  %v69_v13 = vld [vmem:[%s523_s0 + $0x1a8] sm:$0xff]  ;;  %v205_v15 = vmul.f32 %v68_v9, %v68_v9 }
  0x4c   :  { %v118_v26 = vadd.f32 %v117_v22, %v54_v17  ;;  %v253_v28 = vadd.f32 %v252_v24, %v190_v19  ;;  %v70_v17 = vld [vmem:[%s523_s0 + $0x1b0] sm:$0xff]  ;;  %v206_v19 = vmul.f32 %v69_v13, %v69_v13 }
  0x4e   :  { %v119_v30 = vadd.f32 %v118_v26, %v55_v21  ;;  %v254_v32 = vadd.f32 %v253_v28, %v191_v23  ;;  %v71_v21 = vld [vmem:[%s523_s0 + $0x1b8] sm:$0xff]  ;;  %v207_v23 = vmul.f32 %v70_v17, %v70_v17 }
  0x50   :  { %v120_v34 = vadd.f32 %v119_v30, %v56_v25  ;;  %v255_v36 = vadd.f32 %v254_v32, %v192_v27  ;;  %v72_v25 = vld [vmem:[%s523_s0 + $0x1c0] sm:$0xff]  ;;  %v208_v27 = vmul.f32 %v71_v21, %v71_v21 }
  0x52   :  { %v121_v38 = vadd.f32 %v120_v34, %v57_v29  ;;  %v256_v40 = vadd.f32 %v255_v36, %v193_v31  ;;  %v73_v29 = vld [vmem:[%s523_s0 + $0x1c8] sm:$0xff]  ;;  %v209_v31 = vmul.f32 %v72_v25, %v72_v25 }
  0x54   :  { %v122_v42 = vadd.f32 %v121_v38, %v58_v33  ;;  %v257_v44 = vadd.f32 %v256_v40, %v194_v35  ;;  %v74_v33 = vld [vmem:[%s523_s0 + $0x1d0] sm:$0xff]  ;;  %v210_v35 = vmul.f32 %v73_v29, %v73_v29 }
  0x56   :  { %v123_v46 = vadd.f32 %v122_v42, %v59_v37  ;;  %v258_v48 = vadd.f32 %v257_v44, %v195_v39  ;;  %v75_v37 = vld [vmem:[%s523_s0 + $0x1d8] sm:$0xff]  ;;  %v211_v39 = vmul.f32 %v74_v33, %v74_v33 }
  0x58   :  { %v124_v50 = vadd.f32 %v123_v46, %v60_v41  ;;  %v259_v52 = vadd.f32 %v258_v48, %v196_v43  ;;  %v76_v41 = vld [vmem:[%s523_s0 + $0x1e0] sm:$0xff]  ;;  %v212_v43 = vmul.f32 %v75_v37, %v75_v37 }
  0x5a   :  { %v125_v54 = vadd.f32 %v124_v50, %v61_v45  ;;  %v260_v56 = vadd.f32 %v259_v52, %v197_v47  ;;  %v77_v45 = vld [vmem:[%s523_s0 + $0x1e8] sm:$0xff]  ;;  %v213_v47 = vmul.f32 %v76_v41, %v76_v41 }
  0x5c   :  { %v126_v58 = vadd.f32 %v125_v54, %v62_v49  ;;  %v261_v60 = vadd.f32 %v260_v56, %v198_v51  ;;  %v78_v49 = vld [vmem:[%s523_s0 + $0x1f0] sm:$0xff]  ;;  %v214_v51 = vmul.f32 %v77_v45, %v77_v45 }
  0x5e   :  { %v127_v62 = vadd.f32 %v126_v58, %v63_v53  ;;  %v262_v0 = vadd.f32 %v261_v60, %v199_v55  ;;  %v79_v53 = vld [vmem:[%s523_s0 + $0x1f8] sm:$0xff]  ;;  %v215_v55 = vmul.f32 %v78_v49, %v78_v49 }
  0x5f   :  { %v216_v58 = vmul.f32 %v79_v53, %v79_v53 }
  0x60   :  { %v128_v2 = vadd.f32 %v127_v62, %v64_v57  ;;  %v263_v4 = vadd.f32 %v262_v0, %v200_v59 }
  0x62   :  { %v129_v6 = vadd.f32 %v128_v2, %v65_v61  ;;  %v264_v8 = vadd.f32 %v263_v4, %v201_v63 }
  0x64   :  { %v130_v10 = vadd.f32 %v129_v6, %v66_v1  ;;  %v265_v12 = vadd.f32 %v264_v8, %v202_v3 }
  0x66   :  { %v131_v14 = vadd.f32 %v130_v10, %v67_v5  ;;  %v266_v16 = vadd.f32 %v265_v12, %v203_v7  ;;  %v80_v7 = vld [vmem:[%s524_s1] sm:$0x1] }
  0x67   :  { %v152_v12 = vld [vmem:[%s525_s2] sm:$0x1] }
  0x68   :  { %v132_v18 = vadd.f32 %v131_v14, %v68_v9  ;;  %v267_v20 = vadd.f32 %v266_v16, %v204_v11 }
  0x6a   :  { %v133_v22 = vadd.f32 %v132_v18, %v69_v13  ;;  %v268_v24 = vadd.f32 %v267_v20, %v205_v15 }
  0x6c   :  { %v134_v26 = vadd.f32 %v133_v22, %v70_v17  ;;  %v269_v28 = vadd.f32 %v268_v24, %v206_v19 }
  0x6e   :  { %v135_v30 = vadd.f32 %v134_v26, %v71_v21  ;;  %v270_v32 = vadd.f32 %v269_v28, %v207_v23 }
  0x70   :  { %v136_v34 = vadd.f32 %v135_v30, %v72_v25  ;;  %v271_v36 = vadd.f32 %v270_v32, %v208_v27 }
  0x72   :  { %v137_v38 = vadd.f32 %v136_v34, %v73_v29  ;;  %v272_v40 = vadd.f32 %v271_v36, %v209_v31 }
  0x74   :  { %v138_v42 = vadd.f32 %v137_v38, %v74_v33  ;;  %v273_v44 = vadd.f32 %v272_v40, %v210_v35 }
  0x76   :  { %v139_v46 = vadd.f32 %v138_v42, %v75_v37  ;;  %v274_v48 = vadd.f32 %v273_v44, %v211_v39 }
  0x78   :  { %v140_v50 = vadd.f32 %v139_v46, %v76_v41  ;;  %v275_v52 = vadd.f32 %v274_v48, %v212_v43 }
  0x7a   :  { %v141_v54 = vadd.f32 %v140_v50, %v77_v45  ;;  %v276_v56 = vadd.f32 %v275_v52, %v213_v47 }
  0x7c   :  { %v142_v57 = vadd.f32 %v141_v54, %v78_v49  ;;  %v277_v59 = vadd.f32 %v276_v56, %v214_v51 }
  0x7e   :  { %v143_v60 = vadd.f32 %v142_v57, %v79_v53  ;;  %v278_v61 = vadd.f32 %v277_v59, %v215_v55 }
  0x80   :  { %v144_v62 = vrot.slane %v143_v60, 4  ;;  %v279_v63 = vadd.f32 %v278_v61, %v216_v58 }
  0x82   :  { %v145_v0 = vadd.f32 %v144_v62, %v143_v60  ;;  %v280_v1 = vrot.slane %v279_v63, 4 }
  0x84   :  { %v146_v2 = vrot.slane %v145_v0, 2  ;;  %v281_v3 = vadd.f32 %v280_v1, %v279_v63 }
  0x86   :  { %v147_v4 = vadd.f32 %v146_v2, %v145_v0  ;;  %v282_v5 = vrot.slane %v281_v3, 2 }
  0x88   :  { %v148_v6 = vrot.slane %v147_v4, 1  ;;  %v283_v8 = vadd.f32 %v282_v5, %v281_v3 }
  0x8a   :  { %v149_v9 = vadd.f32 %v148_v6, %v147_v4  ;;  %v284_v10 = vrot.slane %v283_v8, 1 }
  0x8c   :  { %v150_v11 = vadd.f32 %v149_v9, %v80_v7  ;;  %v285_v13 = vadd.f32 %v284_v10, %v283_v8 }
  0x8e   :  { %151 = vst [vmem:[%s524_s1] sm:$0x1] %v150_v11  ;;  %v286_v14 = vadd.f32 %v285_v13, %v152_v12 }
  0x90   :  { %287 = vst [vmem:[%s525_s2] sm:$0x1] %v286_v14 }

// kernel: _lambda_.30
= control target key start
LH: loop header
LB: loop body
LE: loop exit
PB: predicated region body
PF: predicated region fallthrough
CT: control target
= control target key end

     0   :  { %s1375_s0 = inlined_call_operand.vmem [shape: f32[512,128], index: 0, kind: input, shape index: {}]   ;;  %s1376_s1 = inlined_call_operand.vmem [shape: f32[1,128], index: 1, kind: input, shape index: {}]   ;;  %s1377_s2 = inlined_call_operand.vmem [shape: f32[1,128], index: 2, kind: input, shape index: {}]   ;;  %s1378_s3 = inlined_call_operand.vmem [shape: bf16[512,128], index: 3, kind: output, shape index: {}]  }
   0x1   :  { %v14_v0 = vld [vmem:[%s1375_s0] sm:$0xff]  ;;  %v15_v1 = vld [vmem:[%s1375_s0 + $0x8] sm:$0xff]  ;;  %v16_v6 = vld [vmem:[%s1375_s0 + $0x10] sm:$0xff] }
   0x2   :  { %v958_v2 = vld [vmem:[%s1376_s1] ss:$0 sm:$0xff]  ;;  %v17_v7 = vld [vmem:[%s1375_s0 + $0x18] sm:$0xff]  ;;  %v19_v11 = vld [vmem:[%s1375_s0 + $0x28] sm:$0xff] }
   0x3   :  { %v85_v3 = vmul.f32 %v958_v2, %v14_v0  ;;  %v86_v4 = vmul.f32 %v958_v2, %v15_v1  ;;  %v965_v5 = vld [vmem:[%s1377_s2] ss:$0 sm:$0xff]  ;;  %v87_v8 = vmul.f32 %v958_v2, %v16_v6  ;;  %v88_v9 = vmul.f32 %v958_v2, %v17_v7  ;;  %v20_v12 = vld [vmem:[%s1375_s0 + $0x30] sm:$0xff]  ;;  %v21_v17 = vld [vmem:[%s1375_s0 + $0x38] sm:$0xff] }
   0x4   :  { %v18_v10 = vld [vmem:[%s1375_s0 + $0x20] sm:$0xff]  ;;  %v90_v16 = vmul.f32 %v958_v2, %v19_v11  ;;  %v91_v20 = vmul.f32 %v958_v2, %v20_v12  ;;  %v92_v21 = vmul.f32 %v958_v2, %v21_v17  ;;  %v23_v27 = vld [vmem:[%s1375_s0 + $0x48] sm:$0xff]  ;;  %v24_v32 = vld [vmem:[%s1375_s0 + $0x50] sm:$0xff] }
   0x5   :  { %v156_v13 = vadd.f32 %v965_v5, %v85_v3  ;;  %v157_v14 = vadd.f32 %v965_v5, %v86_v4  ;;  %v89_v15 = vmul.f32 %v958_v2, %v18_v10  ;;  %v158_v18 = vadd.f32 %v965_v5, %v87_v8  ;;  %v22_v22 = vld [vmem:[%s1375_s0 + $0x40] sm:$0xff]  ;;  %v25_v33 = vld [vmem:[%s1375_s0 + $0x58] sm:$0xff]  ;;  %v27_v39 = vld [vmem:[%s1375_s0 + $0x68] sm:$0xff] }
   0x6   :  { %v159_v19 = vadd.f32 %v965_v5, %v88_v9  ;;  %v161_v26 = vadd.f32 %v965_v5, %v90_v16  ;;  %v162_v30 = vadd.f32 %v965_v5, %v91_v20  ;;  %v163_v31 = vadd.f32 %v965_v5, %v92_v21  ;;  %v26_v38 = vld [vmem:[%s1375_s0 + $0x60] sm:$0xff]  ;;  %v28_v44 = vld [vmem:[%s1375_s0 + $0x70] sm:$0xff]  ;;  %v29_v49 = vld [vmem:[%s1375_s0 + $0x78] sm:$0xff] }
   0x7   :  { %v220_v23 = vmax.f32 %v156_v13, 0.0  ;;  %v221_v24 = vmax.f32 %v157_v14, 0.0  ;;  %v160_v25 = vadd.f32 %v965_v5, %v89_v15  ;;  %v222_v28 = vmax.f32 %v158_v18, 0.0  ;;  %v30_v54 = vld [vmem:[%s1375_s0 + $0x80] sm:$0xff]  ;;  %v31_v63 = vld [vmem:[%s1375_s0 + $0x88] sm:$0xff]  ;;  %v32_v6 = vld [vmem:[%s1375_s0 + $0x90] sm:$0xff] }
   0x8   :  { %v223_v29 = vmax.f32 %v159_v19, 0.0  ;;  %v225_v36 = vmax.f32 %v161_v26, 0.0  ;;  %v93_v37 = vmul.f32 %v958_v2, %v22_v22  ;;  %v226_v41 = vmax.f32 %v162_v30, 0.0  ;;  %v33_v7 = vld [vmem:[%s1375_s0 + $0x98] sm:$0xff]  ;;  %v34_v12 = vld [vmem:[%s1375_s0 + $0xa0] sm:$0xff]  ;;  %v35_v13 = vld [vmem:[%s1375_s0 + $0xa8] sm:$0xff] }
   0x9   :  { %v741_v34 = vpack.c.bf16 %v221_v24, %v220_v23  ;;  %v224_v35 = vmax.f32 %v160_v25, 0.0  ;;  %v227_v42 = vmax.f32 %v163_v31, 0.0  ;;  %v94_v43 = vmul.f32 %v958_v2, %v23_v27  ;;  %v36_v18 = vld [vmem:[%s1375_s0 + $0xb0] sm:$0xff]  ;;  %v37_v23 = vld [vmem:[%s1375_s0 + $0xb8] sm:$0xff] }
   0xa   :  { %v746_v40 = vpack.c.bf16 %v223_v29, %v222_v28  ;;  %v164_v46 = vadd.f32 %v965_v5, %v93_v37  ;;  %v95_v47 = vmul.f32 %v958_v2, %v24_v32  ;;  %v96_v48 = vmul.f32 %v958_v2, %v25_v33  ;;  %v38_v28 = vld [vmem:[%s1375_s0 + $0xc0] sm:$0xff]  ;;  %v39_v37 = vld [vmem:[%s1375_s0 + $0xc8] sm:$0xff] }
   0xb   :  { %742 = vst [vmem:[%s1378_s3] sm:$0xff] %v741_v34   ;;  %v751_v45 = vpack.c.bf16 %v225_v36, %v224_v35  ;;  %v756_v50 = vpack.c.bf16 %v227_v42, %v226_v41  ;;  %v165_v51 = vadd.f32 %v965_v5, %v94_v43  ;;  %v97_v52 = vmul.f32 %v958_v2, %v26_v38  ;;  %v40_v42 = vld [vmem:[%s1375_s0 + $0xd0] sm:$0xff]  ;;  %v41_v43 = vld [vmem:[%s1375_s0 + $0xd8] sm:$0xff] }
   0xc   :  { %898 = vst [vmem:[%s1378_s3 + $0x8] sm:$0xff] %v746_v40   ;;  %v98_v53 = vmul.f32 %v958_v2, %v27_v39  ;;  %v228_v55 = vmax.f32 %v164_v46, 0.0  ;;  %v166_v56 = vadd.f32 %v965_v5, %v95_v47  ;;  %v167_v57 = vadd.f32 %v965_v5, %v96_v48  ;;  %v42_v48 = vld [vmem:[%s1375_s0 + $0xe0] sm:$0xff] }
   0xd   :  { %899 = vst [vmem:[%s1378_s3 + $0x10] sm:$0xff] %v751_v45   ;;  %v99_v58 = vmul.f32 %v958_v2, %v28_v44  ;;  %900 = vst [vmem:[%s1378_s3 + $0x18] sm:$0xff] %v756_v50   ;;  %v229_v59 = vmax.f32 %v165_v51, 0.0  ;;  %v168_v60 = vadd.f32 %v965_v5, %v97_v52  ;;  %v100_v62 = vmul.f32 %v958_v2, %v29_v49  ;;  %v43_v49 = vld [vmem:[%s1375_s0 + $0xe8] sm:$0xff] }
   0xe   :  { %v169_v61 = vadd.f32 %v965_v5, %v98_v53  ;;  %v230_v0 = vmax.f32 %v166_v56, 0.0  ;;  %v231_v1 = vmax.f32 %v167_v57, 0.0  ;;  %v101_v4 = vmul.f32 %v958_v2, %v30_v54  ;;  %v44_v54 = vld [vmem:[%s1375_s0 + $0xf0] sm:$0xff] }
   0xf   :  { %v170_v3 = vadd.f32 %v965_v5, %v99_v58  ;;  %v761_v8 = vpack.c.bf16 %v229_v59, %v228_v55  ;;  %v232_v9 = vmax.f32 %v168_v60, 0.0  ;;  %v171_v11 = vadd.f32 %v965_v5, %v100_v62  ;;  %v45_v59 = vld [vmem:[%s1375_s0 + $0xf8] sm:$0xff] }
  0x10   :  { %v233_v10 = vmax.f32 %v169_v61, 0.0  ;;  %v766_v14 = vpack.c.bf16 %v231_v1, %v230_v0  ;;  %v102_v16 = vmul.f32 %v958_v2, %v31_v63  ;;  %v172_v17 = vadd.f32 %v965_v5, %v101_v4  ;;  %v46_v0 = vld [vmem:[%s1375_s0 + $0x100] sm:$0xff] }
  0x11   :  { %v234_v15 = vmax.f32 %v170_v3, 0.0  ;;  %901 = vst [vmem:[%s1378_s3 + $0x20] sm:$0xff] %v761_v8   ;;  %v235_v20 = vmax.f32 %v171_v11, 0.0  ;;  %v103_v21 = vmul.f32 %v958_v2, %v32_v6  ;;  %v104_v22 = vmul.f32 %v958_v2, %v33_v7  ;;  %v47_v11 = vld [vmem:[%s1375_s0 + $0x108] sm:$0xff] }
  0x12   :  { %v771_v19 = vpack.c.bf16 %v233_v10, %v232_v9  ;;  %902 = vst [vmem:[%s1378_s3 + $0x28] sm:$0xff] %v766_v14   ;;  %v173_v24 = vadd.f32 %v965_v5, %v102_v16  ;;  %v236_v25 = vmax.f32 %v172_v17, 0.0  ;;  %v105_v26 = vmul.f32 %v958_v2, %v34_v12  ;;  %v48_v16 = vld [vmem:[%s1375_s0 + $0x110] sm:$0xff]  ;;  %v49_v17 = vld [vmem:[%s1375_s0 + $0x118] sm:$0xff] }
  0x13   :  { %v106_v27 = vmul.f32 %v958_v2, %v35_v13  ;;  %v776_v29 = vpack.c.bf16 %v235_v20, %v234_v15  ;;  %v174_v30 = vadd.f32 %v965_v5, %v103_v21  ;;  %v175_v31 = vadd.f32 %v965_v5, %v104_v22  ;;  %v50_v22 = vld [vmem:[%s1375_s0 + $0x120] sm:$0xff] }
  0x14   :  { %903 = vst [vmem:[%s1378_s3 + $0x30] sm:$0xff] %v771_v19   ;;  %v107_v32 = vmul.f32 %v958_v2, %v36_v18  ;;  %v237_v33 = vmax.f32 %v173_v24, 0.0  ;;  %v176_v34 = vadd.f32 %v965_v5, %v105_v26  ;;  %v108_v36 = vmul.f32 %v958_v2, %v37_v23  ;;  %v51_v23 = vld [vmem:[%s1375_s0 + $0x128] sm:$0xff] }
  0x15   :  { %v177_v35 = vadd.f32 %v965_v5, %v106_v27  ;;  %904 = vst [vmem:[%s1378_s3 + $0x38] sm:$0xff] %v776_v29   ;;  %v238_v38 = vmax.f32 %v174_v30, 0.0  ;;  %v239_v39 = vmax.f32 %v175_v31, 0.0  ;;  %v109_v41 = vmul.f32 %v958_v2, %v38_v28  ;;  %v52_v28 = vld [vmem:[%s1375_s0 + $0x130] sm:$0xff] }
  0x16   :  { %v178_v40 = vadd.f32 %v965_v5, %v107_v32  ;;  %v781_v44 = vpack.c.bf16 %v237_v33, %v236_v25  ;;  %v240_v45 = vmax.f32 %v176_v34, 0.0  ;;  %v179_v47 = vadd.f32 %v965_v5, %v108_v36  ;;  %v53_v33 = vld [vmem:[%s1375_s0 + $0x138] sm:$0xff] }
  0x17   :  { %v241_v46 = vmax.f32 %v177_v35, 0.0  ;;  %v786_v50 = vpack.c.bf16 %v239_v39, %v238_v38  ;;  %v110_v52 = vmul.f32 %v958_v2, %v39_v37  ;;  %v180_v53 = vadd.f32 %v965_v5, %v109_v41  ;;  %v54_v38 = vld [vmem:[%s1375_s0 + $0x140] sm:$0xff] }
  0x18   :  { %v242_v51 = vmax.f32 %v178_v40, 0.0  ;;  %905 = vst [vmem:[%s1378_s3 + $0x40] sm:$0xff] %v781_v44   ;;  %v243_v56 = vmax.f32 %v179_v47, 0.0  ;;  %v111_v57 = vmul.f32 %v958_v2, %v40_v42  ;;  %v112_v58 = vmul.f32 %v958_v2, %v41_v43  ;;  %v55_v47 = vld [vmem:[%s1375_s0 + $0x148] sm:$0xff] }
  0x19   :  { %v791_v55 = vpack.c.bf16 %v241_v46, %v240_v45  ;;  %906 = vst [vmem:[%s1378_s3 + $0x48] sm:$0xff] %v786_v50   ;;  %v181_v60 = vadd.f32 %v965_v5, %v110_v52  ;;  %v244_v61 = vmax.f32 %v180_v53, 0.0  ;;  %v113_v62 = vmul.f32 %v958_v2, %v42_v48  ;;  %v56_v52 = vld [vmem:[%s1375_s0 + $0x150] sm:$0xff]  ;;  %v57_v53 = vld [vmem:[%s1375_s0 + $0x158] sm:$0xff] }
  0x1a   :  { %v114_v63 = vmul.f32 %v958_v2, %v43_v49  ;;  %v796_v1 = vpack.c.bf16 %v243_v56, %v242_v51  ;;  %v182_v3 = vadd.f32 %v965_v5, %v111_v57  ;;  %v183_v4 = vadd.f32 %v965_v5, %v112_v58  ;;  %v58_v58 = vld [vmem:[%s1375_s0 + $0x160] sm:$0xff] }
  0x1b   :  { %907 = vst [vmem:[%s1378_s3 + $0x50] sm:$0xff] %v791_v55   ;;  %v115_v6 = vmul.f32 %v958_v2, %v44_v54  ;;  %v245_v7 = vmax.f32 %v181_v60, 0.0  ;;  %v184_v8 = vadd.f32 %v965_v5, %v113_v62  ;;  %v116_v10 = vmul.f32 %v958_v2, %v45_v59  ;;  %v59_v59 = vld [vmem:[%s1375_s0 + $0x168] sm:$0xff] }
  0x1c   :  { %v185_v9 = vadd.f32 %v965_v5, %v114_v63  ;;  %908 = vst [vmem:[%s1378_s3 + $0x58] sm:$0xff] %v796_v1   ;;  %v246_v12 = vmax.f32 %v182_v3, 0.0  ;;  %v247_v13 = vmax.f32 %v183_v4, 0.0  ;;  %v117_v15 = vmul.f32 %v958_v2, %v46_v0  ;;  %v60_v0 = vld [vmem:[%s1375_s0 + $0x170] sm:$0xff] }
  0x1d   :  { %v186_v14 = vadd.f32 %v965_v5, %v115_v6  ;;  %v801_v18 = vpack.c.bf16 %v245_v7, %v244_v61  ;;  %v248_v19 = vmax.f32 %v184_v8, 0.0  ;;  %v187_v21 = vadd.f32 %v965_v5, %v116_v10  ;;  %v61_v7 = vld [vmem:[%s1375_s0 + $0x178] sm:$0xff] }
  0x1e   :  { %v249_v20 = vmax.f32 %v185_v9, 0.0  ;;  %v806_v24 = vpack.c.bf16 %v247_v13, %v246_v12  ;;  %v118_v26 = vmul.f32 %v958_v2, %v47_v11  ;;  %v188_v27 = vadd.f32 %v965_v5, %v117_v15  ;;  %v62_v12 = vld [vmem:[%s1375_s0 + $0x180] sm:$0xff] }
  0x1f   :  { %v250_v25 = vmax.f32 %v186_v14, 0.0  ;;  %909 = vst [vmem:[%s1378_s3 + $0x60] sm:$0xff] %v801_v18   ;;  %v251_v30 = vmax.f32 %v187_v21, 0.0  ;;  %v119_v31 = vmul.f32 %v958_v2, %v48_v16  ;;  %v120_v32 = vmul.f32 %v958_v2, %v49_v17  ;;  %v63_v21 = vld [vmem:[%s1375_s0 + $0x188] sm:$0xff] }
  0x20   :  { %v811_v29 = vpack.c.bf16 %v249_v20, %v248_v19  ;;  %910 = vst [vmem:[%s1378_s3 + $0x68] sm:$0xff] %v806_v24   ;;  %v189_v34 = vadd.f32 %v965_v5, %v118_v26  ;;  %v252_v35 = vmax.f32 %v188_v27, 0.0  ;;  %v121_v36 = vmul.f32 %v958_v2, %v50_v22  ;;  %v64_v26 = vld [vmem:[%s1375_s0 + $0x190] sm:$0xff]  ;;  %v65_v27 = vld [vmem:[%s1375_s0 + $0x198] sm:$0xff] }
  0x21   :  { %v122_v37 = vmul.f32 %v958_v2, %v51_v23  ;;  %v816_v39 = vpack.c.bf16 %v251_v30, %v250_v25  ;;  %v190_v40 = vadd.f32 %v965_v5, %v119_v31  ;;  %v191_v41 = vadd.f32 %v965_v5, %v120_v32  ;;  %v66_v32 = vld [vmem:[%s1375_s0 + $0x1a0] sm:$0xff] }
  0x22   :  { %911 = vst [vmem:[%s1378_s3 + $0x70] sm:$0xff] %v811_v29   ;;  %v123_v42 = vmul.f32 %v958_v2, %v52_v28  ;;  %v253_v43 = vmax.f32 %v189_v34, 0.0  ;;  %v192_v44 = vadd.f32 %v965_v5, %v121_v36  ;;  %v124_v46 = vmul.f32 %v958_v2, %v53_v33  ;;  %v67_v33 = vld [vmem:[%s1375_s0 + $0x1a8] sm:$0xff] }
  0x23   :  { %v193_v45 = vadd.f32 %v965_v5, %v122_v37  ;;  %912 = vst [vmem:[%s1378_s3 + $0x78] sm:$0xff] %v816_v39   ;;  %v254_v48 = vmax.f32 %v190_v40, 0.0  ;;  %v255_v49 = vmax.f32 %v191_v41, 0.0  ;;  %v125_v51 = vmul.f32 %v958_v2, %v54_v38  ;;  %v68_v38 = vld [vmem:[%s1375_s0 + $0x1b0] sm:$0xff] }
  0x24   :  { %v194_v50 = vadd.f32 %v965_v5, %v123_v42  ;;  %v821_v54 = vpack.c.bf16 %v253_v43, %v252_v35  ;;  %v256_v55 = vmax.f32 %v192_v44, 0.0  ;;  %v195_v57 = vadd.f32 %v965_v5, %v124_v46  ;;  %v69_v43 = vld [vmem:[%s1375_s0 + $0x1b8] sm:$0xff] }
  0x25   :  { %v257_v56 = vmax.f32 %v193_v45, 0.0  ;;  %v826_v60 = vpack.c.bf16 %v255_v49, %v254_v48  ;;  %v126_v62 = vmul.f32 %v958_v2, %v55_v47  ;;  %v196_v63 = vadd.f32 %v965_v5, %v125_v51  ;;  %v70_v48 = vld [vmem:[%s1375_s0 + $0x1c0] sm:$0xff] }
  0x26   :  { %v258_v61 = vmax.f32 %v194_v50, 0.0  ;;  %913 = vst [vmem:[%s1378_s3 + $0x80] sm:$0xff] %v821_v54   ;;  %v259_v3 = vmax.f32 %v195_v57, 0.0  ;;  %v127_v4 = vmul.f32 %v958_v2, %v56_v52  ;;  %v128_v6 = vmul.f32 %v958_v2, %v57_v53  ;;  %v71_v57 = vld [vmem:[%s1375_s0 + $0x1c8] sm:$0xff] }
  0x27   :  { %v831_v1 = vpack.c.bf16 %v257_v56, %v256_v55  ;;  %914 = vst [vmem:[%s1378_s3 + $0x88] sm:$0xff] %v826_v60   ;;  %v197_v8 = vadd.f32 %v965_v5, %v126_v62  ;;  %v260_v9 = vmax.f32 %v196_v63, 0.0  ;;  %v129_v10 = vmul.f32 %v958_v2, %v58_v58  ;;  %v72_v62 = vld [vmem:[%s1375_s0 + $0x1d0] sm:$0xff]  ;;  %v73_v63 = vld [vmem:[%s1375_s0 + $0x1d8] sm:$0xff] }
  0x28   :  { %v130_v11 = vmul.f32 %v958_v2, %v59_v59  ;;  %v836_v13 = vpack.c.bf16 %v259_v3, %v258_v61  ;;  %v198_v14 = vadd.f32 %v965_v5, %v127_v4  ;;  %v199_v15 = vadd.f32 %v965_v5, %v128_v6  ;;  %v74_v6 = vld [vmem:[%s1375_s0 + $0x1e0] sm:$0xff] }
  0x29   :  { %915 = vst [vmem:[%s1378_s3 + $0x90] sm:$0xff] %v831_v1   ;;  %v131_v16 = vmul.f32 %v958_v2, %v60_v0  ;;  %v261_v17 = vmax.f32 %v197_v8, 0.0  ;;  %v200_v18 = vadd.f32 %v965_v5, %v129_v10  ;;  %v132_v20 = vmul.f32 %v958_v2, %v61_v7  ;;  %v75_v7 = vld [vmem:[%s1375_s0 + $0x1e8] sm:$0xff] }
  0x2a   :  { %v201_v19 = vadd.f32 %v965_v5, %v130_v11  ;;  %916 = vst [vmem:[%s1378_s3 + $0x98] sm:$0xff] %v836_v13   ;;  %v262_v22 = vmax.f32 %v198_v14, 0.0  ;;  %v263_v23 = vmax.f32 %v199_v15, 0.0  ;;  %v133_v25 = vmul.f32 %v958_v2, %v62_v12  ;;  %v76_v12 = vld [vmem:[%s1375_s0 + $0x1f0] sm:$0xff] }
  0x2b   :  { %v202_v24 = vadd.f32 %v965_v5, %v131_v16  ;;  %v841_v28 = vpack.c.bf16 %v261_v17, %v260_v9  ;;  %v264_v29 = vmax.f32 %v200_v18, 0.0  ;;  %v203_v31 = vadd.f32 %v965_v5, %v132_v20  ;;  %v77_v17 = vld [vmem:[%s1375_s0 + $0x1f8] sm:$0xff] }
  0x2c   :  { %v265_v30 = vmax.f32 %v201_v19, 0.0  ;;  %v846_v34 = vpack.c.bf16 %v263_v23, %v262_v22  ;;  %v134_v36 = vmul.f32 %v958_v2, %v63_v21  ;;  %v204_v37 = vadd.f32 %v965_v5, %v133_v25 }
  0x2d   :  { %v266_v35 = vmax.f32 %v202_v24, 0.0  ;;  %917 = vst [vmem:[%s1378_s3 + $0xa0] sm:$0xff] %v841_v28   ;;  %v267_v40 = vmax.f32 %v203_v31, 0.0  ;;  %v135_v41 = vmul.f32 %v958_v2, %v64_v26  ;;  %v136_v42 = vmul.f32 %v958_v2, %v65_v27 }
  0x2e   :  { %v851_v39 = vpack.c.bf16 %v265_v30, %v264_v29  ;;  %918 = vst [vmem:[%s1378_s3 + $0xa8] sm:$0xff] %v846_v34   ;;  %v205_v44 = vadd.f32 %v965_v5, %v134_v36  ;;  %v268_v45 = vmax.f32 %v204_v37, 0.0  ;;  %v137_v46 = vmul.f32 %v958_v2, %v66_v32 }
  0x2f   :  { %v138_v47 = vmul.f32 %v958_v2, %v67_v33  ;;  %v856_v49 = vpack.c.bf16 %v267_v40, %v266_v35  ;;  %v206_v50 = vadd.f32 %v965_v5, %v135_v41  ;;  %v207_v51 = vadd.f32 %v965_v5, %v136_v42 }
  0x30   :  { %919 = vst [vmem:[%s1378_s3 + $0xb0] sm:$0xff] %v851_v39   ;;  %v139_v52 = vmul.f32 %v958_v2, %v68_v38  ;;  %v269_v53 = vmax.f32 %v205_v44, 0.0  ;;  %v208_v54 = vadd.f32 %v965_v5, %v137_v46  ;;  %v140_v56 = vmul.f32 %v958_v2, %v69_v43 }
  0x31   :  { %v209_v55 = vadd.f32 %v965_v5, %v138_v47  ;;  %920 = vst [vmem:[%s1378_s3 + $0xb8] sm:$0xff] %v856_v49   ;;  %v270_v58 = vmax.f32 %v206_v50, 0.0  ;;  %v271_v59 = vmax.f32 %v207_v51, 0.0  ;;  %v141_v61 = vmul.f32 %v958_v2, %v70_v48 }
  0x32   :  { %v210_v60 = vadd.f32 %v965_v5, %v139_v52  ;;  %v861_v0 = vpack.c.bf16 %v269_v53, %v268_v45  ;;  %v272_v1 = vmax.f32 %v208_v54, 0.0  ;;  %v211_v4 = vadd.f32 %v965_v5, %v140_v56 }
  0x33   :  { %v273_v3 = vmax.f32 %v209_v55, 0.0  ;;  %v866_v8 = vpack.c.bf16 %v271_v59, %v270_v58  ;;  %v142_v10 = vmul.f32 %v958_v2, %v71_v57  ;;  %v212_v11 = vadd.f32 %v965_v5, %v141_v61 }
  0x34   :  { %v274_v9 = vmax.f32 %v210_v60, 0.0  ;;  %921 = vst [vmem:[%s1378_s3 + $0xc0] sm:$0xff] %v861_v0   ;;  %v275_v14 = vmax.f32 %v211_v4, 0.0  ;;  %v143_v15 = vmul.f32 %v958_v2, %v72_v62  ;;  %v144_v16 = vmul.f32 %v958_v2, %v73_v63 }
  0x35   :  { %v871_v13 = vpack.c.bf16 %v273_v3, %v272_v1  ;;  %922 = vst [vmem:[%s1378_s3 + $0xc8] sm:$0xff] %v866_v8   ;;  %v213_v18 = vadd.f32 %v965_v5, %v142_v10  ;;  %v276_v19 = vmax.f32 %v212_v11, 0.0  ;;  %v145_v20 = vmul.f32 %v958_v2, %v74_v6 }
  0x36   :  { %v146_v21 = vmul.f32 %v958_v2, %v75_v7  ;;  %v876_v22 = vpack.c.bf16 %v275_v14, %v274_v9  ;;  %v214_v23 = vadd.f32 %v965_v5, %v143_v15  ;;  %v215_v24 = vadd.f32 %v965_v5, %v144_v16 }
  0x37   :  { %923 = vst [vmem:[%s1378_s3 + $0xd0] sm:$0xff] %v871_v13   ;;  %v147_v25 = vmul.f32 %v958_v2, %v76_v12  ;;  %v277_v26 = vmax.f32 %v213_v18, 0.0  ;;  %v216_v27 = vadd.f32 %v965_v5, %v145_v20  ;;  %v148_v29 = vmul.f32 %v958_v2, %v77_v17 }
  0x38   :  { %v217_v28 = vadd.f32 %v965_v5, %v146_v21  ;;  %924 = vst [vmem:[%s1378_s3 + $0xd8] sm:$0xff] %v876_v22   ;;  %v278_v30 = vmax.f32 %v214_v23, 0.0  ;;  %v279_v31 = vmax.f32 %v215_v24, 0.0 }
  0x39   :  { %v218_v32 = vadd.f32 %v965_v5, %v147_v25  ;;  %v881_v33 = vpack.c.bf16 %v277_v26, %v276_v19  ;;  %v280_v34 = vmax.f32 %v216_v27, 0.0  ;;  %v219_v36 = vadd.f32 %v965_v5, %v148_v29 }
  0x3a   :  { %v281_v35 = vmax.f32 %v217_v28, 0.0  ;;  %v886_v37 = vpack.c.bf16 %v279_v31, %v278_v30 }
  0x3b   :  { %v282_v38 = vmax.f32 %v218_v32, 0.0  ;;  %925 = vst [vmem:[%s1378_s3 + $0xe0] sm:$0xff] %v881_v33   ;;  %v283_v39 = vmax.f32 %v219_v36, 0.0 }
  0x3c   :  { %v891_v2 = vpack.c.bf16 %v281_v35, %v280_v34  ;;  %926 = vst [vmem:[%s1378_s3 + $0xe8] sm:$0xff] %v886_v37  }
  0x3d   :  { %v896_v40 = vpack.c.bf16 %v283_v39, %v282_v38 }
  0x3e   :  { %927 = vst [vmem:[%s1378_s3 + $0xf0] sm:$0xff] %v891_v2  }
  0x3f   :  { %928 = vst [vmem:[%s1378_s3 + $0xf8] sm:$0xff] %v896_v40  }

// kernel: _lambda_.28
= control target key start
LH: loop header
LB: loop body
LE: loop exit
PB: predicated region body
PF: predicated region fallthrough
CT: control target
= control target key end

     0   :  { %s2079_s12 = smov 0   ;;  %s2081_s13 = smov 0   ;;  %s2517_s0 = inlined_call_operand.vmem [shape: bf16[512,1152], index: 0, kind: input, shape index: {}]   ;;  %s2518_s1 = inlined_call_operand.vmem [shape: bf16[1152,128], index: 1, kind: input, shape index: {}]   ;;  %s2519_s2 = inlined_call_operand.vmem [shape: f32[1,128], index: 2, kind: input, shape index: {}]   ;;  %s2520_s3 = inlined_call_operand.vmem [shape: f32[512,128], index: 3, kind: output, shape index: {}]  }
   0x1   :  { %s2083_s14 = smov 0   ;;  %s2085_s15 = smov 0  }
   0x2   :  { %s2087_s16 = smov 0   ;;  %s2089_s17 = smov 0  }
   0x3   :  { %s2091_s18 = smov 0  }
   0x4 LB: > { %s25_s19 = sadd.s32 1, %s2049_s16  ;;  %s32_s20 = sadd.s32 1, %s2053_s17  ;;  %s2057_s18 = sphi %s2091_s18, %s13_s18   ;;  %s2053_s17 = sphi %s2089_s17, %s2526_s17   ;;  %s2049_s16 = sphi %s2087_s16, %s2525_s16   ;;  %s2045_s15 = sphi %s2085_s15, %s2524_s15   ;;  %s2041_s14 = sphi %s2083_s14, %s2523_s14   ;;  %s2037_s13 = sphi %s2081_s13, %s2522_s13   ;;  %s2033_s12 = sphi %s2079_s12, %s2521_s12  }
   0x5   : > { %p26_p0 = scmp.ge.s32.totalorder %s25_s19, 3  ;;  %p48_p1 = scmp.ne.s32.totalorder %s2037_s13, %s2033_s12 }
   0x6   : > { %p49_p2 = scmp.eq.s32.totalorder %s2057_s18, 0  ;;  %s41_s24 = sadd.s32 1, %s2037_s13 }
   0x7   : > { %s2528_s19 = smov (%p26_p0, %s25_s19), 0  ;;  %s2530_s20 = smov (!%p26_p0, %s32_s20), %s2053_s17 }
   0x8   : > { %p50_p3 = por %p49_p2, %p48_p1  ;;  %p34_p4 = scmp.ge.s32.totalorder %s2530_s20, 2 }
   0x9   : > { %s37_s21 = ssub.s32 %s2049_s16, %s2528_s19  ;;  %p1508_p6 = scmp.ge.s32.totalorder %s2057_s18, 6 }
   0xa   : > { %s2532_s20 = smov (%p34_p4, %s2530_s20), 0 }
   0xb   : > { %s36_s22 = ssub.s32 %s2053_s17, %s2532_s20  ;;  %162 = sbr.rel (%p1508_p6) target bundleno = 62 (0x3e), region = 20 }
   0xc   : > { %s38_s23 = sor.u32 %s37_s21, %s36_s22 }
   0xd   : > { %p39_p5 = scmp.eq.s32.totalorder %s38_s23, 0 }
   0xf   : > { %s2130_s25 = scalar_select %p39_p5, %s2037_s13, %s41_s24  }
  0x10   : > { %165 = sbr.rel (!%p50_p3) target bundleno = 62 (0x3e), region = 24  ;;  %s167_s26 = sand.u32 (%p50_p3), 1, %s2037_s13  }
  0x11   : > { %s171_s27 = smul.u32 (%p50_p3), 3, %s2049_s16 }
  0x12   : > { %s1856_s28 = smul.u32 (%p50_p3), 384, %s167_s26 }
  0x13   : > { %s1857_s29 = smul.u32 (%p50_p3), 288, %s2053_s17 }
  0x14   : > { %s2144_s8 = scalar_lea.vmem (%p50_p3), [#allocation2], %s1856_s28 }
  0x15   : > { %s173_s30 = sadd.s32 %s1857_s29, %s171_s27 }
  0x16   : > { %s1511_s4 = sshll.u32 %s173_s30, 2 }
  0x17   : > { %s2139_s7 = scalar_lea.vmem %s2517_s0, %s1511_s4 }
  0x18   : > { %v190_v0 = vld [vmem:[%s2139_s7] sm:$0xff]  ;;  %v194_v2 = vld [vmem:[%s2139_s7 + $0x48] sm:$0xff]  ;;  %v198_v4 = vld [vmem:[%s2139_s7 + $0x90] sm:$0xff] }
  0x19   : > { %v192_v1 = vld [vmem:[%s2139_s7 + $0x24] sm:$0xff]  ;;  %191 = vst [vmem:[%s2144_s8] sm:$0xff] %v190_v0  ;;  %195 = vst [vmem:[%s2144_s8 + $0x18] sm:$0xff] %v194_v2  ;;  %v196_v3 = vld [vmem:[%s2139_s7 + $0x6c] sm:$0xff] }
  0x1a   : > { %193 = vst [vmem:[%s2144_s8 + $0xc] sm:$0xff] %v192_v1  ;;  %v200_v5 = vld [vmem:[%s2139_s7 + $0xb4] sm:$0xff]  ;;  %197 = vst [vmem:[%s2144_s8 + $0x24] sm:$0xff] %v196_v3  ;;  %v204_v7 = vld [vmem:[%s2139_s7 + $0xfc] sm:$0xff] }
  0x1b   : > { %199 = vst [vmem:[%s2144_s8 + $0x30] sm:$0xff] %v198_v4  ;;  %201 = vst [vmem:[%s2144_s8 + $0x3c] sm:$0xff] %v200_v5  ;;  %v202_v6 = vld [vmem:[%s2139_s7 + $0xd8] sm:$0xff]  ;;  %v206_v8 = vld [vmem:[%s2139_s7 + $0x120] sm:$0xff] }
  0x1c   : > { %203 = vst [vmem:[%s2144_s8 + $0x48] sm:$0xff] %v202_v6  ;;  %205 = vst [vmem:[%s2144_s8 + $0x54] sm:$0xff] %v204_v7  ;;  %v208_v9 = vld [vmem:[%s2139_s7 + $0x144] sm:$0xff]  ;;  %v212_v11 = vld [vmem:[%s2139_s7 + $0x18c] sm:$0xff] }
  0x1d   : > { %207 = vst [vmem:[%s2144_s8 + $0x60] sm:$0xff] %v206_v8  ;;  %v210_v10 = vld [vmem:[%s2139_s7 + $0x168] sm:$0xff]  ;;  %209 = vst [vmem:[%s2144_s8 + $0x6c] sm:$0xff] %v208_v9  ;;  %v214_v12 = vld [vmem:[%s2139_s7 + $0x1b0] sm:$0xff] }
  0x1e   : > { %211 = vst [vmem:[%s2144_s8 + $0x78] sm:$0xff] %v210_v10  ;;  %213 = vst [vmem:[%s2144_s8 + $0x84] sm:$0xff] %v212_v11  ;;  %v216_v13 = vld [vmem:[%s2139_s7 + $0x1d4] sm:$0xff]  ;;  %v220_v15 = vld [vmem:[%s2139_s7 + $0x21c] sm:$0xff] }
  0x1f   : > { %v218_v14 = vld [vmem:[%s2139_s7 + $0x1f8] sm:$0xff]  ;;  %215 = vst [vmem:[%s2144_s8 + $0x90] sm:$0xff] %v214_v12  ;;  %217 = vst [vmem:[%s2144_s8 + $0x9c] sm:$0xff] %v216_v13  ;;  %v222_v16 = vld [vmem:[%s2139_s7 + $0x240] sm:$0xff] }
  0x20   : > { %219 = vst [vmem:[%s2144_s8 + $0xa8] sm:$0xff] %v218_v14  ;;  %v224_v17 = vld [vmem:[%s2139_s7 + $0x264] sm:$0xff]  ;;  %221 = vst [vmem:[%s2144_s8 + $0xb4] sm:$0xff] %v220_v15  ;;  %v228_v19 = vld [vmem:[%s2139_s7 + $0x2ac] sm:$0xff] }
  0x21   : > { %223 = vst [vmem:[%s2144_s8 + $0xc0] sm:$0xff] %v222_v16  ;;  %225 = vst [vmem:[%s2144_s8 + $0xcc] sm:$0xff] %v224_v17  ;;  %v226_v18 = vld [vmem:[%s2139_s7 + $0x288] sm:$0xff]  ;;  %v230_v20 = vld [vmem:[%s2139_s7 + $0x2d0] sm:$0xff] }
  0x22   : > { %227 = vst [vmem:[%s2144_s8 + $0xd8] sm:$0xff] %v226_v18  ;;  %229 = vst [vmem:[%s2144_s8 + $0xe4] sm:$0xff] %v228_v19  ;;  %v232_v21 = vld [vmem:[%s2139_s7 + $0x2f4] sm:$0xff]  ;;  %v236_v23 = vld [vmem:[%s2139_s7 + $0x33c] sm:$0xff] }
  0x23   : > { %231 = vst [vmem:[%s2144_s8 + $0xf0] sm:$0xff] %v230_v20  ;;  %v234_v22 = vld [vmem:[%s2139_s7 + $0x318] sm:$0xff]  ;;  %233 = vst [vmem:[%s2144_s8 + $0xfc] sm:$0xff] %v232_v21  ;;  %v238_v24 = vld [vmem:[%s2139_s7 + $0x360] sm:$0xff] }
  0x24   : > { %235 = vst [vmem:[%s2144_s8 + $0x108] sm:$0xff] %v234_v22  ;;  %237 = vst [vmem:[%s2144_s8 + $0x114] sm:$0xff] %v236_v23  ;;  %v240_v25 = vld [vmem:[%s2139_s7 + $0x384] sm:$0xff]  ;;  %v244_v27 = vld [vmem:[%s2139_s7 + $0x3cc] sm:$0xff] }
  0x25   : > { %v242_v26 = vld [vmem:[%s2139_s7 + $0x3a8] sm:$0xff]  ;;  %239 = vst [vmem:[%s2144_s8 + $0x120] sm:$0xff] %v238_v24  ;;  %241 = vst [vmem:[%s2144_s8 + $0x12c] sm:$0xff] %v240_v25  ;;  %v246_v28 = vld [vmem:[%s2139_s7 + $0x3f0] sm:$0xff] }
  0x26   : > { %243 = vst [vmem:[%s2144_s8 + $0x138] sm:$0xff] %v242_v26  ;;  %v248_v29 = vld [vmem:[%s2139_s7 + $0x414] sm:$0xff]  ;;  %245 = vst [vmem:[%s2144_s8 + $0x144] sm:$0xff] %v244_v27  ;;  %v252_v31 = vld [vmem:[%s2139_s7 + $0x45c] sm:$0xff] }
  0x27   : > { %247 = vst [vmem:[%s2144_s8 + $0x150] sm:$0xff] %v246_v28  ;;  %249 = vst [vmem:[%s2144_s8 + $0x15c] sm:$0xff] %v248_v29  ;;  %v250_v30 = vld [vmem:[%s2139_s7 + $0x438] sm:$0xff]  ;;  %v1512_v32 = vld [vmem:[%s2139_s7 + $0x8] sm:$0xf] }
  0x28   : > { %251 = vst [vmem:[%s2144_s8 + $0x168] sm:$0xff] %v250_v30  ;;  %253 = vst [vmem:[%s2144_s8 + $0x174] sm:$0xff] %v252_v31  ;;  %v1514_v33 = vld [vmem:[%s2139_s7 + $0x2c] sm:$0xf]  ;;  %v1516_v34 = vld [vmem:[%s2139_s7 + $0x50] sm:$0xf] }
  0x29   : > { %1513 = vst [vmem:[%s2144_s8 + $0x8] sm:$0xf] %v1512_v32  ;;  %v1518_v35 = vld [vmem:[%s2139_s7 + $0x74] sm:$0xf]  ;;  %1515 = vst [vmem:[%s2144_s8 + $0x14] sm:$0xf] %v1514_v33 }
  0x2a   : > { %1517 = vst [vmem:[%s2144_s8 + $0x20] sm:$0xf] %v1516_v34  ;;  %1519 = vst [vmem:[%s2144_s8 + $0x2c] sm:$0xf] %v1518_v35  ;;  %v1520_v36 = vld [vmem:[%s2139_s7 + $0x98] sm:$0xf] }
  0x2b   : > { %v1522_v37 = vld [vmem:[%s2139_s7 + $0xbc] sm:$0xf]  ;;  %v1524_v38 = vld [vmem:[%s2139_s7 + $0xe0] sm:$0xf]  ;;  %1521 = vst [vmem:[%s2144_s8 + $0x38] sm:$0xf] %v1520_v36 }
  0x2c   : > { %1523 = vst [vmem:[%s2144_s8 + $0x44] sm:$0xf] %v1522_v37  ;;  %1525 = vst [vmem:[%s2144_s8 + $0x50] sm:$0xf] %v1524_v38  ;;  %v1526_v39 = vld [vmem:[%s2139_s7 + $0x104] sm:$0xf] }
  0x2d   : > { %v1528_v40 = vld [vmem:[%s2139_s7 + $0x128] sm:$0xf]  ;;  %v1530_v41 = vld [vmem:[%s2139_s7 + $0x14c] sm:$0xf]  ;;  %1527 = vst [vmem:[%s2144_s8 + $0x5c] sm:$0xf] %v1526_v39 }
  0x2e   : > { %1529 = vst [vmem:[%s2144_s8 + $0x68] sm:$0xf] %v1528_v40  ;;  %1531 = vst [vmem:[%s2144_s8 + $0x74] sm:$0xf] %v1530_v41  ;;  %v1532_v42 = vld [vmem:[%s2139_s7 + $0x170] sm:$0xf] }
  0x2f   : > { %v1534_v43 = vld [vmem:[%s2139_s7 + $0x194] sm:$0xf]  ;;  %v1536_v44 = vld [vmem:[%s2139_s7 + $0x1b8] sm:$0xf]  ;;  %1533 = vst [vmem:[%s2144_s8 + $0x80] sm:$0xf] %v1532_v42 }
  0x30   : > { %1535 = vst [vmem:[%s2144_s8 + $0x8c] sm:$0xf] %v1534_v43  ;;  %1537 = vst [vmem:[%s2144_s8 + $0x98] sm:$0xf] %v1536_v44  ;;  %v1538_v45 = vld [vmem:[%s2139_s7 + $0x1dc] sm:$0xf] }
  0x31   : > { %v1540_v46 = vld [vmem:[%s2139_s7 + $0x200] sm:$0xf]  ;;  %v1542_v47 = vld [vmem:[%s2139_s7 + $0x224] sm:$0xf]  ;;  %1539 = vst [vmem:[%s2144_s8 + $0xa4] sm:$0xf] %v1538_v45 }
  0x32   : > { %1541 = vst [vmem:[%s2144_s8 + $0xb0] sm:$0xf] %v1540_v46  ;;  %1543 = vst [vmem:[%s2144_s8 + $0xbc] sm:$0xf] %v1542_v47  ;;  %v1544_v48 = vld [vmem:[%s2139_s7 + $0x248] sm:$0xf] }
  0x33   : > { %v1546_v49 = vld [vmem:[%s2139_s7 + $0x26c] sm:$0xf]  ;;  %v1548_v50 = vld [vmem:[%s2139_s7 + $0x290] sm:$0xf]  ;;  %1545 = vst [vmem:[%s2144_s8 + $0xc8] sm:$0xf] %v1544_v48 }
  0x34   : > { %1547 = vst [vmem:[%s2144_s8 + $0xd4] sm:$0xf] %v1546_v49  ;;  %1549 = vst [vmem:[%s2144_s8 + $0xe0] sm:$0xf] %v1548_v50  ;;  %v1550_v51 = vld [vmem:[%s2139_s7 + $0x2b4] sm:$0xf] }
  0x35   : > { %v1552_v52 = vld [vmem:[%s2139_s7 + $0x2d8] sm:$0xf]  ;;  %v1554_v53 = vld [vmem:[%s2139_s7 + $0x2fc] sm:$0xf]  ;;  %1551 = vst [vmem:[%s2144_s8 + $0xec] sm:$0xf] %v1550_v51 }
  0x36   : > { %1553 = vst [vmem:[%s2144_s8 + $0xf8] sm:$0xf] %v1552_v52  ;;  %1555 = vst [vmem:[%s2144_s8 + $0x104] sm:$0xf] %v1554_v53  ;;  %v1556_v54 = vld [vmem:[%s2139_s7 + $0x320] sm:$0xf] }
  0x37   : > { %v1558_v55 = vld [vmem:[%s2139_s7 + $0x344] sm:$0xf]  ;;  %v1560_v56 = vld [vmem:[%s2139_s7 + $0x368] sm:$0xf]  ;;  %1557 = vst [vmem:[%s2144_s8 + $0x110] sm:$0xf] %v1556_v54 }
  0x38   : > { %1559 = vst [vmem:[%s2144_s8 + $0x11c] sm:$0xf] %v1558_v55  ;;  %1561 = vst [vmem:[%s2144_s8 + $0x128] sm:$0xf] %v1560_v56  ;;  %v1562_v57 = vld [vmem:[%s2139_s7 + $0x38c] sm:$0xf] }
  0x39   : > { %v1564_v58 = vld [vmem:[%s2139_s7 + $0x3b0] sm:$0xf]  ;;  %v1566_v59 = vld [vmem:[%s2139_s7 + $0x3d4] sm:$0xf]  ;;  %1563 = vst [vmem:[%s2144_s8 + $0x134] sm:$0xf] %v1562_v57 }
  0x3a   : > { %1565 = vst [vmem:[%s2144_s8 + $0x140] sm:$0xf] %v1564_v58  ;;  %1567 = vst [vmem:[%s2144_s8 + $0x14c] sm:$0xf] %v1566_v59  ;;  %v1568_v60 = vld [vmem:[%s2139_s7 + $0x3f8] sm:$0xf] }
  0x3b   : > { %v1570_v61 = vld [vmem:[%s2139_s7 + $0x41c] sm:$0xf]  ;;  %v1572_v62 = vld [vmem:[%s2139_s7 + $0x440] sm:$0xf]  ;;  %1569 = vst [vmem:[%s2144_s8 + $0x158] sm:$0xf] %v1568_v60 }
  0x3c   : > { %1571 = vst [vmem:[%s2144_s8 + $0x164] sm:$0xf] %v1570_v61  ;;  %1573 = vst [vmem:[%s2144_s8 + $0x170] sm:$0xf] %v1572_v62  ;;  %v1574_v63 = vld [vmem:[%s2139_s7 + $0x464] sm:$0xf] }
  0x3d   : > { %1575 = vst [vmem:[%s2144_s8 + $0x17c] sm:$0xf] %v1574_v63 }
  0x3e PF: > { %p1576_p7 = scmp.ge.s32.totalorder %s2057_s18, 1  ;;  %p342_p8 = scmp.lt.s32.totalorder %s2057_s18, 7 }
  0x40   : > { %p343_p9 = pnand %p1576_p7, %p342_p8 }
  0x41   : > { %s349_s9 = sand.u32 (!%p343_p9), 1, %s2033_s12   ;;  %s388_s10 = smul.u32 (!%p343_p9), 48, %s2041_s14 }
  0x42   : > { %346 = sbr.rel (%p343_p9) target bundleno = 423 (0x1a7), region = 54  ;;  %s1578_s21 = sshll.u32 (!%p343_p9), %s2045_s15, 5 }
  0x43   : > { %s1858_s11 = smul.u32 (!%p343_p9), 384, %s349_s9  ;;  %p389_p10 = scmp.lt.s32.totalorder (!%p343_p9), %s388_s10, 143 }
  0x44   : > { %p401_p11 = scmp.lt.s32.totalorder (!%p343_p9), %s1578_s21, 63  ;;  %p1580_p12 = scmp.ne.s32.totalorder (!%p343_p9), %s2041_s14, 0 }
  0x45   : > { %s2286_s12 = scalar_lea.vmem (!%p343_p9), [#allocation2], %s1858_s11 }
  0x47   : > { %s2534_s10 = smov (!%p389_p10, %s388_s10), 143  ;;  %s2536_s21 = smov (!%p401_p11, %s1578_s21), 63 }
  0x48   : > { %s1577_s22 = sshll.u32 %s2534_s10, 2  ;;  %s1579_s27 = sshll.u32 %s2536_s21, 3 }
  0x49   : > { %s2279_s26 = scalar_lea.vmem %s2518_s1, %s1577_s22  ;;  %s2284_s30 = scalar_lea.vmem %s2520_s3, %s1579_s27 }
  0x4a   : > { %413 = sbr.rel (%p1580_p12) target bundleno = 96 (0x60), region = 62 }
  0x4f   : > { %v1581_v0 = vld [vmem:[%s2519_s2] ss:$0 sm:$0xff] }
  0x50   : > { %421 = vst [vmem:[%s2284_s30] sm:$0xff] %v1581_v0  ;;  %422 = vst [vmem:[%s2284_s30 + $0x8] sm:$0xff] %v1581_v0 }
  0x51   : > { %423 = vst [vmem:[%s2284_s30 + $0x10] sm:$0xff] %v1581_v0  ;;  %424 = vst [vmem:[%s2284_s30 + $0x18] sm:$0xff] %v1581_v0 }
  0x52   : > { %425 = vst [vmem:[%s2284_s30 + $0x20] sm:$0xff] %v1581_v0  ;;  %426 = vst [vmem:[%s2284_s30 + $0x28] sm:$0xff] %v1581_v0 }
  0x53   : > { %427 = vst [vmem:[%s2284_s30 + $0x30] sm:$0xff] %v1581_v0  ;;  %428 = vst [vmem:[%s2284_s30 + $0x38] sm:$0xff] %v1581_v0 }
  0x54   : > { %429 = vst [vmem:[%s2284_s30 + $0x40] sm:$0xff] %v1581_v0  ;;  %430 = vst [vmem:[%s2284_s30 + $0x48] sm:$0xff] %v1581_v0 }
  0x55   : > { %431 = vst [vmem:[%s2284_s30 + $0x50] sm:$0xff] %v1581_v0  ;;  %432 = vst [vmem:[%s2284_s30 + $0x58] sm:$0xff] %v1581_v0 }
  0x56   : > { %433 = vst [vmem:[%s2284_s30 + $0x60] sm:$0xff] %v1581_v0  ;;  %434 = vst [vmem:[%s2284_s30 + $0x68] sm:$0xff] %v1581_v0 }
  0x57   : > { %435 = vst [vmem:[%s2284_s30 + $0x70] sm:$0xff] %v1581_v0  ;;  %436 = vst [vmem:[%s2284_s30 + $0x78] sm:$0xff] %v1581_v0 }
  0x58   : > { %437 = vst [vmem:[%s2284_s30 + $0x80] sm:$0xff] %v1581_v0  ;;  %438 = vst [vmem:[%s2284_s30 + $0x88] sm:$0xff] %v1581_v0 }
  0x59   : > { %439 = vst [vmem:[%s2284_s30 + $0x90] sm:$0xff] %v1581_v0  ;;  %440 = vst [vmem:[%s2284_s30 + $0x98] sm:$0xff] %v1581_v0 }
  0x5a   : > { %441 = vst [vmem:[%s2284_s30 + $0xa0] sm:$0xff] %v1581_v0  ;;  %442 = vst [vmem:[%s2284_s30 + $0xa8] sm:$0xff] %v1581_v0 }
  0x5b   : > { %443 = vst [vmem:[%s2284_s30 + $0xb0] sm:$0xff] %v1581_v0  ;;  %444 = vst [vmem:[%s2284_s30 + $0xb8] sm:$0xff] %v1581_v0 }
  0x5c   : > { %445 = vst [vmem:[%s2284_s30 + $0xc0] sm:$0xff] %v1581_v0  ;;  %446 = vst [vmem:[%s2284_s30 + $0xc8] sm:$0xff] %v1581_v0 }
  0x5d   : > { %447 = vst [vmem:[%s2284_s30 + $0xd0] sm:$0xff] %v1581_v0  ;;  %448 = vst [vmem:[%s2284_s30 + $0xd8] sm:$0xff] %v1581_v0 }
  0x5e   : > { %449 = vst [vmem:[%s2284_s30 + $0xe0] sm:$0xff] %v1581_v0  ;;  %450 = vst [vmem:[%s2284_s30 + $0xe8] sm:$0xff] %v1581_v0 }
  0x5f   : > { %451 = vst [vmem:[%s2284_s30 + $0xf0] sm:$0xff] %v1581_v0  ;;  %452 = vst [vmem:[%s2284_s30 + $0xf8] sm:$0xff] %v1581_v0 }
  0x60 PF: > { %v1915_v1 = vld [vmem:[%s2279_s26 + $0x78] sm:$0xff]   ;;  %v1917_v3 = vld [vmem:[%s2279_s26 + $0x70] sm:$0xff]   ;;  %v1919_v5 = vld [vmem:[%s2279_s26 + $0x68] sm:$0xff]  }
  0x61   : > { %v1916_v2 = vld [vmem:[%s2279_s26 + $0x38] sm:$0xff]   ;;  %1656 = vmatprep.subr.bf16.mxu0 %v1915_v1  ;;  %1840 = vmatprep.subr.bf16.mxu1 %v1915_v1  ;;  %v1918_v4 = vld [vmem:[%s2279_s26 + $0x30] sm:$0xff]   ;;  %v1920_v6 = vld [vmem:[%s2279_s26 + $0x28] sm:$0xff]  }
  0x62   : > { %1657 = vmatpush3.bf16.msra.mxu0 %v1916_v2  ;;  %1848 = vmatpush3.bf16.msra.mxu1 %v1916_v2  ;;  %v1921_v7 = vld [vmem:[%s2279_s26 + $0x60] sm:$0xff]   ;;  %v1923_v9 = vld [vmem:[%s2279_s26 + $0x58] sm:$0xff]   ;;  %v1925_v11 = vld [vmem:[%s2279_s26 + $0x50] sm:$0xff]  }
  0x63   : > { %1658 = vmatprep.subr.bf16.mxu0 %v1917_v3  ;;  %1841 = vmatprep.subr.bf16.mxu1 %v1917_v3  ;;  %v1922_v8 = vld [vmem:[%s2279_s26 + $0x20] sm:$0xff]   ;;  %v1924_v10 = vld [vmem:[%s2279_s26 + $0x18] sm:$0xff]   ;;  %v1926_v14 = vld [vmem:[%s2279_s26 + $0x10] sm:$0xff]  }
  0x64   : > { %v1933_v12 = vld [vmem:[%s2286_s12 + $0x4] ss:$12 sps:$4 sm:$0xff]   ;;  %v1927_v15 = vld [vmem:[%s2279_s26 + $0x48] sm:$0xff]   ;;  %v1937_v19 = vld [vmem:[%s2279_s26 + $0xb8] sm:$0xff]  }
  0x65   : > { %v1936_v13 = vld [vmem:[%s2286_s12 + $0x124] ss:$12 sps:$4 sm:$0xff]   ;;  %1029 = vmatprep.mubr.bf16.mxu0 %v1933_v12  ;;  %v1928_v16 = vld [vmem:[%s2279_s26 + $0x8] sm:$0xff]   ;;  %v1947_v29 = vld [vmem:[%s2286_s12 + $0x34] ss:$12 sps:$4 sm:$0xff]  }
  0x66   : > { %1659 = vmatpush3.bf16.msra.mxu0 %v1918_v4  ;;  %1849 = vmatpush3.bf16.msra.mxu1 %v1918_v4  ;;  %v1929_v17 = vld [vmem:[%s2279_s26 + $0x40] sm:$0xff]   ;;  %v1939_v22 = vld [vmem:[%s2286_s12 + $0x1c] ss:$12 sps:$4 sm:$0xff]   ;;  %v1938_v23 = vld [vmem:[%s2279_s26 + $0xb0] sm:$0xff]  }
  0x67   : > { %1660 = vmatprep.subr.bf16.mxu0 %v1919_v5  ;;  %1842 = vmatprep.subr.bf16.mxu1 %v1919_v5  ;;  %v1930_v18 = vld [vmem:[%s2279_s26] sm:$0xff]   ;;  %v1941_v24 = vld [vmem:[%s2286_s12 + $0x13c] ss:$12 sps:$4 sm:$0xff]   ;;  %v1954_v34 = vld [vmem:[%s2279_s26 + $0x90] sm:$0xff]  }
  0x68   : > { %1125 = vmatprep.mubr.bf16.mxu1 %v1936_v13  ;;  %v1931_v20 = vld [vmem:[%s2286_s12] ss:$12 sps:$4 sm:$0xff]   ;;  %v1943_v25 = vld [vmem:[%s2286_s12 + $0x18] ss:$12 sps:$4 sm:$0xff]   ;;  %v1951_v32 = vld [vmem:[%s2286_s12 + $0x30] ss:$12 sps:$4 sm:$0xff]  }
  0x69   : > { %v1934_v21 = vld [vmem:[%s2286_s12 + $0x120] ss:$12 sps:$4 sm:$0xff]   ;;  %v1944_v27 = vld [vmem:[%s2286_s12 + $0x138] ss:$12 sps:$4 sm:$0xff]   ;;  %v1952_v33 = vld [vmem:[%s2286_s12 + $0x150] ss:$12 sps:$4 sm:$0xff]  }
  0x6a   : > { %1661 = vmatpush3.bf16.msra.mxu0 %v1920_v6  ;;  %1850 = vmatpush3.bf16.msra.mxu1 %v1920_v6  ;;  %v1945_v26 = vld [vmem:[%s2279_s26 + $0xa8] sm:$0xff]   ;;  %v1946_v28 = vld [vmem:[%s2279_s26 + $0xa0] sm:$0xff]   ;;  %v1953_v31 = vld [vmem:[%s2279_s26 + $0x98] sm:$0xff]  }
  0x6b   : > { %1662 = vmatprep.subr.bf16.mxu0 %v1921_v7  ;;  %1843 = vmatprep.subr.bf16.mxu1 %v1921_v7  ;;  %v1949_v30 = vld [vmem:[%s2286_s12 + $0x154] ss:$12 sps:$4 sm:$0xff]   ;;  %v1955_v35 = vld [vmem:[%s2286_s12 + $0x4c] ss:$12 sps:$4 sm:$0xff]   ;;  %v1963_v40 = vld [vmem:[%s2286_s12 + $0x64] ss:$12 sps:$4 sm:$0xff]  }
  0x6c   : > { %v1957_v36 = vld [vmem:[%s2286_s12 + $0x16c] ss:$12 sps:$4 sm:$0xff]   ;;  %v1959_v38 = vld [vmem:[%s2286_s12 + $0x48] ss:$12 sps:$4 sm:$0xff]   ;;  %v1962_v41 = vld [vmem:[%s2279_s26 + $0x80] sm:$0xff]  }
  0x6d   : > { %v1961_v37 = vld [vmem:[%s2279_s26 + $0x88] sm:$0xff]   ;;  %v1970_v46 = vld [vmem:[%s2286_s12 + $0x38] ss:$12 sps:$4 sm:$0xff]   ;;  %v1972_v48 = vld [vmem:[%s2286_s12 + $0x50] ss:$12 sps:$4 sm:$0xff]  }
  0x6e   : > { %1663 = vmatpush3.bf16.msra.mxu0 %v1922_v8  ;;  %1851 = vmatpush3.bf16.msra.mxu1 %v1922_v8  ;;  %v1960_v39 = vld [vmem:[%s2286_s12 + $0x168] ss:$12 sps:$4 sm:$0xff]   ;;  %v1966_v43 = vld [vmem:[%s2286_s12 + $0x60] ss:$12 sps:$4 sm:$0xff]   ;;  %v1971_v47 = vld [vmem:[%s2286_s12 + $0x78] ss:$12 sps:$4 sm:$0xff]  }
  0x6f   : > { %1664 = vmatprep.subr.bf16.mxu0 %v1923_v9  ;;  %1844 = vmatprep.subr.bf16.mxu1 %v1923_v9  ;;  %v1965_v42 = vld [vmem:[%s2286_s12 + $0x8] ss:$12 sps:$4 sm:$0xff]   ;;  %v1967_v44 = vld [vmem:[%s2286_s12 + $0x20] ss:$12 sps:$4 sm:$0xff]   ;;  %v1976_v51 = vld [vmem:[%s2286_s12 + $0x90] ss:$12 sps:$4 sm:$0xff]  }
  0x70   : > { %v1968_v45 = vld [vmem:[%s2286_s12 + $0x7c] ss:$12 sps:$4 sm:$0xff]   ;;  %v1973_v49 = vld [vmem:[%s2286_s12 + $0x94] ss:$12 sps:$4 sm:$0xff]   ;;  %v1978_v53 = vld [vmem:[%s2286_s12 + $0xac] ss:$12 sps:$4 sm:$0xff]  }
  0x71   : > { %v1975_v50 = vld [vmem:[%s2286_s12 + $0x68] ss:$12 sps:$4 sm:$0xff]   ;;  %v1977_v52 = vld [vmem:[%s2286_s12 + $0x80] ss:$12 sps:$4 sm:$0xff]   ;;  %v1980_v54 = vld [vmem:[%s2286_s12 + $0x98] ss:$12 sps:$4 sm:$0xff]  }
  0x72   : > { %1665 = vmatpush3.bf16.msra.mxu0 %v1924_v10  ;;  %1852 = vmatpush3.bf16.msra.mxu1 %v1924_v10  ;;  %v1981_v55 = vld [vmem:[%s2286_s12 + $0xa8] ss:$12 sps:$4 sm:$0xff]   ;;  %v1982_v56 = vld [vmem:[%s2286_s12 + $0xb0] ss:$12 sps:$4 sm:$0xff]   ;;  %v1986_v59 = vld [vmem:[%s2286_s12 + $0xc0] ss:$12 sps:$4 sm:$0xff]  }
  0x73   : > { %1666 = vmatprep.subr.bf16.mxu0 %v1925_v11  ;;  %1845 = vmatprep.subr.bf16.mxu1 %v1925_v11  ;;  %v1983_v57 = vld [vmem:[%s2286_s12 + $0xc4] ss:$12 sps:$4 sm:$0xff]   ;;  %v1985_v58 = vld [vmem:[%s2286_s12 + $0xc8] ss:$12 sps:$4 sm:$0xff]   ;;  %v1987_v60 = vld [vmem:[%s2286_s12 + $0xe0] ss:$12 sps:$4 sm:$0xff]  }
  0x74   : > { %v1988_v61 = vld [vmem:[%s2286_s12 + $0xdc] ss:$12 sps:$4 sm:$0xff]   ;;  %v1990_v62 = vld [vmem:[%s2286_s12 + $0xf8] ss:$12 sps:$4 sm:$0xff]   ;;  %v1993_v1 = vld [vmem:[%s2286_s12 + $0xf4] ss:$12 sps:$4 sm:$0xff]  }
  0x75   : > { %v1991_v63 = vld [vmem:[%s2286_s12 + $0xd8] ss:$12 sps:$4 sm:$0xff]   ;;  %v1992_v0 = vld [vmem:[%s2286_s12 + $0x110] ss:$12 sps:$4 sm:$0xff]   ;;  %v1995_v2 = vld [vmem:[%s2286_s12 + $0x128] ss:$12 sps:$4 sm:$0xff]  }
  0x76   : > { %1667 = vmatpush3.bf16.msra.mxu0 %v1926_v14  ;;  %1853 = vmatpush3.bf16.msra.mxu1 %v1926_v14  ;;  %v1996_v3 = vld [vmem:[%s2286_s12 + $0xf0] ss:$12 sps:$4 sm:$0xff]   ;;  %v1997_v4 = vld [vmem:[%s2286_s12 + $0x140] ss:$12 sps:$4 sm:$0xff]   ;;  %v2000_v6 = vld [vmem:[%s2286_s12 + $0x158] ss:$12 sps:$4 sm:$0xff]  }
  0x77   : > { %1668 = vmatprep.subr.bf16.mxu0 %v1927_v15  ;;  %1846 = vmatprep.subr.bf16.mxu1 %v1927_v15  ;;  %v1998_v5 = vld [vmem:[%s2286_s12 + $0x10c] ss:$12 sps:$4 sm:$0xff]   ;;  %v2001_v7 = vld [vmem:[%s2286_s12 + $0x108] ss:$12 sps:$4 sm:$0xff]   ;;  %v2002_v8 = vld [vmem:[%s2286_s12 + $0x170] ss:$12 sps:$4 sm:$0xff]  }
  0x7a   : > { %1669 = vmatpush3.bf16.msra.mxu0 %v1928_v16  ;;  %1854 = vmatpush3.bf16.msra.mxu1 %v1928_v16 }
  0x7b   : > { %1670 = vmatprep.subr.bf16.mxu0 %v1929_v17  ;;  %1847 = vmatprep.subr.bf16.mxu1 %v1929_v17 }
  0x7e   : > { %1671 = vmatpush3.bf16.msra.mxu0 %v1930_v18  ;;  %1855 = vmatpush3.bf16.msra.mxu1 %v1930_v18 }
  0x7f   : > { %1792 = vmatprep.subr.bf16.mxu1 %v1937_v19 }
  0x81   : > { %1030 = vmatmul.mubr.bf16.vlgmr.msra.gmra.mxu0 %v1931_v20  ;;  %1126 = vmatmul.mubr.bf16.vlgmr.msra.gmra.mxu1 %v1934_v21 }
  0x82   : > { %1793 = vmatpush3.bf16.msra.mxu1 %v1937_v19  ;;  %1037 = vmatprep.mubr.bf16.mxu0 %v1939_v22 }
  0x83   : > { %1794 = vmatprep.subr.bf16.mxu1 %v1938_v23  ;;  %1133 = vmatprep.mubr.bf16.mxu1 %v1941_v24 }
  0x86   : > { %1795 = vmatpush3.bf16.msra.mxu1 %v1938_v23 }
  0x87   : > { %1796 = vmatprep.subr.bf16.mxu1 %v1945_v26 }
  0x89   : > { %1038 = vmatmul.mubr.bf16.gmra.mxu0 %v1943_v25  ;;  %1134 = vmatmul.mubr.bf16.gmra.mxu1 %v1944_v27 }
  0x8a   : > { %1797 = vmatpush3.bf16.msra.mxu1 %v1945_v26  ;;  %1045 = vmatprep.mubr.bf16.mxu0 %v1947_v29 }
  0x8b   : > { %1798 = vmatprep.subr.bf16.mxu1 %v1946_v28  ;;  %1141 = vmatprep.mubr.bf16.mxu1 %v1949_v30 }
  0x8e   : > { %1799 = vmatpush3.bf16.msra.mxu1 %v1946_v28 }
  0x8f   : > { %1800 = vmatprep.subr.bf16.mxu1 %v1953_v31 }
  0x91   : > { %1046 = vmatmul.mubr.bf16.gmra.mxu0 %v1951_v32  ;;  %1142 = vmatmul.mubr.bf16.gmra.mxu1 %v1952_v33 }
  0x92   : > { %1801 = vmatpush3.bf16.msra.mxu1 %v1953_v31  ;;  %1053 = vmatprep.mubr.bf16.mxu0 %v1955_v35 }
  0x93   : > { %1802 = vmatprep.subr.bf16.mxu1 %v1954_v34  ;;  %1149 = vmatprep.mubr.bf16.mxu1 %v1957_v36 }
  0x96   : > { %1803 = vmatpush3.bf16.msra.mxu1 %v1954_v34 }
  0x97   : > { %1804 = vmatprep.subr.bf16.mxu1 %v1961_v37 }
  0x99   : > { %1054 = vmatmul.mubr.bf16.gmra.mxu0 %v1959_v38  ;;  %1150 = vmatmul.mubr.bf16.gmra.mxu1 %v1960_v39 }
  0x9a   : > { %1805 = vmatpush3.bf16.msra.mxu1 %v1961_v37  ;;  %1061 = vmatprep.mubr.bf16.mxu0 %v1963_v40 }
  0x9b   : > { %1806 = vmatprep.subr.bf16.mxu1 %v1962_v41  ;;  %1808 = vmatprep.mubr.bf16.mxu1 %v1965_v42 }
  0x9e   : > { %1807 = vmatpush3.bf16.msra.mxu1 %v1962_v41 }
  0xa1   : > { %1062 = vmatmul.mubr.bf16.gmra.mxu0 %v1966_v43  ;;  %1809 = vmatmul.mubr.bf16.vlgmr.msra.gmra.mxu1 %v1967_v44 }
  0xa2   : > { %1069 = vmatprep.mubr.bf16.mxu0 %v1968_v45  ;;  %1812 = vmatprep.mubr.bf16.mxu1 %v1970_v46 }
  0xa9   : > { %1070 = vmatmul.mubr.bf16.gmra.mxu0 %v1971_v47  ;;  %1813 = vmatmul.mubr.bf16.gmra.mxu1 %v1972_v48 }
  0xaa   : > { %1077 = vmatprep.mubr.bf16.mxu0 %v1973_v49  ;;  %1816 = vmatprep.mubr.bf16.mxu1 %v1975_v50  ;;  %v455_v49 = vld [vmem:[%s2284_s30 + $0x10] sm:$0xff] }
  0xb1   : > { %1078 = vmatmul.mubr.bf16.gmra.mxu0 %v1976_v51  ;;  %1817 = vmatmul.mubr.bf16.gmra.mxu1 %v1977_v52 }
  0xb2   : > { %1085 = vmatprep.mubr.bf16.mxu0 %v1978_v53  ;;  %1820 = vmatprep.mubr.bf16.mxu1 %v1980_v54  ;;  %v453_v54 = vld [vmem:[%s2284_s30] sm:$0xff] }
  0xb9   : > { %1086 = vmatmul.mubr.bf16.gmra.mxu0 %v1981_v55  ;;  %1821 = vmatmul.mubr.bf16.gmra.mxu1 %v1982_v56 }
  0xba   : > { %1093 = vmatprep.mubr.bf16.mxu0 %v1983_v57  ;;  %1824 = vmatprep.mubr.bf16.mxu1 %v1985_v58 }
  0xc1   : > { %1094 = vmatmul.mubr.bf16.gmra.mxu0 %v1986_v59  ;;  %1825 = vmatmul.mubr.bf16.gmra.mxu1 %v1987_v60  ;;  %v456_v60 = vld [vmem:[%s2284_s30 + $0x18] sm:$0xff] }
  0xc2   : > { %1101 = vmatprep.mubr.bf16.mxu0 %v1988_v61  ;;  %1828 = vmatprep.mubr.bf16.mxu1 %v1990_v62 }
  0xc9   : > { %1102 = vmatmul.mubr.bf16.gmra.mxu0 %v1991_v63  ;;  %1829 = vmatmul.mubr.bf16.gmra.mxu1 %v1992_v0 }
  0xca   : > { %1109 = vmatprep.mubr.bf16.mxu0 %v1993_v1  ;;  %1832 = vmatprep.mubr.bf16.mxu1 %v1995_v2  ;;  %v454_v2 = vld [vmem:[%s2284_s30 + $0x8] sm:$0xff] }
  0xd1   : > { %1110 = vmatmul.mubr.bf16.gmra.mxu0 %v1996_v3  ;;  %1833 = vmatmul.mubr.bf16.gmra.mxu1 %v1997_v4 }
  0xd2   : > { %1117 = vmatprep.mubr.bf16.mxu0 %v1998_v5  ;;  %1836 = vmatprep.mubr.bf16.mxu1 %v2000_v6 }
  0xd9   : > { %1118 = vmatmul.mubr.bf16.gmra.mxu0 %v2001_v7  ;;  %1837 = vmatmul.mubr.bf16.gmra.mxu1 %v2002_v8  ;;  %v459_v8 = vld [vmem:[%s2284_s30 + $0x30] sm:$0xff] }
 0x141   : > { %v1672_v9 = vpop.f32.mrf.mxu0  ;;  %v1744_v10 = vpop.f32.mrf.mxu1 }
 0x143   : > { %v1673_v11 = vpop.f32.mrf.mxu0  ;;  %v1745_v12 = vpop.f32.mrf.mxu1 }
 0x144   : > { %v2396_v13 = vadd.f32 %v1745_v12, %v1744_v10  ;;  %v1674_v51 = vadd.f32 %v1673_v11, %v1672_v9 }
 0x145   : > { %v1675_v14 = vpop.f32.mrf.mxu0  ;;  %v1747_v15 = vpop.f32.mrf.mxu1 }
 0x147   : > { %v1676_v16 = vpop.f32.mrf.mxu0  ;;  %v1748_v17 = vpop.f32.mrf.mxu1 }
 0x148   : > { %v2398_v18 = vadd.f32 %v1748_v17, %v1747_v15  ;;  %v1677_v62 = vadd.f32 %v1676_v16, %v1675_v14  ;;  %v457_v15 = vld [vmem:[%s2284_s30 + $0x20] sm:$0xff] }
 0x149   : > { %v1678_v19 = vpop.f32.mrf.mxu0  ;;  %v1750_v20 = vpop.f32.mrf.mxu1 }
 0x14b   : > { %v1679_v21 = vpop.f32.mrf.mxu0  ;;  %v1751_v22 = vpop.f32.mrf.mxu1 }
 0x14c   : > { %v2400_v23 = vadd.f32 %v1751_v22, %v1750_v20  ;;  %v1680_v47 = vadd.f32 %v1679_v21, %v1678_v19  ;;  %v460_v22 = vld [vmem:[%s2284_s30 + $0x38] sm:$0xff] }
 0x14d   : > { %v1681_v24 = vpop.f32.mrf.mxu0  ;;  %v1753_v25 = vpop.f32.mrf.mxu1 }
 0x14f   : > { %v1682_v26 = vpop.f32.mrf.mxu0  ;;  %v1754_v27 = vpop.f32.mrf.mxu1 }
 0x150   : > { %v2402_v28 = vadd.f32 %v1754_v27, %v1753_v25  ;;  %v1683_v56 = vadd.f32 %v1682_v26, %v1681_v24 }
 0x151   : > { %v1684_v29 = vpop.f32.mrf.mxu0  ;;  %v1756_v30 = vpop.f32.mrf.mxu1 }
 0x153   : > { %v1685_v31 = vpop.f32.mrf.mxu0  ;;  %v1757_v32 = vpop.f32.mrf.mxu1 }
 0x154   : > { %v2404_v33 = vadd.f32 %v1757_v32, %v1756_v30  ;;  %v1686_v10 = vadd.f32 %v1685_v31, %v1684_v29  ;;  %v458_v30 = vld [vmem:[%s2284_s30 + $0x28] sm:$0xff] }
 0x155   : > { %v1687_v34 = vpop.f32.mrf.mxu0  ;;  %v1759_v35 = vpop.f32.mrf.mxu1 }
 0x157   : > { %v1688_v36 = vpop.f32.mrf.mxu0  ;;  %v1760_v37 = vpop.f32.mrf.mxu1 }
 0x158   : > { %v2406_v38 = vadd.f32 %v1760_v37, %v1759_v35  ;;  %v1689_v25 = vadd.f32 %v1688_v36, %v1687_v34 }
 0x159   : > { %v1690_v39 = vpop.f32.mrf.mxu0  ;;  %v2408_v40 = vpop.f32.mrf.mxu1 }
 0x15b   : > { %v1691_v41 = vpop.f32.mrf.mxu0  ;;  %v2410_v42 = vpop.f32.mrf.mxu1 }
 0x15c   : > { %v1692_v4 = vadd.f32 %v1691_v41, %v1690_v39  ;;  %v463_v41 = vld [vmem:[%s2284_s30 + $0x50] sm:$0xff] }
 0x15d   : > { %v1693_v43 = vpop.f32.mrf.mxu0  ;;  %v2412_v44 = vpop.f32.mrf.mxu1 }
 0x15f   : > { %v1694_v45 = vpop.f32.mrf.mxu0  ;;  %v2414_v46 = vpop.f32.mrf.mxu1 }
 0x160   : > { %v1695_v17 = vadd.f32 %v1694_v45, %v1693_v43 }
 0x161   : > { %v1696_v48 = vpop.f32.mrf.mxu0  ;;  %v1810_v50 = vpop.f32.mrf.mxu1 }
 0x162   : > { %v1201_v52 = vadd.f32 %v1810_v50, %v1680_v47 }
 0x163   : > { %v1697_v53 = vpop.f32.mrf.mxu0  ;;  %v1192_v55 = vpop.f32.mrf.mxu1 }
 0x164   : > { %v1321_v57 = vadd.f32 %v1201_v52, %v455_v49  ;;  %v1193_v58 = vadd.f32 %v1674_v51, %v1192_v55  ;;  %v1698_v45 = vadd.f32 %v1697_v53, %v1696_v48  ;;  %v461_v49 = vld [vmem:[%s2284_s30 + $0x40] sm:$0xff] }
 0x165   : > { %v1699_v59 = vpop.f32.mrf.mxu0  ;;  %v1811_v61 = vpop.f32.mrf.mxu1 }
 0x166   : > { %1353 = vst [vmem:[%s2284_s30 + $0x10] sm:$0xff] %v1321_v57  ;;  %v1319_v63 = vadd.f32 %v1193_v58, %v453_v54  ;;  %v1204_v0 = vadd.f32 %v1811_v61, %v1683_v56  ;;  %v464_v56 = vld [vmem:[%s2284_s30 + $0x58] sm:$0xff]  ;;  %v462_v61 = vld [vmem:[%s2284_s30 + $0x48] sm:$0xff] }
 0x167   : > { %v1700_v1 = vpop.f32.mrf.mxu0  ;;  %v1195_v3 = vpop.f32.mrf.mxu1 }
 0x168   : > { %1351 = vst [vmem:[%s2284_s30] sm:$0xff] %v1319_v63  ;;  %v1322_v5 = vadd.f32 %v1204_v0, %v456_v60  ;;  %v1196_v6 = vadd.f32 %v1677_v62, %v1195_v3  ;;  %v1701_v58 = vadd.f32 %v1700_v1, %v1699_v59  ;;  %v465_v59 = vld [vmem:[%s2284_s30 + $0x60] sm:$0xff] }
 0x169   : > { %v1702_v7 = vpop.f32.mrf.mxu0  ;;  %v1814_v9 = vpop.f32.mrf.mxu1 }
 0x16a   : > { %1354 = vst [vmem:[%s2284_s30 + $0x18] sm:$0xff] %v1322_v5  ;;  %v1320_v11 = vadd.f32 %v1196_v6, %v454_v2  ;;  %v1217_v12 = vadd.f32 %v1814_v9, %v1692_v4  ;;  %v467_v9 = vld [vmem:[%s2284_s30 + $0x70] sm:$0xff] }
 0x16b   : > { %v1703_v14 = vpop.f32.mrf.mxu0  ;;  %v1208_v16 = vpop.f32.mrf.mxu1 }
 0x16c   : > { %1352 = vst [vmem:[%s2284_s30 + $0x8] sm:$0xff] %v1320_v11  ;;  %v1325_v19 = vadd.f32 %v1217_v12, %v459_v8  ;;  %v1209_v20 = vadd.f32 %v1686_v10, %v1208_v16  ;;  %v1704_v32 = vadd.f32 %v1703_v14, %v1702_v7 }
 0x16d   : > { %v1705_v21 = vpop.f32.mrf.mxu0  ;;  %v1815_v24 = vpop.f32.mrf.mxu1 }
 0x16e   : > { %1357 = vst [vmem:[%s2284_s30 + $0x30] sm:$0xff] %v1325_v19  ;;  %v1323_v26 = vadd.f32 %v1209_v20, %v457_v15  ;;  %v1220_v27 = vadd.f32 %v1815_v24, %v1695_v17  ;;  %v466_v17 = vld [vmem:[%s2284_s30 + $0x68] sm:$0xff]  ;;  %v468_v24 = vld [vmem:[%s2284_s30 + $0x78] sm:$0xff] }
 0x16f   : > { %v1706_v29 = vpop.f32.mrf.mxu0  ;;  %v1211_v31 = vpop.f32.mrf.mxu1 }
 0x170   : > { %1355 = vst [vmem:[%s2284_s30 + $0x20] sm:$0xff] %v1323_v26  ;;  %v1326_v35 = vadd.f32 %v1220_v27, %v460_v22  ;;  %v1212_v37 = vadd.f32 %v1689_v25, %v1211_v31  ;;  %v1707_v51 = vadd.f32 %v1706_v29, %v1705_v21 }
 0x171   : > { %v1708_v39 = vpop.f32.mrf.mxu0  ;;  %v1818_v43 = vpop.f32.mrf.mxu1 }
 0x172   : > { %1358 = vst [vmem:[%s2284_s30 + $0x38] sm:$0xff] %v1326_v35  ;;  %v1324_v34 = vadd.f32 %v1212_v37, %v458_v30  ;;  %v1233_v36 = vadd.f32 %v1818_v43, %v1704_v32  ;;  %v469_v37 = vld [vmem:[%s2284_s30 + $0x80] sm:$0xff] }
 0x173   : > { %v1709_v47 = vpop.f32.mrf.mxu0  ;;  %v1224_v50 = vpop.f32.mrf.mxu1 }
 0x174   : > { %1356 = vst [vmem:[%s2284_s30 + $0x28] sm:$0xff] %v1324_v34  ;;  %v1329_v52 = vadd.f32 %v1233_v36, %v463_v41  ;;  %v1225_v54 = vadd.f32 %v1698_v45, %v1224_v50  ;;  %v1710_v4 = vadd.f32 %v1709_v47, %v1708_v39 }
 0x175   : > { %v1711_v55 = vpop.f32.mrf.mxu0  ;;  %v1819_v57 = vpop.f32.mrf.mxu1 }
 0x176   : > { %1361 = vst [vmem:[%s2284_s30 + $0x50] sm:$0xff] %v1329_v52  ;;  %v1327_v48 = vadd.f32 %v1225_v54, %v461_v49  ;;  %v1236_v53 = vadd.f32 %v1819_v57, %v1707_v51  ;;  %v470_v49 = vld [vmem:[%s2284_s30 + $0x88] sm:$0xff] }
 0x177   : > { %v1712_v60 = vpop.f32.mrf.mxu0  ;;  %v1227_v62 = vpop.f32.mrf.mxu1 }
 0x178   : > { %1359 = vst [vmem:[%s2284_s30 + $0x40] sm:$0xff] %v1327_v48  ;;  %v1330_v63 = vadd.f32 %v1236_v53, %v464_v56  ;;  %v1228_v0 = vadd.f32 %v1701_v58, %v1227_v62  ;;  %v1713_v12 = vadd.f32 %v1712_v60, %v1711_v55  ;;  %v471_v58 = vld [vmem:[%s2284_s30 + $0x90] sm:$0xff] }
 0x179   : > { %v1714_v2 = vpop.f32.mrf.mxu0  ;;  %v1822_v3 = vpop.f32.mrf.mxu1 }
 0x17a   : > { %1362 = vst [vmem:[%s2284_s30 + $0x58] sm:$0xff] %v1330_v63  ;;  %v1328_v5 = vadd.f32 %v1228_v0, %v462_v61 }
 0x17b   : > { %v1715_v6 = vpop.f32.mrf.mxu0  ;;  %v1240_v1 = vpop.f32.mrf.mxu1 }
 0x17c   : > { %1360 = vst [vmem:[%s2284_s30 + $0x48] sm:$0xff] %v1328_v5  ;;  %v1716_v7 = vadd.f32 %v1715_v6, %v1714_v2  ;;  %v1241_v8 = vadd.f32 %v1710_v4, %v1240_v1  ;;  %v472_v2 = vld [vmem:[%s2284_s30 + $0x98] sm:$0xff]  ;;  %v479_v4 = vld [vmem:[%s2284_s30 + $0xd0] sm:$0xff] }
 0x17d   : > { %v1717_v10 = vpop.f32.mrf.mxu0  ;;  %v1823_v11 = vpop.f32.mrf.mxu1 }
 0x17e   : > { %v1249_v14 = vadd.f32 %v1822_v3, %v1716_v7  ;;  %v1331_v15 = vadd.f32 %v1241_v8, %v465_v59  ;;  %v477_v7 = vld [vmem:[%s2284_s30 + $0xc0] sm:$0xff] }
 0x17f   : > { %v1718_v16 = vpop.f32.mrf.mxu0  ;;  %v1243_v19 = vpop.f32.mrf.mxu1 }
 0x180   : > { %v1333_v20 = vadd.f32 %v1249_v14, %v467_v9  ;;  %1363 = vst [vmem:[%s2284_s30 + $0x60] sm:$0xff] %v1331_v15  ;;  %v1719_v21 = vadd.f32 %v1718_v16, %v1717_v10  ;;  %v1244_v22 = vadd.f32 %v1713_v12, %v1243_v19  ;;  %v473_v14 = vld [vmem:[%s2284_s30 + $0xa0] sm:$0xff]  ;;  %v480_v16 = vld [vmem:[%s2284_s30 + $0xd8] sm:$0xff] }
 0x181   : > { %v1720_v25 = vpop.f32.mrf.mxu0  ;;  %v1826_v26 = vpop.f32.mrf.mxu1 }
 0x182   : > { %1365 = vst [vmem:[%s2284_s30 + $0x70] sm:$0xff] %v1333_v20  ;;  %v1252_v27 = vadd.f32 %v1823_v11, %v1719_v21  ;;  %v1332_v29 = vadd.f32 %v1244_v22, %v466_v17  ;;  %v1764_v21 = vadd.f32 %v2410_v42, %v2408_v40 }
 0x183   : > { %v1721_v30 = vpop.f32.mrf.mxu0  ;;  %v1256_v31 = vpop.f32.mrf.mxu1 }
 0x184   : > { %v1334_v32 = vadd.f32 %v1252_v27, %v468_v24  ;;  %1364 = vst [vmem:[%s2284_s30 + $0x68] sm:$0xff] %v1332_v29  ;;  %v1722_v35 = vadd.f32 %v1721_v30, %v1720_v25  ;;  %v478_v24 = vld [vmem:[%s2284_s30 + $0xc8] sm:$0xff] }
 0x185   : > { %v1723_v39 = vpop.f32.mrf.mxu0  ;;  %v1827_v41 = vpop.f32.mrf.mxu1  ;;  %v474_v30 = vld [vmem:[%s2284_s30 + $0xa8] sm:$0xff] }
 0x186   : > { %1366 = vst [vmem:[%s2284_s30 + $0x78] sm:$0xff] %v1334_v32  ;;  %v1257_v43 = vadd.f32 %v1722_v35, %v1256_v31  ;;  %v483_v32 = vld [vmem:[%s2284_s30 + $0xf0] sm:$0xff] }
 0x187   : > { %v1724_v45 = vpop.f32.mrf.mxu0  ;;  %v1259_v34 = vpop.f32.mrf.mxu1 }
 0x188   : > { %v1335_v36 = vadd.f32 %v1257_v43, %v469_v37  ;;  %v1725_v47 = vadd.f32 %v1724_v45, %v1723_v39  ;;  %v1767_v37 = vadd.f32 %v2414_v46, %v2412_v44 }
 0x189   : > { %v1726_v50 = vpop.f32.mrf.mxu0  ;;  %v2450_v51 = vpop.f32.mrf.mxu1 }
 0x18a   : > { %1367 = vst [vmem:[%s2284_s30 + $0x80] sm:$0xff] %v1335_v36  ;;  %v1260_v52 = vadd.f32 %v1725_v47, %v1259_v34  ;;  %v475_v47 = vld [vmem:[%s2284_s30 + $0xb0] sm:$0xff] }
 0x18b   : > { %v1727_v54 = vpop.f32.mrf.mxu0  ;;  %v1272_v55 = vpop.f32.mrf.mxu1 }
 0x18c   : > { %v1336_v56 = vadd.f32 %v1260_v52, %v470_v49  ;;  %v1728_v57 = vadd.f32 %v1727_v54, %v1726_v50  ;;  %v484_v50 = vld [vmem:[%s2284_s30 + $0xf8] sm:$0xff] }
 0x18d   : > { %v1729_v48 = vpop.f32.mrf.mxu0  ;;  %v2454_v53 = vpop.f32.mrf.mxu1 }
 0x18e   : > { %1368 = vst [vmem:[%s2284_s30 + $0x88] sm:$0xff] %v1336_v56  ;;  %v1265_v60 = vadd.f32 %v1826_v26, %v1728_v57  ;;  %v482_v56 = vld [vmem:[%s2284_s30 + $0xe8] sm:$0xff] }
 0x18f   : > { %v1730_v61 = vpop.f32.mrf.mxu0  ;;  %v1275_v62 = vpop.f32.mrf.mxu1 }
 0x190   : > { %v1337_v63 = vadd.f32 %v1265_v60, %v471_v58  ;;  %v1731_v0 = vadd.f32 %v1730_v61, %v1729_v48  ;;  %v476_v61 = vld [vmem:[%s2284_s30 + $0xb8] sm:$0xff] }
 0x191   : > { %v1732_v3 = vpop.f32.mrf.mxu0  ;;  %v1834_v5 = vpop.f32.mrf.mxu1 }
 0x192   : > { %1369 = vst [vmem:[%s2284_s30 + $0x90] sm:$0xff] %v1337_v63  ;;  %v1268_v6 = vadd.f32 %v1827_v41, %v1731_v0  ;;  %v1297_v59 = vadd.f32 %v1834_v5, %v2400_v23  ;;  %v481_v41 = vld [vmem:[%s2284_s30 + $0xe0] sm:$0xff] }
 0x193   : > { %v1733_v1 = vpop.f32.mrf.mxu0  ;;  %v1288_v8 = vpop.f32.mrf.mxu1 }
 0x194   : > { %v1338_v9 = vadd.f32 %v1268_v6, %v472_v2  ;;  %v1345_v10 = vadd.f32 %v1297_v59, %v479_v4  ;;  %v1734_v11 = vadd.f32 %v1733_v1, %v1732_v3  ;;  %v1289_v12 = vadd.f32 %v2396_v13, %v1288_v8 }
 0x195   : > { %v1735_v15 = vpop.f32.mrf.mxu0  ;;  %v1835_v17 = vpop.f32.mrf.mxu1 }
 0x196   : > { %1370 = vst [vmem:[%s2284_s30 + $0x98] sm:$0xff] %v1338_v9  ;;  %1377 = vst [vmem:[%s2284_s30 + $0xd0] sm:$0xff] %v1345_v10  ;;  %v1273_v19 = vadd.f32 %v1734_v11, %v1272_v55  ;;  %v1343_v23 = vadd.f32 %v1289_v12, %v477_v7  ;;  %v1300_v20 = vadd.f32 %v1835_v17, %v2402_v28 }
 0x197   : > { %v1736_v22 = vpop.f32.mrf.mxu0  ;;  %v1291_v13 = vpop.f32.mrf.mxu1 }
 0x198   : > { %v1339_v25 = vadd.f32 %v1273_v19, %v473_v14  ;;  %1375 = vst [vmem:[%s2284_s30 + $0xc0] sm:$0xff] %v1343_v23  ;;  %v1346_v26 = vadd.f32 %v1300_v20, %v480_v16  ;;  %v1737_v27 = vadd.f32 %v1736_v22, %v1735_v15  ;;  %v1292_v29 = vadd.f32 %v2398_v18, %v1291_v13 }
 0x199   : > { %v1738_v31 = vpop.f32.mrf.mxu0  ;;  %v1838_v35 = vpop.f32.mrf.mxu1 }
 0x19a   : > { %1371 = vst [vmem:[%s2284_s30 + $0xa0] sm:$0xff] %v1339_v25  ;;  %1378 = vst [vmem:[%s2284_s30 + $0xd8] sm:$0xff] %v1346_v26  ;;  %v1276_v28 = vadd.f32 %v1737_v27, %v1275_v62  ;;  %v1344_v40 = vadd.f32 %v1292_v29, %v478_v24  ;;  %v1313_v42 = vadd.f32 %v1838_v35, %v1764_v21 }
 0x19b   : > { %v1739_v39 = vpop.f32.mrf.mxu0  ;;  %v1304_v43 = vpop.f32.mrf.mxu1 }
 0x19c   : > { %v1340_v18 = vadd.f32 %v1276_v28, %v474_v30  ;;  %1376 = vst [vmem:[%s2284_s30 + $0xc8] sm:$0xff] %v1344_v40  ;;  %v1349_v45 = vadd.f32 %v1313_v42, %v483_v32  ;;  %v1740_v34 = vadd.f32 %v1739_v39, %v1738_v31  ;;  %v1305_v36 = vadd.f32 %v2404_v33, %v1304_v43 }
 0x19d   : > { %v1741_v49 = vpop.f32.mrf.mxu0  ;;  %v1839_v52 = vpop.f32.mrf.mxu1 }
 0x19e   : > { %1372 = vst [vmem:[%s2284_s30 + $0xa8] sm:$0xff] %v1340_v18  ;;  %1381 = vst [vmem:[%s2284_s30 + $0xf0] sm:$0xff] %v1349_v45  ;;  %v1281_v44 = vadd.f32 %v2450_v51, %v1740_v34  ;;  %v1347_v46 = vadd.f32 %v1305_v36, %v481_v41  ;;  %v1316_v54 = vadd.f32 %v1839_v52, %v1767_v37 }
 0x19f   : > { %v1742_v55 = vpop.f32.mrf.mxu0  ;;  %v1307_v57 = vpop.f32.mrf.mxu1 }
 0x1a0   : > { %v1341_v58 = vadd.f32 %v1281_v44, %v475_v47  ;;  %1379 = vst [vmem:[%s2284_s30 + $0xe0] sm:$0xff] %v1347_v46  ;;  %v1350_v33 = vadd.f32 %v1316_v54, %v484_v50  ;;  %v1743_v48 = vadd.f32 %v1742_v55, %v1741_v49  ;;  %v1308_v60 = vadd.f32 %v2406_v38, %v1307_v57 }
 0x1a2   : > { %1373 = vst [vmem:[%s2284_s30 + $0xb0] sm:$0xff] %v1341_v58  ;;  %1382 = vst [vmem:[%s2284_s30 + $0xf8] sm:$0xff] %v1350_v33  ;;  %v1284_v62 = vadd.f32 %v2454_v53, %v1743_v48  ;;  %v1348_v63 = vadd.f32 %v1308_v60, %v482_v56 }
 0x1a4   : > { %v1342_v51 = vadd.f32 %v1284_v62, %v476_v61  ;;  %1380 = vst [vmem:[%s2284_s30 + $0xe8] sm:$0xff] %v1348_v63 }
 0x1a6   : > { %1374 = vst [vmem:[%s2284_s30 + $0xb8] sm:$0xff] %v1342_v51 }
 0x1a7 PF: > { %s13_s18 = sadd.s32 1, %s2057_s18   ;;  %s2521_s12 = smov %s2037_s13 }
 0x1a8   : > { %p10_p13 = scmp.ge.s32.totalorder %s13_s18, 8   ;;  %s2522_s13 = smov %s2130_s25 }
 0x1a9   : > { %s2523_s14 = smov %s2049_s16  ;;  %s2524_s15 = smov %s2053_s17 }
 0x1aa   : > { %s2525_s16 = smov %s2528_s19  ;;  %s2526_s17 = smov %s2532_s20 }
 0x1ab   :  { %12 = sbr.rel (!%p10_p13) target bundleno = 4 (0x4), region = 109 }

// kernel: _lambda_.19
= control target key start
LH: loop header
LB: loop body
LE: loop exit
PB: predicated region body
PF: predicated region fallthrough
CT: control target
= control target key end

     0   :  { %s1081_s12 = smov 0   ;;  %s1083_s13 = smov 0   ;;  %s1231_s0 = inlined_call_operand.vmem [shape: bf16[512,128], index: 0, kind: input, shape index: {}]   ;;  %s1232_s1 = inlined_call_operand.vmem [shape: bf16[128,128], index: 1, kind: input, shape index: {}]   ;;  %s1233_s2 = inlined_call_operand.vmem [shape: f32[1,128], index: 2, kind: input, shape index: {}]   ;;  %s1234_s3 = inlined_call_operand.vmem [shape: f32[512,128], index: 3, kind: output, shape index: {}]  }
   0x1   :  { %s1085_s14 = smov 0  }
   0x2 LB: > { %s32_s15 = sadd.s32 1, %s1055_s13  ;;  %p869_p0 = scmp.ge.s32.totalorder %s1059_s14, 1  ;;  %s1059_s14 = sphi %s1085_s14, %s13_s14   ;;  %s1055_s13 = sphi %s1083_s13, %s1236_s13   ;;  %s1051_s12 = sphi %s1081_s12, %s1235_s12  }
   0x3   : > { %p34_p1 = scmp.ge.s32.totalorder %s32_s15, 2  ;;  %p188_p2 = scmp.lt.s32.totalorder %s1059_s14, 3 }
   0x5   : > { %s1238_s15 = smov (%p34_p1, %s32_s15), 0  ;;  %p189_p3 = pnand %p869_p0, %p188_p2 }
   0x6   : > { %s870_s18 = sshll.u32 (!%p189_p3), %s1051_s12, 5 }
   0x7   : > { %192 = sbr.rel (%p189_p3) target bundleno = 271 (0x10f), region = 32  ;;  %p230_p4 = scmp.lt.s32.totalorder (!%p189_p3), %s870_s18, 63 }
   0xc   : > { %v1013_v0 = vld [vmem:[%s1232_s1 + $0x38] sm:$0xff]   ;;  %v1014_v1 = vld [vmem:[%s1232_s1 + $0x30] sm:$0xff]   ;;  %s1240_s18 = smov (!%p230_p4, %s870_s18), 63  ;;  %v1015_v2 = vld [vmem:[%s1232_s1 + $0x28] sm:$0xff]  }
   0xd   : > { %925 = vmatprep.subr.bf16.mxu0 %v1013_v0  ;;  %973 = vmatprep.subr.bf16.mxu1 %v1013_v0  ;;  %s871_s23 = sshll.u32 %s1240_s18, 2  ;;  %v1016_v3 = vld [vmem:[%s1232_s1 + $0x20] sm:$0xff]   ;;  %v1017_v6 = vld [vmem:[%s1232_s1 + $0x18] sm:$0xff]   ;;  %v1018_v7 = vld [vmem:[%s1232_s1 + $0x10] sm:$0xff]   ;;  %s873_s10 = sshll.u32 %s1240_s18, 3 }
   0xe   : > { %926 = vmatpush3.bf16.msra.mxu0 %v1013_v0  ;;  %981 = vmatpush3.bf16.msra.mxu1 %v1013_v0  ;;  %s1114_s26 = scalar_lea.vmem %s1231_s0, %s871_s23  ;;  %v1019_v8 = vld [vmem:[%s1232_s1 + $0x8] sm:$0xff]   ;;  %v1020_v9 = vld [vmem:[%s1232_s1] sm:$0xff]   ;;  %s1156_s19 = scalar_lea.vmem %s1234_s3, %s873_s10 }
   0xf   : > { %927 = vmatprep.subr.bf16.mxu0 %v1014_v1  ;;  %974 = vmatprep.subr.bf16.mxu1 %v1014_v1  ;;  %v1021_v4 = vld [vmem:[%s1114_s26] sm:$0xff]   ;;  %v1023_v10 = vld [vmem:[%s1114_s26 + $0x8] sm:$0xff]   ;;  %v1025_v12 = vld [vmem:[%s1114_s26 + $0x10] sm:$0xff]  }
  0x10   : > { %v1022_v5 = vld [vmem:[%s1114_s26 + $0x40] sm:$0xff]   ;;  %941 = vmatprep.mubr.bf16.mxu0 %v1021_v4  ;;  %v1024_v11 = vld [vmem:[%s1114_s26 + $0x48] sm:$0xff]   ;;  %v1026_v13 = vld [vmem:[%s1114_s26 + $0x50] sm:$0xff]  }
  0x11   : > { %957 = vmatprep.mubr.bf16.mxu1 %v1022_v5  ;;  %v1027_v14 = vld [vmem:[%s1114_s26 + $0x18] sm:$0xff]   ;;  %v1029_v16 = vld [vmem:[%s1114_s26 + $0x20] sm:$0xff]   ;;  %v1031_v18 = vld [vmem:[%s1114_s26 + $0x28] sm:$0xff]  }
  0x12   : > { %928 = vmatpush3.bf16.msra.mxu0 %v1014_v1  ;;  %982 = vmatpush3.bf16.msra.mxu1 %v1014_v1  ;;  %v1028_v15 = vld [vmem:[%s1114_s26 + $0x58] sm:$0xff]   ;;  %v1030_v17 = vld [vmem:[%s1114_s26 + $0x60] sm:$0xff]   ;;  %v1032_v19 = vld [vmem:[%s1114_s26 + $0x68] sm:$0xff]  }
  0x13   : > { %929 = vmatprep.subr.bf16.mxu0 %v1015_v2  ;;  %975 = vmatprep.subr.bf16.mxu1 %v1015_v2  ;;  %v1033_v20 = vld [vmem:[%s1114_s26 + $0x30] sm:$0xff]   ;;  %v1035_v22 = vld [vmem:[%s1114_s26 + $0x38] sm:$0xff]   ;;  %v1151_v24 = vld [vmem:[%s1233_s2] ss:$0 sm:$0xff] }
  0x14   : > { %v1034_v21 = vld [vmem:[%s1114_s26 + $0x70] sm:$0xff]   ;;  %v1036_v23 = vld [vmem:[%s1114_s26 + $0x78] sm:$0xff]  }
  0x16   : > { %930 = vmatpush3.bf16.msra.mxu0 %v1015_v2  ;;  %983 = vmatpush3.bf16.msra.mxu1 %v1015_v2 }
  0x17   : > { %931 = vmatprep.subr.bf16.mxu0 %v1016_v3  ;;  %976 = vmatprep.subr.bf16.mxu1 %v1016_v3 }
  0x1a   : > { %932 = vmatpush3.bf16.msra.mxu0 %v1016_v3  ;;  %984 = vmatpush3.bf16.msra.mxu1 %v1016_v3 }
  0x1b   : > { %933 = vmatprep.subr.bf16.mxu0 %v1017_v6  ;;  %977 = vmatprep.subr.bf16.mxu1 %v1017_v6 }
  0x1e   : > { %934 = vmatpush3.bf16.msra.mxu0 %v1017_v6  ;;  %985 = vmatpush3.bf16.msra.mxu1 %v1017_v6 }
  0x1f   : > { %935 = vmatprep.subr.bf16.mxu0 %v1018_v7  ;;  %978 = vmatprep.subr.bf16.mxu1 %v1018_v7 }
  0x22   : > { %936 = vmatpush3.bf16.msra.mxu0 %v1018_v7  ;;  %986 = vmatpush3.bf16.msra.mxu1 %v1018_v7 }
  0x23   : > { %937 = vmatprep.subr.bf16.mxu0 %v1019_v8  ;;  %979 = vmatprep.subr.bf16.mxu1 %v1019_v8 }
  0x26   : > { %938 = vmatpush3.bf16.msra.mxu0 %v1019_v8  ;;  %987 = vmatpush3.bf16.msra.mxu1 %v1019_v8 }
  0x27   : > { %939 = vmatprep.subr.bf16.mxu0 %v1020_v9  ;;  %980 = vmatprep.subr.bf16.mxu1 %v1020_v9 }
  0x2a   : > { %940 = vmatpush3.bf16.msra.mxu0 %v1020_v9  ;;  %988 = vmatpush3.bf16.msra.mxu1 %v1020_v9 }
  0x2d   : > { %942 = vmatmul.mubr.bf16.vlgmr.msra.gmra.mxu0 %v1023_v10  ;;  %958 = vmatmul.mubr.bf16.vlgmr.msra.gmra.mxu1 %v1024_v11 }
  0x2e   : > { %945 = vmatprep.mubr.bf16.mxu0 %v1025_v12  ;;  %961 = vmatprep.mubr.bf16.mxu1 %v1026_v13 }
  0x35   : > { %946 = vmatmul.mubr.bf16.gmra.mxu0 %v1027_v14  ;;  %962 = vmatmul.mubr.bf16.gmra.mxu1 %v1028_v15 }
  0x36   : > { %949 = vmatprep.mubr.bf16.mxu0 %v1029_v16  ;;  %965 = vmatprep.mubr.bf16.mxu1 %v1030_v17 }
  0x3d   : > { %950 = vmatmul.mubr.bf16.gmra.mxu0 %v1031_v18  ;;  %966 = vmatmul.mubr.bf16.gmra.mxu1 %v1032_v19 }
  0x3e   : > { %953 = vmatprep.mubr.bf16.mxu0 %v1033_v20  ;;  %969 = vmatprep.mubr.bf16.mxu1 %v1034_v21 }
  0x45   : > { %954 = vmatmul.mubr.bf16.gmra.mxu0 %v1035_v22  ;;  %970 = vmatmul.mubr.bf16.gmra.mxu1 %v1036_v23 }
  0xed   : > { %v943_v25 = vpop.f32.mrf.mxu0  ;;  %v959_v26 = vpop.f32.mrf.mxu1 }
  0xee   : > { %v690_v27 = vadd.f32 %v943_v25, %v1151_v24  ;;  %v706_v28 = vadd.f32 %v959_v26, %v1151_v24 }
  0xef   : > { %v561_v29 = vpop.f32.mrf.mxu0  ;;  %v625_v30 = vpop.f32.mrf.mxu1 }
  0xf0   : > { %722 = vst [vmem:[%s1156_s19 + $0x10] sm:$0xff] %v690_v27  ;;  %738 = vst [vmem:[%s1156_s19 + $0x90] sm:$0xff] %v706_v28  ;;  %v688_v31 = vadd.f32 %v1151_v24, %v561_v29  ;;  %v704_v32 = vadd.f32 %v1151_v24, %v625_v30 }
  0xf1   : > { %v944_v33 = vpop.f32.mrf.mxu0  ;;  %v960_v34 = vpop.f32.mrf.mxu1 }
  0xf2   : > { %720 = vst [vmem:[%s1156_s19] sm:$0xff] %v688_v31  ;;  %736 = vst [vmem:[%s1156_s19 + $0x80] sm:$0xff] %v704_v32  ;;  %v691_v35 = vadd.f32 %v944_v33, %v1151_v24  ;;  %v707_v36 = vadd.f32 %v960_v34, %v1151_v24 }
  0xf3   : > { %v564_v37 = vpop.f32.mrf.mxu0  ;;  %v628_v38 = vpop.f32.mrf.mxu1 }
  0xf4   : > { %723 = vst [vmem:[%s1156_s19 + $0x18] sm:$0xff] %v691_v35  ;;  %739 = vst [vmem:[%s1156_s19 + $0x98] sm:$0xff] %v707_v36  ;;  %v689_v39 = vadd.f32 %v1151_v24, %v564_v37  ;;  %v705_v40 = vadd.f32 %v1151_v24, %v628_v38 }
  0xf5   : > { %v947_v41 = vpop.f32.mrf.mxu0  ;;  %v963_v42 = vpop.f32.mrf.mxu1 }
  0xf6   : > { %721 = vst [vmem:[%s1156_s19 + $0x8] sm:$0xff] %v689_v39  ;;  %737 = vst [vmem:[%s1156_s19 + $0x88] sm:$0xff] %v705_v40  ;;  %v694_v43 = vadd.f32 %v947_v41, %v1151_v24  ;;  %v710_v44 = vadd.f32 %v963_v42, %v1151_v24 }
  0xf7   : > { %v577_v45 = vpop.f32.mrf.mxu0  ;;  %v641_v46 = vpop.f32.mrf.mxu1 }
  0xf8   : > { %726 = vst [vmem:[%s1156_s19 + $0x30] sm:$0xff] %v694_v43  ;;  %742 = vst [vmem:[%s1156_s19 + $0xb0] sm:$0xff] %v710_v44  ;;  %v692_v47 = vadd.f32 %v1151_v24, %v577_v45  ;;  %v708_v48 = vadd.f32 %v1151_v24, %v641_v46 }
  0xf9   : > { %v948_v49 = vpop.f32.mrf.mxu0  ;;  %v964_v50 = vpop.f32.mrf.mxu1 }
  0xfa   : > { %724 = vst [vmem:[%s1156_s19 + $0x20] sm:$0xff] %v692_v47  ;;  %740 = vst [vmem:[%s1156_s19 + $0xa0] sm:$0xff] %v708_v48  ;;  %v695_v51 = vadd.f32 %v948_v49, %v1151_v24  ;;  %v711_v52 = vadd.f32 %v964_v50, %v1151_v24 }
  0xfb   : > { %v580_v53 = vpop.f32.mrf.mxu0  ;;  %v644_v54 = vpop.f32.mrf.mxu1 }
  0xfc   : > { %727 = vst [vmem:[%s1156_s19 + $0x38] sm:$0xff] %v695_v51  ;;  %743 = vst [vmem:[%s1156_s19 + $0xb8] sm:$0xff] %v711_v52  ;;  %v693_v55 = vadd.f32 %v1151_v24, %v580_v53  ;;  %v709_v56 = vadd.f32 %v1151_v24, %v644_v54 }
  0xfd   : > { %v951_v57 = vpop.f32.mrf.mxu0  ;;  %v967_v58 = vpop.f32.mrf.mxu1 }
  0xfe   : > { %725 = vst [vmem:[%s1156_s19 + $0x28] sm:$0xff] %v693_v55  ;;  %741 = vst [vmem:[%s1156_s19 + $0xa8] sm:$0xff] %v709_v56  ;;  %v698_v59 = vadd.f32 %v951_v57, %v1151_v24  ;;  %v714_v60 = vadd.f32 %v967_v58, %v1151_v24 }
  0xff   : > { %v593_v61 = vpop.f32.mrf.mxu0  ;;  %v657_v62 = vpop.f32.mrf.mxu1 }
 0x100   : > { %730 = vst [vmem:[%s1156_s19 + $0x50] sm:$0xff] %v698_v59  ;;  %746 = vst [vmem:[%s1156_s19 + $0xd0] sm:$0xff] %v714_v60  ;;  %v696_v63 = vadd.f32 %v1151_v24, %v593_v61  ;;  %v712_v0 = vadd.f32 %v1151_v24, %v657_v62 }
 0x101   : > { %v952_v1 = vpop.f32.mrf.mxu0  ;;  %v968_v2 = vpop.f32.mrf.mxu1 }
 0x102   : > { %728 = vst [vmem:[%s1156_s19 + $0x40] sm:$0xff] %v696_v63  ;;  %744 = vst [vmem:[%s1156_s19 + $0xc0] sm:$0xff] %v712_v0  ;;  %v699_v3 = vadd.f32 %v952_v1, %v1151_v24  ;;  %v715_v4 = vadd.f32 %v968_v2, %v1151_v24 }
 0x103   : > { %v596_v5 = vpop.f32.mrf.mxu0  ;;  %v660_v6 = vpop.f32.mrf.mxu1 }
 0x104   : > { %731 = vst [vmem:[%s1156_s19 + $0x58] sm:$0xff] %v699_v3  ;;  %747 = vst [vmem:[%s1156_s19 + $0xd8] sm:$0xff] %v715_v4  ;;  %v697_v7 = vadd.f32 %v1151_v24, %v596_v5  ;;  %v713_v8 = vadd.f32 %v1151_v24, %v660_v6 }
 0x105   : > { %v955_v9 = vpop.f32.mrf.mxu0  ;;  %v971_v10 = vpop.f32.mrf.mxu1 }
 0x106   : > { %729 = vst [vmem:[%s1156_s19 + $0x48] sm:$0xff] %v697_v7  ;;  %745 = vst [vmem:[%s1156_s19 + $0xc8] sm:$0xff] %v713_v8  ;;  %v702_v11 = vadd.f32 %v955_v9, %v1151_v24  ;;  %v718_v12 = vadd.f32 %v971_v10, %v1151_v24 }
 0x107   : > { %v609_v13 = vpop.f32.mrf.mxu0  ;;  %v673_v14 = vpop.f32.mrf.mxu1 }
 0x108   : > { %734 = vst [vmem:[%s1156_s19 + $0x70] sm:$0xff] %v702_v11  ;;  %750 = vst [vmem:[%s1156_s19 + $0xf0] sm:$0xff] %v718_v12  ;;  %v700_v15 = vadd.f32 %v1151_v24, %v609_v13  ;;  %v716_v16 = vadd.f32 %v1151_v24, %v673_v14 }
 0x109   : > { %v956_v17 = vpop.f32.mrf.mxu0  ;;  %v972_v18 = vpop.f32.mrf.mxu1 }
 0x10a   : > { %732 = vst [vmem:[%s1156_s19 + $0x60] sm:$0xff] %v700_v15  ;;  %748 = vst [vmem:[%s1156_s19 + $0xe0] sm:$0xff] %v716_v16  ;;  %v703_v19 = vadd.f32 %v956_v17, %v1151_v24  ;;  %v719_v20 = vadd.f32 %v972_v18, %v1151_v24 }
 0x10b   : > { %v612_v21 = vpop.f32.mrf.mxu0  ;;  %v676_v22 = vpop.f32.mrf.mxu1 }
 0x10c   : > { %735 = vst [vmem:[%s1156_s19 + $0x78] sm:$0xff] %v703_v19  ;;  %751 = vst [vmem:[%s1156_s19 + $0xf8] sm:$0xff] %v719_v20  ;;  %v701_v23 = vadd.f32 %v1151_v24, %v612_v21  ;;  %v717_v25 = vadd.f32 %v1151_v24, %v676_v22 }
 0x10e   : > { %733 = vst [vmem:[%s1156_s19 + $0x68] sm:$0xff] %v701_v23  ;;  %749 = vst [vmem:[%s1156_s19 + $0xe8] sm:$0xff] %v717_v25 }
 0x10f PF: > { %s13_s14 = sadd.s32 1, %s1059_s14   ;;  %s1235_s12 = smov %s1055_s13 }
 0x110   : > { %p10_p5 = scmp.ge.s32.totalorder %s13_s14, 4   ;;  %s1236_s13 = smov %s1238_s15 }
 0x112   :  { %12 = sbr.rel (!%p10_p5) target bundleno = 2 (0x2), region = 72 }

// kernel: _lambda_.33
= control target key start
LH: loop header
LB: loop body
LE: loop exit
PB: predicated region body
PF: predicated region fallthrough
CT: control target
= control target key end

     0   :  { %v49_v0 = vmov 0.0   ;;  %s89_s1 = inlined_call_operand.vmem [shape: f32[1,128], index: 1, kind: output, shape index: {0}]   ;;  %s90_s2 = inlined_call_operand.vmem [shape: f32[1,128], index: 2, kind: output, shape index: {1}]   ;;  %s91_s0 = inlined_call_operand.vmem [shape: f32[16,128], index: 0, kind: input, shape index: {}]  }
   0x1   :  { %14 = vst [vmem:[%s89_s1] sm:$0x1] %v49_v0  ;;  %15 = vst [vmem:[%s90_s2] sm:$0x1] %v49_v0  ;;  %v16_v1 = vld [vmem:[%s91_s0] sm:$0xff]  ;;  %v17_v2 = vld [vmem:[%s91_s0 + $0x8] sm:$0xff] }
   0x2   :  { %v19_v3 = vadd.f32 %v17_v2, %v16_v1  ;;  %v29_v4 = vmul.f32 %v16_v1, %v16_v1  ;;  %v30_v5 = vmul.f32 %v17_v2, %v17_v2 }
   0x4   :  { %v20_v6 = vrot.slane %v19_v3, 4  ;;  %v31_v7 = vadd.f32 %v30_v5, %v29_v4 }
   0x6   :  { %v21_v8 = vadd.f32 %v20_v6, %v19_v3  ;;  %v32_v9 = vrot.slane %v31_v7, 4 }
   0x8   :  { %v22_v10 = vrot.slane %v21_v8, 2  ;;  %v33_v11 = vadd.f32 %v32_v9, %v31_v7  ;;  %v18_v16 = vld [vmem:[%s89_s1] sm:$0x1] }
   0x9   :  { %v28_v19 = vld [vmem:[%s90_s2] sm:$0x1] }
   0xa   :  { %v23_v12 = vadd.f32 %v22_v10, %v21_v8  ;;  %v34_v13 = vrot.slane %v33_v11, 2 }
   0xc   :  { %v24_v14 = vrot.slane %v23_v12, 1  ;;  %v35_v15 = vadd.f32 %v34_v13, %v33_v11 }
   0xe   :  { %v25_v17 = vadd.f32 %v24_v14, %v23_v12  ;;  %v36_v18 = vrot.slane %v35_v15, 1 }
  0x10   :  { %v26_v20 = vadd.f32 %v25_v17, %v18_v16  ;;  %v37_v21 = vadd.f32 %v36_v18, %v35_v15 }
  0x12   :  { %27 = vst [vmem:[%s89_s1] sm:$0x1] %v26_v20  ;;  %v38_v22 = vadd.f32 %v37_v21, %v28_v19 }
  0x14   :  { %39 = vst [vmem:[%s90_s2] sm:$0x1] %v38_v22 }

// kernel: _lambda_.32
= control target key start
LH: loop header
LB: loop body
LE: loop exit
PB: predicated region body
PF: predicated region fallthrough
CT: control target
= control target key end

     0   :  { %v201_v0 = vmov 0.0   ;;  %vm202_vm0 = vmmov 0   ;;  %s259_s1 = inlined_call_operand.vmem [shape: bf16[128,128], index: 1, kind: input, shape index: {}]   ;;  %s260_s0 = inlined_call_operand.vmem [shape: bf16[16,128], index: 0, kind: input, shape index: {}]   ;;  %s261_s2 = inlined_call_operand.vmem [shape: f32[1,128], index: 2, kind: input, shape index: {}]   ;;  %s262_s3 = inlined_call_operand.vmem [shape: f32[16,128], index: 3, kind: output, shape index: {}]  }
   0x1   :  { %170 = vmatprep.subr.bf16.mxu0 %v201_v0  ;;  %v192_v1 = vld [vmem:[%s259_s1 + $0x38] sm:$0xff]   ;;  %186 = vmatprep.mubr.msk.bf16.mxu0 %vm202_vm0, %v201_v0  ;;  %v193_v2 = vld [vmem:[%s259_s1 + $0x30] sm:$0xff]   ;;  %v194_v3 = vld [vmem:[%s259_s1 + $0x28] sm:$0xff]  }
   0x2   :  { %171 = vmatpush3.bf16.msra.mxu0 %v192_v1  ;;  %v195_v4 = vld [vmem:[%s259_s1 + $0x20] sm:$0xff]   ;;  %v196_v5 = vld [vmem:[%s259_s1 + $0x18] sm:$0xff]   ;;  %v197_v6 = vld [vmem:[%s259_s1 + $0x10] sm:$0xff]  }
   0x3   :  { %172 = vmatprep.subr.bf16.mxu0 %v201_v0  ;;  %v198_v7 = vld [vmem:[%s259_s1 + $0x8] sm:$0xff]   ;;  %v199_v8 = vld [vmem:[%s259_s1] sm:$0xff]  }
   0x4   :  { %v200_v9 = vld [vmem:[%s260_s0] sm:$0xff]  }
   0x5   :  { %v151_v10 = vld [vmem:[%s261_s2] ss:$0 sm:$0xff] }
   0x6   :  { %173 = vmatpush3.bf16.msra.mxu0 %v193_v2 }
   0x7   :  { %174 = vmatprep.subr.bf16.mxu0 %v201_v0 }
   0xa   :  { %175 = vmatpush3.bf16.msra.mxu0 %v194_v3 }
   0xb   :  { %176 = vmatprep.subr.bf16.mxu0 %v201_v0 }
   0xe   :  { %177 = vmatpush3.bf16.msra.mxu0 %v195_v4 }
   0xf   :  { %178 = vmatprep.subr.bf16.mxu0 %v201_v0 }
  0x12   :  { %179 = vmatpush3.bf16.msra.mxu0 %v196_v5 }
  0x13   :  { %180 = vmatprep.subr.bf16.mxu0 %v201_v0 }
  0x16   :  { %181 = vmatpush3.bf16.msra.mxu0 %v197_v6 }
  0x17   :  { %182 = vmatprep.subr.bf16.mxu0 %v201_v0 }
  0x1a   :  { %183 = vmatpush3.bf16.msra.mxu0 %v198_v7 }
  0x1b   :  { %184 = vmatprep.subr.bf16.mxu0 %v201_v0 }
  0x1e   :  { %185 = vmatpush3.bf16.msra.mxu0 %v199_v8 }
  0x21   :  { %187 = vmatmul.mubr.bf16.vlgmr.msra.gmra.mxu0 %v200_v9 }
  0xe1   :  { %v136_v11 = vpop.f32.mrf.mxu0 }
  0xe2   :  { %v143_v12 = vadd.f32 %v151_v10, %v136_v11 }
  0xe3   :  { %v188_v13 = vpop.f32.mrf.mxu0 }
  0xe4   :  { %145 = vst [vmem:[%s262_s3] sm:$0xff] %v143_v12 }
  0xe5   :  { %v139_v14 = vpop.f32.mrf.mxu0 }
  0xe6   :  { %v144_v15 = vadd.f32 %v151_v10, %v139_v14 }
  0xe7   :  { %v189_v16 = vpop.f32.mrf.mxu0 }
  0xe8   :  { %146 = vst [vmem:[%s262_s3 + $0x8] sm:$0xff] %v144_v15 }

// kernel: _lambda_.31
= control target key start
LH: loop header
LB: loop body
LE: loop exit
PB: predicated region body
PF: predicated region fallthrough
CT: control target
= control target key end

     0   :  { %s349_s6 = smov 0   ;;  %s351_s7 = smov 0   ;;  %s421_s0 = inlined_call_operand.vmem [shape: f32[2,256,128], index: 0, kind: input, shape index: {}]   ;;  %s422_s1 = inlined_call_operand.vmem [shape: f32[2,1,128], index: 1, kind: output, shape index: {}]  }
   0x1   :  { %s353_s8 = smov 0  }
   0x2 LB: > { %s23_s9 = sadd.s32 1, %s332_s7  ;;  %p283_p0 = scmp.ge.s32.totalorder %s336_s8, 1  ;;  %s336_s8 = sphi %s353_s8, %s11_s8   ;;  %s332_s7 = sphi %s351_s7, %s424_s7   ;;  %s328_s6 = sphi %s349_s6, %s423_s6  }
   0x3   : > { %p25_p1 = scmp.ge.s32.totalorder %s23_s9, 2  ;;  %p106_p2 = scmp.lt.s32.totalorder %s336_s8, 3 }
   0x5   : > { %s426_s9 = smov (%p25_p1, %s23_s9), 0  ;;  %p107_p3 = pnand %p283_p0, %p106_p2 }
   0x6   : > { %p129_p4 = scmp.lt.s32.totalorder (!%p107_p3), %s328_s6, 1 }
   0x7   : > { %110 = sbr.rel (%p107_p3) target bundleno = 93 (0x5d), region = 24 }
   0xc   : > { %s428_s6 = smov (!%p129_p4, %s328_s6), 1  ;;  %v338_v0 = vmov 0.0  }
   0xd   : > { %s288_s10 = sshll.u32 %s428_s6, 8  ;;  %s370_s13 = scalar_lea.vmem %s422_s1, %s428_s6 }
   0xe   : > { %s375_s16 = scalar_lea.vmem %s421_s0, %s288_s10  ;;  %145 = vst [vmem:[%s370_s13] sm:$0x1] %v338_v0 }
   0xf   : > { %v147_v1 = vld [vmem:[%s375_s16] sm:$0xff]  ;;  %v148_v2 = vld [vmem:[%s375_s16 + $0x8] sm:$0xff]  ;;  %v149_v3 = vld [vmem:[%s375_s16 + $0x10] sm:$0xff] }
  0x10   : > { %v179_v4 = vadd.f32 %v148_v2, %v147_v1  ;;  %v150_v5 = vld [vmem:[%s375_s16 + $0x18] sm:$0xff]  ;;  %v151_v7 = vld [vmem:[%s375_s16 + $0x20] sm:$0xff]  ;;  %v152_v9 = vld [vmem:[%s375_s16 + $0x28] sm:$0xff] }
  0x11   : > { %v153_v11 = vld [vmem:[%s375_s16 + $0x30] sm:$0xff]  ;;  %v154_v13 = vld [vmem:[%s375_s16 + $0x38] sm:$0xff]  ;;  %v155_v15 = vld [vmem:[%s375_s16 + $0x40] sm:$0xff] }
  0x12   : > { %v180_v6 = vadd.f32 %v179_v4, %v149_v3  ;;  %v156_v17 = vld [vmem:[%s375_s16 + $0x48] sm:$0xff]  ;;  %v157_v19 = vld [vmem:[%s375_s16 + $0x50] sm:$0xff]  ;;  %v158_v21 = vld [vmem:[%s375_s16 + $0x58] sm:$0xff] }
  0x13   : > { %v159_v23 = vld [vmem:[%s375_s16 + $0x60] sm:$0xff]  ;;  %v160_v25 = vld [vmem:[%s375_s16 + $0x68] sm:$0xff]  ;;  %v161_v27 = vld [vmem:[%s375_s16 + $0x70] sm:$0xff] }
  0x14   : > { %v181_v8 = vadd.f32 %v180_v6, %v150_v5  ;;  %v162_v29 = vld [vmem:[%s375_s16 + $0x78] sm:$0xff]  ;;  %v163_v31 = vld [vmem:[%s375_s16 + $0x80] sm:$0xff]  ;;  %v164_v33 = vld [vmem:[%s375_s16 + $0x88] sm:$0xff] }
  0x15   : > { %v165_v35 = vld [vmem:[%s375_s16 + $0x90] sm:$0xff]  ;;  %v166_v37 = vld [vmem:[%s375_s16 + $0x98] sm:$0xff]  ;;  %v167_v39 = vld [vmem:[%s375_s16 + $0xa0] sm:$0xff] }
  0x16   : > { %v182_v10 = vadd.f32 %v181_v8, %v151_v7  ;;  %v168_v41 = vld [vmem:[%s375_s16 + $0xa8] sm:$0xff]  ;;  %v169_v43 = vld [vmem:[%s375_s16 + $0xb0] sm:$0xff]  ;;  %v170_v45 = vld [vmem:[%s375_s16 + $0xb8] sm:$0xff] }
  0x17   : > { %v171_v47 = vld [vmem:[%s375_s16 + $0xc0] sm:$0xff]  ;;  %v172_v49 = vld [vmem:[%s375_s16 + $0xc8] sm:$0xff]  ;;  %v173_v51 = vld [vmem:[%s375_s16 + $0xd0] sm:$0xff] }
  0x18   : > { %v183_v12 = vadd.f32 %v182_v10, %v152_v9  ;;  %v174_v53 = vld [vmem:[%s375_s16 + $0xd8] sm:$0xff]  ;;  %v175_v55 = vld [vmem:[%s375_s16 + $0xe0] sm:$0xff]  ;;  %v176_v57 = vld [vmem:[%s375_s16 + $0xe8] sm:$0xff] }
  0x19   : > { %v177_v59 = vld [vmem:[%s375_s16 + $0xf0] sm:$0xff]  ;;  %v178_v61 = vld [vmem:[%s375_s16 + $0xf8] sm:$0xff]  ;;  %v146_v5 = vld [vmem:[%s370_s13] sm:$0x1] }
  0x1a   : > { %v184_v14 = vadd.f32 %v183_v12, %v153_v11 }
  0x1c   : > { %v185_v16 = vadd.f32 %v184_v14, %v154_v13 }
  0x1e   : > { %v186_v18 = vadd.f32 %v185_v16, %v155_v15 }
  0x20   : > { %v187_v20 = vadd.f32 %v186_v18, %v156_v17 }
  0x22   : > { %v188_v22 = vadd.f32 %v187_v20, %v157_v19 }
  0x24   : > { %v189_v24 = vadd.f32 %v188_v22, %v158_v21 }
  0x26   : > { %v190_v26 = vadd.f32 %v189_v24, %v159_v23 }
  0x28   : > { %v191_v28 = vadd.f32 %v190_v26, %v160_v25 }
  0x2a   : > { %v192_v30 = vadd.f32 %v191_v28, %v161_v27 }
  0x2c   : > { %v193_v32 = vadd.f32 %v192_v30, %v162_v29 }
  0x2e   : > { %v194_v34 = vadd.f32 %v193_v32, %v163_v31 }
  0x30   : > { %v195_v36 = vadd.f32 %v194_v34, %v164_v33 }
  0x32   : > { %v196_v38 = vadd.f32 %v195_v36, %v165_v35 }
  0x34   : > { %v197_v40 = vadd.f32 %v196_v38, %v166_v37 }
  0x36   : > { %v198_v42 = vadd.f32 %v197_v40, %v167_v39 }
  0x38   : > { %v199_v44 = vadd.f32 %v198_v42, %v168_v41 }
  0x3a   : > { %v200_v46 = vadd.f32 %v199_v44, %v169_v43 }
  0x3c   : > { %v201_v48 = vadd.f32 %v200_v46, %v170_v45 }
  0x3e   : > { %v202_v50 = vadd.f32 %v201_v48, %v171_v47 }
  0x40   : > { %v203_v52 = vadd.f32 %v202_v50, %v172_v49 }
  0x42   : > { %v204_v54 = vadd.f32 %v203_v52, %v173_v51 }
  0x44   : > { %v205_v56 = vadd.f32 %v204_v54, %v174_v53 }
  0x46   : > { %v206_v58 = vadd.f32 %v205_v56, %v175_v55 }
  0x48   : > { %v207_v60 = vadd.f32 %v206_v58, %v176_v57 }
  0x4a   : > { %v208_v62 = vadd.f32 %v207_v60, %v177_v59 }
  0x4c   : > { %v209_v63 = vadd.f32 %v208_v62, %v178_v61 }
  0x4e   : > { %v210_v0 = vrot.slane %v209_v63, 4 }
  0x50   : > { %v211_v1 = vadd.f32 %v210_v0, %v209_v63 }
  0x52   : > { %v212_v2 = vrot.slane %v211_v1, 2 }
  0x54   : > { %v213_v3 = vadd.f32 %v212_v2, %v211_v1 }
  0x56   : > { %v214_v4 = vrot.slane %v213_v3, 1 }
  0x58   : > { %v215_v6 = vadd.f32 %v214_v4, %v213_v3 }
  0x5a   : > { %v216_v7 = vadd.f32 %v215_v6, %v146_v5 }
  0x5c   : > { %217 = vst [vmem:[%s370_s13] sm:$0x1] %v216_v7 }
  0x5d PF: > { %s11_s8 = sadd.s32 1, %s336_s8   ;;  %s423_s6 = smov %s332_s7 }
  0x5e   : > { %p8_p5 = scmp.ge.s32.totalorder %s11_s8, 4   ;;  %s424_s7 = smov %s426_s9 }
  0x60   :  { %10 = sbr.rel (!%p8_p5) target bundleno = 2 (0x2), region = 58 }

// kernel: _lambda_.34
= control target key start
LH: loop header
LB: loop body
LE: loop exit
PB: predicated region body
PF: predicated region fallthrough
CT: control target
= control target key end

     0   :  { %s96_s0 = inlined_call_operand.vmem [shape: f32[16,128], index: 0, kind: input, shape index: {}]   ;;  %s97_s1 = inlined_call_operand.vmem [shape: f32[1,128], index: 1, kind: input, shape index: {}]   ;;  %s98_s2 = inlined_call_operand.vmem [shape: f32[1,128], index: 2, kind: input, shape index: {}]   ;;  %s99_s3 = inlined_call_operand.vmem [shape: bf16[16,128], index: 3, kind: output, shape index: {}]  }
   0x1   :  { %v14_v0 = vld [vmem:[%s96_s0] sm:$0xff]  ;;  %v15_v1 = vld [vmem:[%s96_s0 + $0x8] sm:$0xff] }
   0x2   :  { %v50_v2 = vld [vmem:[%s97_s1] ss:$0 sm:$0xff] }
   0x3   :  { %v23_v3 = vmul.f32 %v50_v2, %v14_v0  ;;  %v24_v4 = vmul.f32 %v50_v2, %v15_v1  ;;  %v51_v5 = vld [vmem:[%s98_s2] ss:$0 sm:$0xff] }
   0x5   :  { %v32_v6 = vadd.f32 %v51_v5, %v23_v3  ;;  %v33_v7 = vadd.f32 %v51_v5, %v24_v4 }
   0x7   :  { %v34_v8 = vmax.f32 %v32_v6, 0.0  ;;  %v35_v9 = vmax.f32 %v33_v7, 0.0 }
   0x9   :  { %v59_v10 = vpack.c.bf16 %v35_v9, %v34_v8 }
   0xb   :  { %60 = vst [vmem:[%s99_s3] sm:$0xff] %v59_v10  }

// kernel: _lambda_.37
= control target key start
LH: loop header
LB: loop body
LE: loop exit
PB: predicated region body
PF: predicated region fallthrough
CT: control target
= control target key end

     0   :  { %s748_s0 = inlined_call_operand.vmem [shape: f32[512,128], index: 0, kind: input, shape index: {}]   ;;  %s749_s1 = inlined_call_operand.vmem [shape: f32[1,128], index: 1, kind: input, shape index: {}]   ;;  %s750_s2 = inlined_call_operand.vmem [shape: f32[1,128], index: 2, kind: input, shape index: {}]   ;;  %s751_s3 = inlined_call_operand.hbm [shape: f32[512,128], index: 3, kind: output, shape index: {}]  }
   0x1   :  { %v15_v0 = vld [vmem:[%s748_s0] sm:$0xff]  ;;  %v16_v4 = vld [vmem:[%s748_s0 + $0x8] sm:$0xff]  ;;  %v17_v5 = vld [vmem:[%s748_s0 + $0x10] sm:$0xff] }
   0x2   :  { %v421_v1 = vld [vmem:[%s749_s1] ss:$0 sm:$0xff]  ;;  %v18_v6 = vld [vmem:[%s748_s0 + $0x18] sm:$0xff]  ;;  %v20_v11 = vld [vmem:[%s748_s0 + $0x28] sm:$0xff] }
   0x3   :  { %v426_v2 = vld [vmem:[%s750_s2] ss:$0 sm:$0xff]  ;;  %v86_v3 = vmul.f32 %v421_v1, %v15_v0  ;;  %v87_v7 = vmul.f32 %v421_v1, %v16_v4  ;;  %v88_v8 = vmul.f32 %v421_v1, %v17_v5  ;;  %v89_v9 = vmul.f32 %v421_v1, %v18_v6  ;;  %v21_v12 = vld [vmem:[%s748_s0 + $0x30] sm:$0xff]  ;;  %v22_v17 = vld [vmem:[%s748_s0 + $0x38] sm:$0xff] }
   0x4   :  { %v19_v10 = vld [vmem:[%s748_s0 + $0x20] sm:$0xff]  ;;  %v91_v15 = vmul.f32 %v421_v1, %v20_v11  ;;  %v92_v16 = vmul.f32 %v421_v1, %v21_v12  ;;  %v93_v21 = vmul.f32 %v421_v1, %v22_v17  ;;  %v24_v27 = vld [vmem:[%s748_s0 + $0x48] sm:$0xff]  ;;  %v25_v28 = vld [vmem:[%s748_s0 + $0x50] sm:$0xff] }
   0x5   :  { %v157_v13 = vadd.f32 %v426_v2, %v86_v3  ;;  %v90_v14 = vmul.f32 %v421_v1, %v19_v10  ;;  %v158_v18 = vadd.f32 %v426_v2, %v87_v7  ;;  %v159_v19 = vadd.f32 %v426_v2, %v88_v8  ;;  %v23_v22 = vld [vmem:[%s748_s0 + $0x40] sm:$0xff]  ;;  %v26_v29 = vld [vmem:[%s748_s0 + $0x58] sm:$0xff]  ;;  %v28_v35 = vld [vmem:[%s748_s0 + $0x68] sm:$0xff] }
   0x6   :  { %v160_v20 = vadd.f32 %v426_v2, %v89_v9  ;;  %v162_v25 = vadd.f32 %v426_v2, %v91_v15  ;;  %v163_v26 = vadd.f32 %v426_v2, %v92_v16  ;;  %v164_v33 = vadd.f32 %v426_v2, %v93_v21  ;;  %v27_v34 = vld [vmem:[%s748_s0 + $0x60] sm:$0xff]  ;;  %v29_v36 = vld [vmem:[%s748_s0 + $0x70] sm:$0xff]  ;;  %v30_v41 = vld [vmem:[%s748_s0 + $0x78] sm:$0xff] }
   0x7   :  { %v221_v23 = vmax.f32 %v157_v13, 0.0  ;;  %v161_v24 = vadd.f32 %v426_v2, %v90_v14  ;;  %v222_v30 = vmax.f32 %v158_v18, 0.0  ;;  %v223_v31 = vmax.f32 %v159_v19, 0.0  ;;  %v31_v54 = vld [vmem:[%s748_s0 + $0x80] sm:$0xff]  ;;  %v32_v59 = vld [vmem:[%s748_s0 + $0x88] sm:$0xff]  ;;  %v33_v60 = vld [vmem:[%s748_s0 + $0x90] sm:$0xff] }
   0x8   :  { %v224_v32 = vmax.f32 %v160_v20, 0.0  ;;  %v226_v38 = vmax.f32 %v162_v25, 0.0  ;;  %v227_v39 = vmax.f32 %v163_v26, 0.0  ;;  %v94_v40 = vmul.f32 %v421_v1, %v23_v22  ;;  %v34_v61 = vld [vmem:[%s748_s0 + $0x98] sm:$0xff]  ;;  %v35_v4 = vld [vmem:[%s748_s0 + $0xa0] sm:$0xff]  ;;  %v36_v5 = vld [vmem:[%s748_s0 + $0xa8] sm:$0xff] }
   0x9   :  { %285 = vst [vmem:[#allocation2] sm:$0xff] %v221_v23  ;;  %v225_v37 = vmax.f32 %v161_v24, 0.0  ;;  %286 = vst [vmem:[#allocation2 + $0x8] sm:$0xff] %v222_v30  ;;  %v228_v42 = vmax.f32 %v164_v33, 0.0  ;;  %v95_v43 = vmul.f32 %v421_v1, %v24_v27  ;;  %v96_v44 = vmul.f32 %v421_v1, %v25_v28  ;;  %v37_v6 = vld [vmem:[%s748_s0 + $0xb0] sm:$0xff]  ;;  %v38_v11 = vld [vmem:[%s748_s0 + $0xb8] sm:$0xff] }
   0xa   :  { %287 = vst [vmem:[#allocation2 + $0x10] sm:$0xff] %v223_v31  ;;  %288 = vst [vmem:[#allocation2 + $0x18] sm:$0xff] %v224_v32  ;;  %v97_v45 = vmul.f32 %v421_v1, %v26_v29  ;;  %v165_v46 = vadd.f32 %v426_v2, %v94_v40  ;;  %v98_v47 = vmul.f32 %v421_v1, %v27_v34  ;;  %v39_v24 = vld [vmem:[%s748_s0 + $0xc0] sm:$0xff]  ;;  %v40_v29 = vld [vmem:[%s748_s0 + $0xc8] sm:$0xff] }
   0xb   :  { %289 = vst [vmem:[#allocation2 + $0x20] sm:$0xff] %v225_v37  ;;  %290 = vst [vmem:[#allocation2 + $0x28] sm:$0xff] %v226_v38  ;;  %v99_v48 = vmul.f32 %v421_v1, %v28_v35  ;;  %v100_v49 = vmul.f32 %v421_v1, %v29_v36  ;;  %v166_v50 = vadd.f32 %v426_v2, %v95_v43  ;;  %v41_v30 = vld [vmem:[%s748_s0 + $0xd0] sm:$0xff]  ;;  %v42_v31 = vld [vmem:[%s748_s0 + $0xd8] sm:$0xff] }
   0xc   :  { %291 = vst [vmem:[#allocation2 + $0x30] sm:$0xff] %v227_v39  ;;  %292 = vst [vmem:[#allocation2 + $0x38] sm:$0xff] %v228_v42  ;;  %v167_v51 = vadd.f32 %v426_v2, %v96_v44  ;;  %v168_v52 = vadd.f32 %v426_v2, %v97_v45  ;;  %v101_v53 = vmul.f32 %v421_v1, %v30_v41  ;;  %v229_v55 = vmax.f32 %v165_v46, 0.0  ;;  %v43_v36 = vld [vmem:[%s748_s0 + $0xe0] sm:$0xff]  ;;  %v44_v37 = vld [vmem:[%s748_s0 + $0xe8] sm:$0xff] }
   0xd   :  { %v169_v56 = vadd.f32 %v426_v2, %v98_v47  ;;  %v170_v57 = vadd.f32 %v426_v2, %v99_v48  ;;  %v171_v58 = vadd.f32 %v426_v2, %v100_v49  ;;  %v230_v62 = vmax.f32 %v166_v50, 0.0  ;;  %v45_v38 = vld [vmem:[%s748_s0 + $0xf0] sm:$0xff]  ;;  %v46_v43 = vld [vmem:[%s748_s0 + $0xf8] sm:$0xff] }
   0xe   :  { %v231_v63 = vmax.f32 %v167_v51, 0.0  ;;  %v232_v0 = vmax.f32 %v168_v52, 0.0  ;;  %v172_v3 = vadd.f32 %v426_v2, %v101_v53  ;;  %293 = vst [vmem:[#allocation2 + $0x40] sm:$0xff] %v229_v55  ;;  %v102_v10 = vmul.f32 %v421_v1, %v31_v54 }
   0xf   :  { %v233_v7 = vmax.f32 %v169_v56, 0.0  ;;  %v234_v8 = vmax.f32 %v170_v57, 0.0  ;;  %v235_v9 = vmax.f32 %v171_v58, 0.0  ;;  %294 = vst [vmem:[#allocation2 + $0x48] sm:$0xff] %v230_v62  ;;  %v103_v13 = vmul.f32 %v421_v1, %v32_v59  ;;  %v47_v56 = vld [vmem:[%s748_s0 + $0x100] sm:$0xff] }
  0x10   :  { %295 = vst [vmem:[#allocation2 + $0x50] sm:$0xff] %v231_v63  ;;  %296 = vst [vmem:[#allocation2 + $0x58] sm:$0xff] %v232_v0  ;;  %v236_v12 = vmax.f32 %v172_v3, 0.0  ;;  %v104_v14 = vmul.f32 %v421_v1, %v33_v60  ;;  %v105_v15 = vmul.f32 %v421_v1, %v34_v61  ;;  %v173_v16 = vadd.f32 %v426_v2, %v102_v10 }
  0x11   :  { %297 = vst [vmem:[#allocation2 + $0x60] sm:$0xff] %v233_v7  ;;  %298 = vst [vmem:[#allocation2 + $0x68] sm:$0xff] %v234_v8  ;;  %v106_v17 = vmul.f32 %v421_v1, %v35_v4  ;;  %v107_v18 = vmul.f32 %v421_v1, %v36_v5  ;;  %v108_v19 = vmul.f32 %v421_v1, %v37_v6 }
  0x12   :  { %299 = vst [vmem:[#allocation2 + $0x70] sm:$0xff] %v235_v9  ;;  %300 = vst [vmem:[#allocation2 + $0x78] sm:$0xff] %v236_v12  ;;  %v174_v20 = vadd.f32 %v426_v2, %v103_v13  ;;  %v175_v21 = vadd.f32 %v426_v2, %v104_v14  ;;  %v176_v22 = vadd.f32 %v426_v2, %v105_v15  ;;  %v237_v25 = vmax.f32 %v173_v16, 0.0 }
  0x13   :  { %v109_v23 = vmul.f32 %v421_v1, %v38_v11  ;;  %v177_v26 = vadd.f32 %v426_v2, %v106_v17  ;;  %v178_v27 = vadd.f32 %v426_v2, %v107_v18  ;;  %v179_v28 = vadd.f32 %v426_v2, %v108_v19 }
  0x14   :  { %v238_v32 = vmax.f32 %v174_v20, 0.0  ;;  %v239_v33 = vmax.f32 %v175_v21, 0.0  ;;  %v240_v34 = vmax.f32 %v176_v22, 0.0  ;;  %301 = vst [vmem:[#allocation2 + $0x80] sm:$0xff] %v237_v25  ;;  %v110_v42 = vmul.f32 %v421_v1, %v39_v24 }
  0x15   :  { %v180_v35 = vadd.f32 %v426_v2, %v109_v23  ;;  %v241_v39 = vmax.f32 %v177_v26, 0.0  ;;  %v242_v40 = vmax.f32 %v178_v27, 0.0  ;;  %v243_v41 = vmax.f32 %v179_v28, 0.0 }
  0x16   :  { %302 = vst [vmem:[#allocation2 + $0x88] sm:$0xff] %v238_v32  ;;  %303 = vst [vmem:[#allocation2 + $0x90] sm:$0xff] %v239_v33  ;;  %v111_v45 = vmul.f32 %v421_v1, %v40_v29  ;;  %v112_v46 = vmul.f32 %v421_v1, %v41_v30  ;;  %v113_v47 = vmul.f32 %v421_v1, %v42_v31 }
  0x17   :  { %304 = vst [vmem:[#allocation2 + $0x98] sm:$0xff] %v240_v34  ;;  %v244_v44 = vmax.f32 %v180_v35, 0.0  ;;  %305 = vst [vmem:[#allocation2 + $0xa0] sm:$0xff] %v241_v39  ;;  %v181_v48 = vadd.f32 %v426_v2, %v110_v42  ;;  %v114_v49 = vmul.f32 %v421_v1, %v43_v36  ;;  %v115_v50 = vmul.f32 %v421_v1, %v44_v37 }
  0x18   :  { %306 = vst [vmem:[#allocation2 + $0xa8] sm:$0xff] %v242_v40  ;;  %307 = vst [vmem:[#allocation2 + $0xb0] sm:$0xff] %v243_v41  ;;  %v116_v51 = vmul.f32 %v421_v1, %v45_v38  ;;  %v182_v52 = vadd.f32 %v426_v2, %v111_v45  ;;  %v183_v53 = vadd.f32 %v426_v2, %v112_v46 }
  0x19   :  { %308 = vst [vmem:[#allocation2 + $0xb8] sm:$0xff] %v244_v44  ;;  %v184_v54 = vadd.f32 %v426_v2, %v113_v47  ;;  %v117_v55 = vmul.f32 %v421_v1, %v46_v43 }
  0x1a   :  { %8 = vsyncpa [#allocation3], 0  ;;  %v245_v57 = vmax.f32 %v181_v48, 0.0  ;;  %v185_v58 = vadd.f32 %v426_v2, %v114_v49  ;;  %v186_v59 = vadd.f32 %v426_v2, %v115_v50  ;;  %v187_v60 = vadd.f32 %v426_v2, %v116_v51  ;;  %v48_v61 = vld [vmem:[%s748_s0 + $0x108] sm:$0xff]  ;;  %v49_v62 = vld [vmem:[%s748_s0 + $0x110] sm:$0xff] }
  0x1b   :  { %v50_v63 = vld [vmem:[%s748_s0 + $0x118] sm:$0xff]  ;;  %v246_v0 = vmax.f32 %v182_v52, 0.0  ;;  %v247_v3 = vmax.f32 %v183_v53, 0.0  ;;  %v248_v4 = vmax.f32 %v184_v54, 0.0  ;;  %v188_v5 = vadd.f32 %v426_v2, %v117_v55  ;;  %v51_v6 = vld [vmem:[%s748_s0 + $0x120] sm:$0xff]  ;;  %v52_v7 = vld [vmem:[%s748_s0 + $0x128] sm:$0xff] }
  0x1c   :  { %v53_v8 = vld [vmem:[%s748_s0 + $0x130] sm:$0xff]  ;;  %309 = vst [vmem:[#allocation2 + $0xc0] sm:$0xff] %v245_v57  ;;  %v249_v9 = vmax.f32 %v185_v58, 0.0  ;;  %v250_v10 = vmax.f32 %v186_v59, 0.0  ;;  %v251_v11 = vmax.f32 %v187_v60, 0.0  ;;  %v118_v12 = vmul.f32 %v421_v1, %v47_v56  ;;  %v54_v13 = vld [vmem:[%s748_s0 + $0x138] sm:$0xff] }
  0x1d   :  { %310 = vst [vmem:[#allocation2 + $0xc8] sm:$0xff] %v246_v0  ;;  %311 = vst [vmem:[#allocation2 + $0xd0] sm:$0xff] %v247_v3  ;;  %v252_v14 = vmax.f32 %v188_v5, 0.0  ;;  %v119_v15 = vmul.f32 %v421_v1, %v48_v61  ;;  %v120_v16 = vmul.f32 %v421_v1, %v49_v62  ;;  %v121_v17 = vmul.f32 %v421_v1, %v50_v63  ;;  %v55_v26 = vld [vmem:[%s748_s0 + $0x140] sm:$0xff]  ;;  %v56_v31 = vld [vmem:[%s748_s0 + $0x148] sm:$0xff] }
  0x1e   :  { %312 = vst [vmem:[#allocation2 + $0xd8] sm:$0xff] %v248_v4  ;;  %313 = vst [vmem:[#allocation2 + $0xe0] sm:$0xff] %v249_v9  ;;  %v189_v18 = vadd.f32 %v426_v2, %v118_v12  ;;  %v122_v19 = vmul.f32 %v421_v1, %v51_v6  ;;  %v123_v20 = vmul.f32 %v421_v1, %v52_v7  ;;  %v57_v32 = vld [vmem:[%s748_s0 + $0x150] sm:$0xff]  ;;  %v58_v33 = vld [vmem:[%s748_s0 + $0x158] sm:$0xff] }
  0x1f   :  { %314 = vst [vmem:[#allocation2 + $0xe8] sm:$0xff] %v250_v10  ;;  %315 = vst [vmem:[#allocation2 + $0xf0] sm:$0xff] %v251_v11  ;;  %v124_v21 = vmul.f32 %v421_v1, %v53_v8  ;;  %v190_v22 = vadd.f32 %v426_v2, %v119_v15  ;;  %v191_v23 = vadd.f32 %v426_v2, %v120_v16  ;;  %v59_v38 = vld [vmem:[%s748_s0 + $0x160] sm:$0xff]  ;;  %v60_v39 = vld [vmem:[%s748_s0 + $0x168] sm:$0xff] }
  0x20   :  { %316 = vst [vmem:[#allocation2 + $0xf8] sm:$0xff] %v252_v14  ;;  %v192_v24 = vadd.f32 %v426_v2, %v121_v17  ;;  %v125_v25 = vmul.f32 %v421_v1, %v54_v13  ;;  %v253_v27 = vmax.f32 %v189_v18, 0.0  ;;  %v193_v28 = vadd.f32 %v426_v2, %v122_v19  ;;  %v61_v40 = vld [vmem:[%s748_s0 + $0x170] sm:$0xff]  ;;  %v62_v45 = vld [vmem:[%s748_s0 + $0x178] sm:$0xff]  ;;  %v63_v58 = vld [vmem:[%s748_s0 + $0x180] sm:$0xff] }
  0x21   :  { %v194_v29 = vadd.f32 %v426_v2, %v123_v20  ;;  %v195_v30 = vadd.f32 %v426_v2, %v124_v21  ;;  %v254_v34 = vmax.f32 %v190_v22, 0.0  ;;  %v255_v35 = vmax.f32 %v191_v23, 0.0  ;;  %v64_v63 = vld [vmem:[%s748_s0 + $0x188] sm:$0xff]  ;;  %v65_v0 = vld [vmem:[%s748_s0 + $0x190] sm:$0xff]  ;;  %v66_v3 = vld [vmem:[%s748_s0 + $0x198] sm:$0xff] }
  0x22   :  { %v256_v36 = vmax.f32 %v192_v24, 0.0  ;;  %v196_v37 = vadd.f32 %v426_v2, %v125_v25  ;;  %317 = vst [vmem:[#allocation2 + $0x100] sm:$0xff] %v253_v27  ;;  %v257_v41 = vmax.f32 %v193_v28, 0.0  ;;  %v126_v44 = vmul.f32 %v421_v1, %v55_v26  ;;  %v67_v8 = vld [vmem:[%s748_s0 + $0x1a0] sm:$0xff]  ;;  %v68_v9 = vld [vmem:[%s748_s0 + $0x1a8] sm:$0xff]  ;;  %v69_v10 = vld [vmem:[%s748_s0 + $0x1b0] sm:$0xff] }
  0x23   :  { %v258_v42 = vmax.f32 %v194_v29, 0.0  ;;  %v259_v43 = vmax.f32 %v195_v30, 0.0  ;;  %318 = vst [vmem:[#allocation2 + $0x108] sm:$0xff] %v254_v34  ;;  %319 = vst [vmem:[#allocation2 + $0x110] sm:$0xff] %v255_v35  ;;  %v127_v47 = vmul.f32 %v421_v1, %v56_v31  ;;  %v128_v48 = vmul.f32 %v421_v1, %v57_v32  ;;  %v70_v15 = vld [vmem:[%s748_s0 + $0x1b8] sm:$0xff]  ;;  %v71_v28 = vld [vmem:[%s748_s0 + $0x1c0] sm:$0xff] }
  0x24   :  { %320 = vst [vmem:[#allocation2 + $0x118] sm:$0xff] %v256_v36  ;;  %v260_v46 = vmax.f32 %v196_v37, 0.0  ;;  %v129_v49 = vmul.f32 %v421_v1, %v58_v33  ;;  %321 = vst [vmem:[#allocation2 + $0x120] sm:$0xff] %v257_v41  ;;  %v197_v50 = vadd.f32 %v426_v2, %v126_v44  ;;  %v130_v51 = vmul.f32 %v421_v1, %v59_v38  ;;  %v72_v33 = vld [vmem:[%s748_s0 + $0x1c8] sm:$0xff]  ;;  %v73_v34 = vld [vmem:[%s748_s0 + $0x1d0] sm:$0xff] }
  0x25   :  { %322 = vst [vmem:[#allocation2 + $0x128] sm:$0xff] %v258_v42  ;;  %323 = vst [vmem:[#allocation2 + $0x130] sm:$0xff] %v259_v43  ;;  %v131_v52 = vmul.f32 %v421_v1, %v60_v39  ;;  %v132_v53 = vmul.f32 %v421_v1, %v61_v40  ;;  %v198_v54 = vadd.f32 %v426_v2, %v127_v47  ;;  %v74_v35 = vld [vmem:[%s748_s0 + $0x1d8] sm:$0xff]  ;;  %v75_v40 = vld [vmem:[%s748_s0 + $0x1e0] sm:$0xff] }
  0x26   :  { %324 = vst [vmem:[#allocation2 + $0x138] sm:$0xff] %v260_v46  ;;  %v199_v55 = vadd.f32 %v426_v2, %v128_v48  ;;  %v200_v56 = vadd.f32 %v426_v2, %v129_v49  ;;  %v133_v57 = vmul.f32 %v421_v1, %v62_v45  ;;  %v261_v59 = vmax.f32 %v197_v50, 0.0  ;;  %v76_v41 = vld [vmem:[%s748_s0 + $0x1e8] sm:$0xff]  ;;  %v77_v42 = vld [vmem:[%s748_s0 + $0x1f0] sm:$0xff]  ;;  %v78_v47 = vld [vmem:[%s748_s0 + $0x1f8] sm:$0xff]  ;;  %s392_s0 = smov [#allocation2]  }
  0x27   :  { %v201_v60 = vadd.f32 %v426_v2, %v130_v51  ;;  %v202_v61 = vadd.f32 %v426_v2, %v131_v52  ;;  %v203_v62 = vadd.f32 %v426_v2, %v132_v53  ;;  %v262_v4 = vmax.f32 %v198_v54, 0.0  ;;  %s354_s26 = sshll.u32 %s392_s0, 4  ;;  %s355_s26 = int_to_ptr.vmem [resolvable:$true] %s354_s26 }
  0x28   :  { %v263_v5 = vmax.f32 %v199_v55, 0.0  ;;  %v264_v6 = vmax.f32 %v200_v56, 0.0  ;;  %v204_v7 = vadd.f32 %v426_v2, %v133_v57  ;;  %325 = vst [vmem:[#allocation2 + $0x140] sm:$0xff] %v261_v59  ;;  %v134_v14 = vmul.f32 %v421_v1, %v63_v58  ;;  %s370_s27 = scalar_lea.vmem %s355_s26, 8192  ;;  %p375_p1 = scmp.lt.s32.totalorder %s355_s26, %s355_s26 }
  0x29   :  { %v265_v11 = vmax.f32 %v201_v60, 0.0  ;;  %v266_v12 = vmax.f32 %v202_v61, 0.0  ;;  %v267_v13 = vmax.f32 %v203_v62, 0.0  ;;  %326 = vst [vmem:[#allocation2 + $0x148] sm:$0xff] %v262_v4  ;;  %v135_v17 = vmul.f32 %v421_v1, %v64_v63  ;;  %p371_p0 = scmp.ne.s32.totalorder %s355_s26, %s370_s27  ;;  %p376_p2 = scmp.lt.s32.totalorder %s370_s27, %s370_s27 }
  0x2a   :  { %327 = vst [vmem:[#allocation2 + $0x150] sm:$0xff] %v263_v5  ;;  %328 = vst [vmem:[#allocation2 + $0x158] sm:$0xff] %v264_v6  ;;  %v268_v16 = vmax.f32 %v204_v7, 0.0  ;;  %v136_v18 = vmul.f32 %v421_v1, %v65_v0  ;;  %v137_v19 = vmul.f32 %v421_v1, %v66_v3  ;;  %v205_v20 = vadd.f32 %v426_v2, %v134_v14 }
  0x2b   :  { %329 = vst [vmem:[#allocation2 + $0x160] sm:$0xff] %v265_v11  ;;  %330 = vst [vmem:[#allocation2 + $0x168] sm:$0xff] %v266_v12  ;;  %v138_v21 = vmul.f32 %v421_v1, %v67_v8  ;;  %v139_v22 = vmul.f32 %v421_v1, %v68_v9  ;;  %v140_v23 = vmul.f32 %v421_v1, %v69_v10  ;;  %p377_p3 = por %p376_p2, %p375_p1 }
  0x2c   :  { %331 = vst [vmem:[#allocation2 + $0x170] sm:$0xff] %v267_v13  ;;  %332 = vst [vmem:[#allocation2 + $0x178] sm:$0xff] %v268_v16  ;;  %v206_v24 = vadd.f32 %v426_v2, %v135_v17  ;;  %v207_v25 = vadd.f32 %v426_v2, %v136_v18  ;;  %v208_v26 = vadd.f32 %v426_v2, %v137_v19  ;;  %v269_v29 = vmax.f32 %v205_v20, 0.0 }
  0x2d   :  { %v141_v27 = vmul.f32 %v421_v1, %v70_v15  ;;  %v209_v30 = vadd.f32 %v426_v2, %v138_v21  ;;  %v210_v31 = vadd.f32 %v426_v2, %v139_v22  ;;  %v211_v32 = vadd.f32 %v426_v2, %v140_v23  ;;  %p378_p4 = pnand %p377_p3, %p371_p0 }
  0x2e   :  { %v270_v36 = vmax.f32 %v206_v24, 0.0  ;;  %v271_v37 = vmax.f32 %v207_v25, 0.0  ;;  %v272_v38 = vmax.f32 %v208_v26, 0.0  ;;  %333 = vst [vmem:[#allocation2 + $0x180] sm:$0xff] %v269_v29  ;;  %v142_v46 = vmul.f32 %v421_v1, %v71_v28 }
  0x2f   :  { %v212_v39 = vadd.f32 %v426_v2, %v141_v27  ;;  %v273_v43 = vmax.f32 %v209_v30, 0.0  ;;  %v274_v44 = vmax.f32 %v210_v31, 0.0  ;;  %v275_v45 = vmax.f32 %v211_v32, 0.0 }
  0x30   :  { %334 = vst [vmem:[#allocation2 + $0x188] sm:$0xff] %v270_v36  ;;  %335 = vst [vmem:[#allocation2 + $0x190] sm:$0xff] %v271_v37  ;;  %v143_v49 = vmul.f32 %v421_v1, %v72_v33  ;;  %v144_v50 = vmul.f32 %v421_v1, %v73_v34  ;;  %v145_v51 = vmul.f32 %v421_v1, %v74_v35 }
  0x31   :  { %336 = vst [vmem:[#allocation2 + $0x198] sm:$0xff] %v272_v38  ;;  %v276_v48 = vmax.f32 %v212_v39, 0.0  ;;  %337 = vst [vmem:[#allocation2 + $0x1a0] sm:$0xff] %v273_v43  ;;  %v213_v52 = vadd.f32 %v426_v2, %v142_v46  ;;  %v146_v53 = vmul.f32 %v421_v1, %v75_v40  ;;  %v147_v54 = vmul.f32 %v421_v1, %v76_v41 }
  0x32   :  { %338 = vst [vmem:[#allocation2 + $0x1a8] sm:$0xff] %v274_v44  ;;  %339 = vst [vmem:[#allocation2 + $0x1b0] sm:$0xff] %v275_v45  ;;  %v148_v55 = vmul.f32 %v421_v1, %v77_v42  ;;  %v214_v56 = vadd.f32 %v426_v2, %v143_v49  ;;  %v215_v57 = vadd.f32 %v426_v2, %v144_v50 }
  0x33   :  { %340 = vst [vmem:[#allocation2 + $0x1b8] sm:$0xff] %v276_v48  ;;  %v216_v58 = vadd.f32 %v426_v2, %v145_v51  ;;  %v149_v59 = vmul.f32 %v421_v1, %v78_v47  ;;  %v277_v60 = vmax.f32 %v213_v52, 0.0  ;;  %v217_v61 = vadd.f32 %v426_v2, %v146_v53 }
  0x34   :  { %v218_v62 = vadd.f32 %v426_v2, %v147_v54  ;;  %v219_v63 = vadd.f32 %v426_v2, %v148_v55  ;;  %v278_v0 = vmax.f32 %v214_v56, 0.0  ;;  %v279_v3 = vmax.f32 %v215_v57, 0.0 }
  0x35   :  { %v280_v4 = vmax.f32 %v216_v58, 0.0  ;;  %v220_v5 = vadd.f32 %v426_v2, %v149_v59  ;;  %341 = vst [vmem:[#allocation2 + $0x1c0] sm:$0xff] %v277_v60  ;;  %v281_v6 = vmax.f32 %v217_v61, 0.0 }
  0x36   :  { %v282_v7 = vmax.f32 %v218_v62, 0.0  ;;  %v283_v8 = vmax.f32 %v219_v63, 0.0  ;;  %342 = vst [vmem:[#allocation2 + $0x1c8] sm:$0xff] %v278_v0  ;;  %343 = vst [vmem:[#allocation2 + $0x1d0] sm:$0xff] %v279_v3 }
  0x37   :  { %344 = vst [vmem:[#allocation2 + $0x1d8] sm:$0xff] %v280_v4  ;;  %v284_v1 = vmax.f32 %v220_v5, 0.0  ;;  %345 = vst [vmem:[#allocation2 + $0x1e0] sm:$0xff] %v281_v6 }
  0x38   :  { %346 = vst [vmem:[#allocation2 + $0x1e8] sm:$0xff] %v282_v7  ;;  %347 = vst [vmem:[#allocation2 + $0x1f0] sm:$0xff] %v283_v8 }
  0x39   :  { %348 = vst [vmem:[#allocation2 + $0x1f8] sm:$0xff] %v284_v1 }
  0x3a   :  { %381 = shalt.err (!%p378_p4)
}
  0x3b   :  { %s393_s28 = smov 128   ;;  %s394_s29 = smov 8  }
  0x3c   :  { %360 = dma.vmem_to_hbm [thread:$0]  %s355_s26, 8192, %s751_s3, [#allocation3], %s393_s28, %s393_s28, %s394_s29  }
  0x3d   :  { %390 = dma.done.wait [#allocation3], 8192  }
  0x3e   :  { %391 = vsyncadd [#allocation3], 4294959104 }
  0x3f   :  { %364 = vsyncpa [#allocation3], 1 }

// kernel: _lambda_.35
= control target key start
LH: loop header
LB: loop body
LE: loop exit
PB: predicated region body
PF: predicated region fallthrough
CT: control target
= control target key end

     0   :  { %s1316_s12 = smov 0   ;;  %s1318_s13 = smov 0   ;;  %s1606_s0 = inlined_call_operand.vmem [shape: bf16[512,640], index: 0, kind: input, shape index: {}]   ;;  %s1607_s1 = inlined_call_operand.vmem [shape: bf16[640,128], index: 1, kind: input, shape index: {}]   ;;  %s1608_s2 = inlined_call_operand.vmem [shape: f32[1,128], index: 2, kind: input, shape index: {}]   ;;  %s1609_s3 = inlined_call_operand.vmem [shape: f32[512,128], index: 3, kind: output, shape index: {}]  }
   0x1   :  { %s1320_s14 = smov 0   ;;  %s1322_s15 = smov 0  }
   0x2   :  { %s1324_s16 = smov 0   ;;  %s1326_s17 = smov 0  }
   0x3   :  { %s1328_s18 = smov 0  }
   0x4 LB: > { %s25_s19 = sadd.s32 1, %s1286_s16  ;;  %s32_s20 = sadd.s32 1, %s1290_s17  ;;  %s1294_s18 = sphi %s1328_s18, %s13_s18   ;;  %s1290_s17 = sphi %s1326_s17, %s1615_s17   ;;  %s1286_s16 = sphi %s1324_s16, %s1614_s16   ;;  %s1282_s15 = sphi %s1322_s15, %s1613_s15   ;;  %s1278_s14 = sphi %s1320_s14, %s1612_s14   ;;  %s1274_s13 = sphi %s1318_s13, %s1611_s13   ;;  %s1270_s12 = sphi %s1316_s12, %s1610_s12  }
   0x5   : > { %p26_p0 = scmp.ge.s32.totalorder %s25_s19, 5  ;;  %p48_p1 = scmp.ne.s32.totalorder %s1274_s13, %s1270_s12 }
   0x6   : > { %p49_p2 = scmp.eq.s32.totalorder %s1294_s18, 0  ;;  %s41_s24 = sadd.s32 1, %s1274_s13 }
   0x7   : > { %s1617_s19 = smov (%p26_p0, %s25_s19), 0  ;;  %s1619_s20 = smov (!%p26_p0, %s32_s20), %s1290_s17 }
   0x8   : > { %p50_p3 = por %p49_p2, %p48_p1  ;;  %p34_p4 = scmp.ge.s32.totalorder %s1619_s20, 2 }
   0x9   : > { %s37_s21 = ssub.s32 %s1286_s16, %s1617_s19  ;;  %p1032_p6 = scmp.ge.s32.totalorder %s1294_s18, 10 }
   0xa   : > { %s1621_s20 = smov (%p34_p4, %s1619_s20), 0 }
   0xb   : > { %s36_s22 = ssub.s32 %s1290_s17, %s1621_s20  ;;  %162 = sbr.rel (%p1032_p6) target bundleno = 44 (0x2c), region = 20 }
   0xc   : > { %s38_s23 = sor.u32 %s37_s21, %s36_s22 }
   0xd   : > { %p39_p5 = scmp.eq.s32.totalorder %s38_s23, 0 }
   0xf   : > { %s1367_s25 = scalar_select %p39_p5, %s1274_s13, %s41_s24  }
  0x10   : > { %165 = sbr.rel (!%p50_p3) target bundleno = 44 (0x2c), region = 24  ;;  %s167_s26 = sand.u32 (%p50_p3), 1, %s1274_s13  }
  0x11   : > { %s1159_s27 = smul.u32 (%p50_p3), 160, %s1290_s17  ;;  %s1033_s28 = sshll.u32 (%p50_p3), %s167_s26, 7 }
  0x12   : > { %s1381_s7 = scalar_lea.vmem (%p50_p3), [#allocation2], %s1033_s28 }
  0x13   : > { %s172_s29 = sadd.s32 (%p50_p3), %s1286_s16, %s1159_s27 }
  0x14   : > { %s1036_s30 = sshll.u32 (%p50_p3), %s172_s29, 2 }
  0x15   : > { %s1376_s6 = scalar_lea.vmem %s1606_s0, %s1036_s30 }
  0x16   : > { %v191_v0 = vld [vmem:[%s1376_s6] sm:$0xf]  ;;  %v193_v1 = vld [vmem:[%s1376_s6 + $0x14] sm:$0xf]  ;;  %v195_v2 = vld [vmem:[%s1376_s6 + $0x28] sm:$0xf] }
  0x17   : > { %192 = vst [vmem:[%s1381_s7] sm:$0xf] %v191_v0  ;;  %194 = vst [vmem:[%s1381_s7 + $0x4] sm:$0xf] %v193_v1  ;;  %v197_v3 = vld [vmem:[%s1376_s6 + $0x3c] sm:$0xf] }
  0x18   : > { %196 = vst [vmem:[%s1381_s7 + $0x8] sm:$0xf] %v195_v2  ;;  %v199_v4 = vld [vmem:[%s1376_s6 + $0x50] sm:$0xf]  ;;  %v201_v5 = vld [vmem:[%s1376_s6 + $0x64] sm:$0xf] }
  0x19   : > { %198 = vst [vmem:[%s1381_s7 + $0xc] sm:$0xf] %v197_v3  ;;  %200 = vst [vmem:[%s1381_s7 + $0x10] sm:$0xf] %v199_v4  ;;  %v203_v6 = vld [vmem:[%s1376_s6 + $0x78] sm:$0xf] }
  0x1a   : > { %202 = vst [vmem:[%s1381_s7 + $0x14] sm:$0xf] %v201_v5  ;;  %v205_v7 = vld [vmem:[%s1376_s6 + $0x8c] sm:$0xf]  ;;  %v207_v8 = vld [vmem:[%s1376_s6 + $0xa0] sm:$0xf] }
  0x1b   : > { %204 = vst [vmem:[%s1381_s7 + $0x18] sm:$0xf] %v203_v6  ;;  %206 = vst [vmem:[%s1381_s7 + $0x1c] sm:$0xf] %v205_v7  ;;  %v209_v9 = vld [vmem:[%s1376_s6 + $0xb4] sm:$0xf] }
  0x1c   : > { %208 = vst [vmem:[%s1381_s7 + $0x20] sm:$0xf] %v207_v8  ;;  %v211_v10 = vld [vmem:[%s1376_s6 + $0xc8] sm:$0xf]  ;;  %v213_v11 = vld [vmem:[%s1376_s6 + $0xdc] sm:$0xf] }
  0x1d   : > { %210 = vst [vmem:[%s1381_s7 + $0x24] sm:$0xf] %v209_v9  ;;  %212 = vst [vmem:[%s1381_s7 + $0x28] sm:$0xf] %v211_v10  ;;  %v215_v12 = vld [vmem:[%s1376_s6 + $0xf0] sm:$0xf] }
  0x1e   : > { %214 = vst [vmem:[%s1381_s7 + $0x2c] sm:$0xf] %v213_v11  ;;  %v217_v13 = vld [vmem:[%s1376_s6 + $0x104] sm:$0xf]  ;;  %v219_v14 = vld [vmem:[%s1376_s6 + $0x118] sm:$0xf] }
  0x1f   : > { %216 = vst [vmem:[%s1381_s7 + $0x30] sm:$0xf] %v215_v12  ;;  %218 = vst [vmem:[%s1381_s7 + $0x34] sm:$0xf] %v217_v13  ;;  %v221_v15 = vld [vmem:[%s1376_s6 + $0x12c] sm:$0xf] }
  0x20   : > { %220 = vst [vmem:[%s1381_s7 + $0x38] sm:$0xf] %v219_v14  ;;  %v223_v16 = vld [vmem:[%s1376_s6 + $0x140] sm:$0xf]  ;;  %v225_v17 = vld [vmem:[%s1376_s6 + $0x154] sm:$0xf] }
  0x21   : > { %222 = vst [vmem:[%s1381_s7 + $0x3c] sm:$0xf] %v221_v15  ;;  %224 = vst [vmem:[%s1381_s7 + $0x40] sm:$0xf] %v223_v16  ;;  %v227_v18 = vld [vmem:[%s1376_s6 + $0x168] sm:$0xf] }
  0x22   : > { %226 = vst [vmem:[%s1381_s7 + $0x44] sm:$0xf] %v225_v17  ;;  %v229_v19 = vld [vmem:[%s1376_s6 + $0x17c] sm:$0xf]  ;;  %v231_v20 = vld [vmem:[%s1376_s6 + $0x190] sm:$0xf] }
  0x23   : > { %228 = vst [vmem:[%s1381_s7 + $0x48] sm:$0xf] %v227_v18  ;;  %230 = vst [vmem:[%s1381_s7 + $0x4c] sm:$0xf] %v229_v19  ;;  %v233_v21 = vld [vmem:[%s1376_s6 + $0x1a4] sm:$0xf] }
  0x24   : > { %232 = vst [vmem:[%s1381_s7 + $0x50] sm:$0xf] %v231_v20  ;;  %v235_v22 = vld [vmem:[%s1376_s6 + $0x1b8] sm:$0xf]  ;;  %v237_v23 = vld [vmem:[%s1376_s6 + $0x1cc] sm:$0xf] }
  0x25   : > { %234 = vst [vmem:[%s1381_s7 + $0x54] sm:$0xf] %v233_v21  ;;  %236 = vst [vmem:[%s1381_s7 + $0x58] sm:$0xf] %v235_v22  ;;  %v239_v24 = vld [vmem:[%s1376_s6 + $0x1e0] sm:$0xf] }
  0x26   : > { %238 = vst [vmem:[%s1381_s7 + $0x5c] sm:$0xf] %v237_v23  ;;  %v241_v25 = vld [vmem:[%s1376_s6 + $0x1f4] sm:$0xf]  ;;  %v243_v26 = vld [vmem:[%s1376_s6 + $0x208] sm:$0xf] }
  0x27   : > { %240 = vst [vmem:[%s1381_s7 + $0x60] sm:$0xf] %v239_v24  ;;  %242 = vst [vmem:[%s1381_s7 + $0x64] sm:$0xf] %v241_v25  ;;  %v245_v27 = vld [vmem:[%s1376_s6 + $0x21c] sm:$0xf] }
  0x28   : > { %244 = vst [vmem:[%s1381_s7 + $0x68] sm:$0xf] %v243_v26  ;;  %v247_v28 = vld [vmem:[%s1376_s6 + $0x230] sm:$0xf]  ;;  %v249_v29 = vld [vmem:[%s1376_s6 + $0x244] sm:$0xf] }
  0x29   : > { %246 = vst [vmem:[%s1381_s7 + $0x6c] sm:$0xf] %v245_v27  ;;  %248 = vst [vmem:[%s1381_s7 + $0x70] sm:$0xf] %v247_v28  ;;  %v251_v30 = vld [vmem:[%s1376_s6 + $0x258] sm:$0xf] }
  0x2a   : > { %250 = vst [vmem:[%s1381_s7 + $0x74] sm:$0xf] %v249_v29  ;;  %v253_v31 = vld [vmem:[%s1376_s6 + $0x26c] sm:$0xf]  ;;  %252 = vst [vmem:[%s1381_s7 + $0x78] sm:$0xf] %v251_v30 }
  0x2b   : > { %254 = vst [vmem:[%s1381_s7 + $0x7c] sm:$0xf] %v253_v31 }
  0x2c PF: > { %p1037_p7 = scmp.ge.s32.totalorder %s1294_s18, 1  ;;  %p353_p8 = scmp.lt.s32.totalorder %s1294_s18, 11 }
  0x2e   : > { %p354_p9 = pnand %p1037_p7, %p353_p8 }
  0x2f   : > { %s360_s8 = sand.u32 (!%p354_p9), 1, %s1270_s12   ;;  %s1039_s9 = sshll.u32 (!%p354_p9), %s1278_s14, 4 }
  0x30   : > { %357 = sbr.rel (%p354_p9) target bundleno = 337 (0x151), region = 69  ;;  %s1038_s10 = sshll.u32 (!%p354_p9), %s360_s8, 7 }
  0x31   : > { %p399_p10 = scmp.lt.s32.totalorder (!%p354_p9), %s1039_s9, 79  ;;  %s1041_s11 = sshll.u32 (!%p354_p9), %s1282_s15, 5 }
  0x32   : > { %p411_p11 = scmp.lt.s32.totalorder (!%p354_p9), %s1041_s11, 63  ;;  %s1459_s12 = scalar_lea.vmem (!%p354_p9), [#allocation2], %s1038_s10 }
  0x33   : > { %p1043_p12 = scmp.ne.s32.totalorder (!%p354_p9), %s1278_s14, 0 }
  0x35   : > { %s1623_s9 = smov (!%p399_p10, %s1039_s9), 79  ;;  %s1625_s11 = smov (!%p411_p11, %s1041_s11), 63 }
  0x36   : > { %s1040_s21 = sshll.u32 %s1623_s9, 2  ;;  %s1042_s26 = sshll.u32 %s1625_s11, 3 }
  0x37   : > { %s1452_s24 = scalar_lea.vmem %s1607_s1, %s1040_s21  ;;  %s1457_s29 = scalar_lea.vmem %s1609_s3, %s1042_s26 }
  0x38   : > { %423 = sbr.rel (%p1043_p12) target bundleno = 78 (0x4e), region = 77 }
  0x3d   : > { %v1044_v32 = vld [vmem:[%s1608_s2] ss:$0 sm:$0xff] }
  0x3e   : > { %431 = vst [vmem:[%s1457_s29] sm:$0xff] %v1044_v32  ;;  %432 = vst [vmem:[%s1457_s29 + $0x8] sm:$0xff] %v1044_v32 }
  0x3f   : > { %433 = vst [vmem:[%s1457_s29 + $0x10] sm:$0xff] %v1044_v32  ;;  %434 = vst [vmem:[%s1457_s29 + $0x18] sm:$0xff] %v1044_v32 }
  0x40   : > { %435 = vst [vmem:[%s1457_s29 + $0x20] sm:$0xff] %v1044_v32  ;;  %436 = vst [vmem:[%s1457_s29 + $0x28] sm:$0xff] %v1044_v32 }
  0x41   : > { %437 = vst [vmem:[%s1457_s29 + $0x30] sm:$0xff] %v1044_v32  ;;  %438 = vst [vmem:[%s1457_s29 + $0x38] sm:$0xff] %v1044_v32 }
  0x42   : > { %439 = vst [vmem:[%s1457_s29 + $0x40] sm:$0xff] %v1044_v32  ;;  %440 = vst [vmem:[%s1457_s29 + $0x48] sm:$0xff] %v1044_v32 }
  0x43   : > { %441 = vst [vmem:[%s1457_s29 + $0x50] sm:$0xff] %v1044_v32  ;;  %442 = vst [vmem:[%s1457_s29 + $0x58] sm:$0xff] %v1044_v32 }
  0x44   : > { %443 = vst [vmem:[%s1457_s29 + $0x60] sm:$0xff] %v1044_v32  ;;  %444 = vst [vmem:[%s1457_s29 + $0x68] sm:$0xff] %v1044_v32 }
  0x45   : > { %445 = vst [vmem:[%s1457_s29 + $0x70] sm:$0xff] %v1044_v32  ;;  %446 = vst [vmem:[%s1457_s29 + $0x78] sm:$0xff] %v1044_v32 }
  0x46   : > { %447 = vst [vmem:[%s1457_s29 + $0x80] sm:$0xff] %v1044_v32  ;;  %448 = vst [vmem:[%s1457_s29 + $0x88] sm:$0xff] %v1044_v32 }
  0x47   : > { %449 = vst [vmem:[%s1457_s29 + $0x90] sm:$0xff] %v1044_v32  ;;  %450 = vst [vmem:[%s1457_s29 + $0x98] sm:$0xff] %v1044_v32 }
  0x48   : > { %451 = vst [vmem:[%s1457_s29 + $0xa0] sm:$0xff] %v1044_v32  ;;  %452 = vst [vmem:[%s1457_s29 + $0xa8] sm:$0xff] %v1044_v32 }
  0x49   : > { %453 = vst [vmem:[%s1457_s29 + $0xb0] sm:$0xff] %v1044_v32  ;;  %454 = vst [vmem:[%s1457_s29 + $0xb8] sm:$0xff] %v1044_v32 }
  0x4a   : > { %455 = vst [vmem:[%s1457_s29 + $0xc0] sm:$0xff] %v1044_v32  ;;  %456 = vst [vmem:[%s1457_s29 + $0xc8] sm:$0xff] %v1044_v32 }
  0x4b   : > { %457 = vst [vmem:[%s1457_s29 + $0xd0] sm:$0xff] %v1044_v32  ;;  %458 = vst [vmem:[%s1457_s29 + $0xd8] sm:$0xff] %v1044_v32 }
  0x4c   : > { %459 = vst [vmem:[%s1457_s29 + $0xe0] sm:$0xff] %v1044_v32  ;;  %460 = vst [vmem:[%s1457_s29 + $0xe8] sm:$0xff] %v1044_v32 }
  0x4d   : > { %461 = vst [vmem:[%s1457_s29 + $0xf0] sm:$0xff] %v1044_v32  ;;  %462 = vst [vmem:[%s1457_s29 + $0xf8] sm:$0xff] %v1044_v32 }
  0x4e PF: > { %v1216_v33 = vld [vmem:[%s1452_s24 + $0x38] sm:$0xff]   ;;  %v1217_v34 = vld [vmem:[%s1452_s24 + $0x30] sm:$0xff]   ;;  %v1218_v35 = vld [vmem:[%s1452_s24 + $0x28] sm:$0xff]  }
  0x4f   : > { %1095 = vmatprep.subr.bf16.mxu0 %v1216_v33  ;;  %1143 = vmatprep.subr.bf16.mxu1 %v1216_v33  ;;  %v1219_v36 = vld [vmem:[%s1452_s24 + $0x20] sm:$0xff]   ;;  %v1220_v39 = vld [vmem:[%s1452_s24 + $0x18] sm:$0xff]   ;;  %v1221_v40 = vld [vmem:[%s1452_s24 + $0x10] sm:$0xff]  }
  0x50   : > { %1096 = vmatpush3.bf16.msra.mxu0 %v1216_v33  ;;  %1151 = vmatpush3.bf16.msra.mxu1 %v1216_v33  ;;  %v1224_v37 = vld [vmem:[%s1459_s12] sm:$0xff]   ;;  %v1222_v41 = vld [vmem:[%s1452_s24 + $0x8] sm:$0xff]   ;;  %v1228_v45 = vld [vmem:[%s1459_s12 + $0x10] sm:$0xff]  }
  0x51   : > { %1097 = vmatprep.subr.bf16.mxu0 %v1217_v34  ;;  %1144 = vmatprep.subr.bf16.mxu1 %v1217_v34  ;;  %v1225_v38 = vld [vmem:[%s1459_s12 + $0x40] sm:$0xff]   ;;  %v1226_v43 = vld [vmem:[%s1459_s12 + $0x8] sm:$0xff]   ;;  %v1229_v46 = vld [vmem:[%s1459_s12 + $0x50] sm:$0xff]  }
  0x52   : > { %1111 = vmatprep.mubr.bf16.mxu0 %v1224_v37  ;;  %1127 = vmatprep.mubr.bf16.mxu1 %v1225_v38  ;;  %v1223_v42 = vld [vmem:[%s1452_s24] sm:$0xff]   ;;  %v1227_v44 = vld [vmem:[%s1459_s12 + $0x48] sm:$0xff]   ;;  %v1230_v47 = vld [vmem:[%s1459_s12 + $0x18] sm:$0xff]  }
  0x53   : > { %v1231_v48 = vld [vmem:[%s1459_s12 + $0x58] sm:$0xff]   ;;  %v1232_v49 = vld [vmem:[%s1459_s12 + $0x20] sm:$0xff]   ;;  %v1234_v51 = vld [vmem:[%s1459_s12 + $0x28] sm:$0xff]  }
  0x54   : > { %1098 = vmatpush3.bf16.msra.mxu0 %v1217_v34  ;;  %1152 = vmatpush3.bf16.msra.mxu1 %v1217_v34  ;;  %v1233_v50 = vld [vmem:[%s1459_s12 + $0x60] sm:$0xff]   ;;  %v1235_v52 = vld [vmem:[%s1459_s12 + $0x68] sm:$0xff]   ;;  %v1236_v53 = vld [vmem:[%s1459_s12 + $0x30] sm:$0xff]  }
  0x55   : > { %1099 = vmatprep.subr.bf16.mxu0 %v1218_v35  ;;  %1145 = vmatprep.subr.bf16.mxu1 %v1218_v35  ;;  %v1237_v54 = vld [vmem:[%s1459_s12 + $0x70] sm:$0xff]   ;;  %v1238_v55 = vld [vmem:[%s1459_s12 + $0x38] sm:$0xff]   ;;  %v463_v61 = vld [vmem:[%s1457_s29] sm:$0xff] }
  0x56   : > { %v1239_v56 = vld [vmem:[%s1459_s12 + $0x78] sm:$0xff]   ;;  %v465_v57 = vld [vmem:[%s1457_s29 + $0x10] sm:$0xff]  ;;  %v479_v62 = vld [vmem:[%s1457_s29 + $0x80] sm:$0xff] }
  0x57   : > { %v481_v58 = vld [vmem:[%s1457_s29 + $0x90] sm:$0xff]  ;;  %v466_v3 = vld [vmem:[%s1457_s29 + $0x18] sm:$0xff]  ;;  %v464_v9 = vld [vmem:[%s1457_s29 + $0x8] sm:$0xff] }
  0x58   : > { %1100 = vmatpush3.bf16.msra.mxu0 %v1218_v35  ;;  %1153 = vmatpush3.bf16.msra.mxu1 %v1218_v35  ;;  %v482_v4 = vld [vmem:[%s1457_s29 + $0x98] sm:$0xff]  ;;  %v480_v10 = vld [vmem:[%s1457_s29 + $0x88] sm:$0xff]  ;;  %v469_v15 = vld [vmem:[%s1457_s29 + $0x30] sm:$0xff] }
  0x59   : > { %1101 = vmatprep.subr.bf16.mxu0 %v1219_v36  ;;  %1146 = vmatprep.subr.bf16.mxu1 %v1219_v36  ;;  %v485_v16 = vld [vmem:[%s1457_s29 + $0xb0] sm:$0xff]  ;;  %v467_v21 = vld [vmem:[%s1457_s29 + $0x20] sm:$0xff]  ;;  %v470_v27 = vld [vmem:[%s1457_s29 + $0x38] sm:$0xff] }
  0x5a   : > { %v483_v22 = vld [vmem:[%s1457_s29 + $0xa0] sm:$0xff]  ;;  %v486_v28 = vld [vmem:[%s1457_s29 + $0xb8] sm:$0xff]  ;;  %v468_v33 = vld [vmem:[%s1457_s29 + $0x28] sm:$0xff] }
  0x5b   : > { %v484_v34 = vld [vmem:[%s1457_s29 + $0xa8] sm:$0xff] }
  0x5c   : > { %1102 = vmatpush3.bf16.msra.mxu0 %v1219_v36  ;;  %1154 = vmatpush3.bf16.msra.mxu1 %v1219_v36 }
  0x5d   : > { %1103 = vmatprep.subr.bf16.mxu0 %v1220_v39  ;;  %1147 = vmatprep.subr.bf16.mxu1 %v1220_v39 }
  0x60   : > { %1104 = vmatpush3.bf16.msra.mxu0 %v1220_v39  ;;  %1155 = vmatpush3.bf16.msra.mxu1 %v1220_v39  ;;  %v473_v39 = vld [vmem:[%s1457_s29 + $0x50] sm:$0xff] }
  0x61   : > { %1105 = vmatprep.subr.bf16.mxu0 %v1221_v40  ;;  %1148 = vmatprep.subr.bf16.mxu1 %v1221_v40 }
  0x64   : > { %1106 = vmatpush3.bf16.msra.mxu0 %v1221_v40  ;;  %1156 = vmatpush3.bf16.msra.mxu1 %v1221_v40  ;;  %v489_v40 = vld [vmem:[%s1457_s29 + $0xd0] sm:$0xff] }
  0x65   : > { %1107 = vmatprep.subr.bf16.mxu0 %v1222_v41  ;;  %1149 = vmatprep.subr.bf16.mxu1 %v1222_v41 }
  0x68   : > { %1108 = vmatpush3.bf16.msra.mxu0 %v1222_v41  ;;  %1157 = vmatpush3.bf16.msra.mxu1 %v1222_v41 }
  0x69   : > { %1109 = vmatprep.subr.bf16.mxu0 %v1223_v42  ;;  %1150 = vmatprep.subr.bf16.mxu1 %v1223_v42 }
  0x6c   : > { %1110 = vmatpush3.bf16.msra.mxu0 %v1223_v42  ;;  %1158 = vmatpush3.bf16.msra.mxu1 %v1223_v42 }
  0x6f   : > { %1112 = vmatmul.mubr.bf16.vlgmr.msra.gmra.mxu0 %v1226_v43  ;;  %1128 = vmatmul.mubr.bf16.vlgmr.msra.gmra.mxu1 %v1227_v44 }
  0x70   : > { %1115 = vmatprep.mubr.bf16.mxu0 %v1228_v45  ;;  %1131 = vmatprep.mubr.bf16.mxu1 %v1229_v46  ;;  %v471_v45 = vld [vmem:[%s1457_s29 + $0x40] sm:$0xff] }
  0x71   : > { %v487_v46 = vld [vmem:[%s1457_s29 + $0xc0] sm:$0xff] }
  0x77   : > { %1116 = vmatmul.mubr.bf16.gmra.mxu0 %v1230_v47  ;;  %1132 = vmatmul.mubr.bf16.gmra.mxu1 %v1231_v48 }
  0x78   : > { %1119 = vmatprep.mubr.bf16.mxu0 %v1232_v49  ;;  %1135 = vmatprep.mubr.bf16.mxu1 %v1233_v50 }
  0x7f   : > { %1120 = vmatmul.mubr.bf16.gmra.mxu0 %v1234_v51  ;;  %1136 = vmatmul.mubr.bf16.gmra.mxu1 %v1235_v52  ;;  %v474_v51 = vld [vmem:[%s1457_s29 + $0x58] sm:$0xff] }
  0x80   : > { %1123 = vmatprep.mubr.bf16.mxu0 %v1236_v53  ;;  %1139 = vmatprep.mubr.bf16.mxu1 %v1237_v54  ;;  %v490_v52 = vld [vmem:[%s1457_s29 + $0xd8] sm:$0xff] }
  0x87   : > { %1124 = vmatmul.mubr.bf16.gmra.mxu0 %v1238_v55  ;;  %1140 = vmatmul.mubr.bf16.gmra.mxu1 %v1239_v56 }
 0x12f   : > { %v1113_v59 = vpop.f32.mrf.mxu0  ;;  %v1129_v60 = vpop.f32.mrf.mxu1 }
 0x130   : > { %v850_v63 = vadd.f32 %v1113_v59, %v465_v57  ;;  %v866_v0 = vadd.f32 %v1129_v60, %v481_v58  ;;  %v472_v57 = vld [vmem:[%s1457_s29 + $0x48] sm:$0xff] }
 0x131   : > { %v721_v1 = vpop.f32.mrf.mxu0  ;;  %v785_v2 = vpop.f32.mrf.mxu1  ;;  %v488_v58 = vld [vmem:[%s1457_s29 + $0xc8] sm:$0xff] }
 0x132   : > { %882 = vst [vmem:[%s1457_s29 + $0x10] sm:$0xff] %v850_v63  ;;  %898 = vst [vmem:[%s1457_s29 + $0x90] sm:$0xff] %v866_v0  ;;  %v848_v5 = vadd.f32 %v721_v1, %v463_v61  ;;  %v864_v6 = vadd.f32 %v785_v2, %v479_v62  ;;  %v477_v63 = vld [vmem:[%s1457_s29 + $0x70] sm:$0xff] }
 0x133   : > { %v1114_v7 = vpop.f32.mrf.mxu0  ;;  %v1130_v8 = vpop.f32.mrf.mxu1  ;;  %v493_v0 = vld [vmem:[%s1457_s29 + $0xf0] sm:$0xff] }
 0x134   : > { %880 = vst [vmem:[%s1457_s29] sm:$0xff] %v848_v5  ;;  %896 = vst [vmem:[%s1457_s29 + $0x80] sm:$0xff] %v864_v6  ;;  %v851_v11 = vadd.f32 %v1114_v7, %v466_v3  ;;  %v867_v12 = vadd.f32 %v1130_v8, %v482_v4  ;;  %v475_v5 = vld [vmem:[%s1457_s29 + $0x60] sm:$0xff] }
 0x135   : > { %v724_v13 = vpop.f32.mrf.mxu0  ;;  %v788_v14 = vpop.f32.mrf.mxu1  ;;  %v491_v6 = vld [vmem:[%s1457_s29 + $0xe0] sm:$0xff] }
 0x136   : > { %883 = vst [vmem:[%s1457_s29 + $0x18] sm:$0xff] %v851_v11  ;;  %899 = vst [vmem:[%s1457_s29 + $0x98] sm:$0xff] %v867_v12  ;;  %v849_v17 = vadd.f32 %v724_v13, %v464_v9  ;;  %v865_v18 = vadd.f32 %v788_v14, %v480_v10  ;;  %v478_v11 = vld [vmem:[%s1457_s29 + $0x78] sm:$0xff] }
 0x137   : > { %v1117_v19 = vpop.f32.mrf.mxu0  ;;  %v1133_v20 = vpop.f32.mrf.mxu1  ;;  %v494_v12 = vld [vmem:[%s1457_s29 + $0xf8] sm:$0xff] }
 0x138   : > { %881 = vst [vmem:[%s1457_s29 + $0x8] sm:$0xff] %v849_v17  ;;  %897 = vst [vmem:[%s1457_s29 + $0x88] sm:$0xff] %v865_v18  ;;  %v854_v23 = vadd.f32 %v1117_v19, %v469_v15  ;;  %v870_v24 = vadd.f32 %v1133_v20, %v485_v16  ;;  %v476_v17 = vld [vmem:[%s1457_s29 + $0x68] sm:$0xff] }
 0x139   : > { %v737_v25 = vpop.f32.mrf.mxu0  ;;  %v801_v26 = vpop.f32.mrf.mxu1  ;;  %v492_v18 = vld [vmem:[%s1457_s29 + $0xe8] sm:$0xff] }
 0x13a   : > { %886 = vst [vmem:[%s1457_s29 + $0x30] sm:$0xff] %v854_v23  ;;  %902 = vst [vmem:[%s1457_s29 + $0xb0] sm:$0xff] %v870_v24  ;;  %v852_v29 = vadd.f32 %v737_v25, %v467_v21  ;;  %v868_v30 = vadd.f32 %v801_v26, %v483_v22 }
 0x13b   : > { %v1118_v31 = vpop.f32.mrf.mxu0  ;;  %v1134_v32 = vpop.f32.mrf.mxu1 }
 0x13c   : > { %884 = vst [vmem:[%s1457_s29 + $0x20] sm:$0xff] %v852_v29  ;;  %900 = vst [vmem:[%s1457_s29 + $0xa0] sm:$0xff] %v868_v30  ;;  %v855_v35 = vadd.f32 %v1118_v31, %v470_v27  ;;  %v871_v36 = vadd.f32 %v1134_v32, %v486_v28 }
 0x13d   : > { %v740_v37 = vpop.f32.mrf.mxu0  ;;  %v804_v38 = vpop.f32.mrf.mxu1 }
 0x13e   : > { %887 = vst [vmem:[%s1457_s29 + $0x38] sm:$0xff] %v855_v35  ;;  %903 = vst [vmem:[%s1457_s29 + $0xb8] sm:$0xff] %v871_v36  ;;  %v853_v41 = vadd.f32 %v740_v37, %v468_v33  ;;  %v869_v42 = vadd.f32 %v804_v38, %v484_v34 }
 0x13f   : > { %v1121_v43 = vpop.f32.mrf.mxu0  ;;  %v1137_v44 = vpop.f32.mrf.mxu1 }
 0x140   : > { %885 = vst [vmem:[%s1457_s29 + $0x28] sm:$0xff] %v853_v41  ;;  %901 = vst [vmem:[%s1457_s29 + $0xa8] sm:$0xff] %v869_v42  ;;  %v858_v47 = vadd.f32 %v1121_v43, %v473_v39  ;;  %v874_v48 = vadd.f32 %v1137_v44, %v489_v40 }
 0x141   : > { %v753_v49 = vpop.f32.mrf.mxu0  ;;  %v817_v50 = vpop.f32.mrf.mxu1 }
 0x142   : > { %890 = vst [vmem:[%s1457_s29 + $0x50] sm:$0xff] %v858_v47  ;;  %906 = vst [vmem:[%s1457_s29 + $0xd0] sm:$0xff] %v874_v48  ;;  %v856_v53 = vadd.f32 %v753_v49, %v471_v45  ;;  %v872_v54 = vadd.f32 %v817_v50, %v487_v46 }
 0x143   : > { %v1122_v55 = vpop.f32.mrf.mxu0  ;;  %v1138_v56 = vpop.f32.mrf.mxu1 }
 0x144   : > { %888 = vst [vmem:[%s1457_s29 + $0x40] sm:$0xff] %v856_v53  ;;  %904 = vst [vmem:[%s1457_s29 + $0xc0] sm:$0xff] %v872_v54  ;;  %v859_v59 = vadd.f32 %v1122_v55, %v474_v51  ;;  %v875_v60 = vadd.f32 %v1138_v56, %v490_v52 }
 0x145   : > { %v756_v61 = vpop.f32.mrf.mxu0  ;;  %v820_v62 = vpop.f32.mrf.mxu1 }
 0x146   : > { %891 = vst [vmem:[%s1457_s29 + $0x58] sm:$0xff] %v859_v59  ;;  %907 = vst [vmem:[%s1457_s29 + $0xd8] sm:$0xff] %v875_v60  ;;  %v857_v1 = vadd.f32 %v756_v61, %v472_v57  ;;  %v873_v2 = vadd.f32 %v820_v62, %v488_v58 }
 0x147   : > { %v1125_v3 = vpop.f32.mrf.mxu0  ;;  %v1141_v4 = vpop.f32.mrf.mxu1 }
 0x148   : > { %889 = vst [vmem:[%s1457_s29 + $0x48] sm:$0xff] %v857_v1  ;;  %905 = vst [vmem:[%s1457_s29 + $0xc8] sm:$0xff] %v873_v2  ;;  %v862_v7 = vadd.f32 %v1125_v3, %v477_v63  ;;  %v878_v8 = vadd.f32 %v1141_v4, %v493_v0 }
 0x149   : > { %v769_v9 = vpop.f32.mrf.mxu0  ;;  %v833_v10 = vpop.f32.mrf.mxu1 }
 0x14a   : > { %894 = vst [vmem:[%s1457_s29 + $0x70] sm:$0xff] %v862_v7  ;;  %910 = vst [vmem:[%s1457_s29 + $0xf0] sm:$0xff] %v878_v8  ;;  %v860_v13 = vadd.f32 %v769_v9, %v475_v5  ;;  %v876_v14 = vadd.f32 %v833_v10, %v491_v6 }
 0x14b   : > { %v1126_v15 = vpop.f32.mrf.mxu0  ;;  %v1142_v16 = vpop.f32.mrf.mxu1 }
 0x14c   : > { %892 = vst [vmem:[%s1457_s29 + $0x60] sm:$0xff] %v860_v13  ;;  %908 = vst [vmem:[%s1457_s29 + $0xe0] sm:$0xff] %v876_v14  ;;  %v863_v19 = vadd.f32 %v1126_v15, %v478_v11  ;;  %v879_v20 = vadd.f32 %v1142_v16, %v494_v12 }
 0x14d   : > { %v772_v21 = vpop.f32.mrf.mxu0  ;;  %v836_v22 = vpop.f32.mrf.mxu1 }
 0x14e   : > { %895 = vst [vmem:[%s1457_s29 + $0x78] sm:$0xff] %v863_v19  ;;  %911 = vst [vmem:[%s1457_s29 + $0xf8] sm:$0xff] %v879_v20  ;;  %v861_v23 = vadd.f32 %v772_v21, %v476_v17  ;;  %v877_v24 = vadd.f32 %v836_v22, %v492_v18 }
 0x150   : > { %893 = vst [vmem:[%s1457_s29 + $0x68] sm:$0xff] %v861_v23  ;;  %909 = vst [vmem:[%s1457_s29 + $0xe8] sm:$0xff] %v877_v24 }
 0x151 PF: > { %s13_s18 = sadd.s32 1, %s1294_s18   ;;  %s1610_s12 = smov %s1274_s13 }
 0x152   : > { %p10_p13 = scmp.ge.s32.totalorder %s13_s18, 12   ;;  %s1611_s13 = smov %s1367_s25 }
 0x153   : > { %s1612_s14 = smov %s1286_s16  ;;  %s1613_s15 = smov %s1290_s17 }
 0x154   : > { %s1614_s16 = smov %s1617_s19  ;;  %s1615_s17 = smov %s1621_s20 }
 0x155   :  { %12 = sbr.rel (!%p10_p13) target bundleno = 4 (0x4), region = 118 }

</bundles_post_ra>
